<compile_context>
chip_gen: v5e
topology: v5e:2x2
jax: 0.10.0
libtpu: 0.0.40
codegen_flags: <defaults>
</compile_context>

<pallas_src>
import functools

import jax
import jax.numpy as jnp
from jax.experimental import pallas as pl
from jax.experimental.pallas import tpu as pltpu

NUM_CLASSES = 4     # cfg.MODEL.FCOS.NUM_CLASSES (toy)
TOPK = 4            # proposals kept per image (stand-in for NMS/top-k selection)
NPOINTS = 32        # snake contour points (DeepSnake uses 128; small for the demo)

HEAD_PAD = 128      # fused cls|reg|ctr head output padded to a full lane group
SNAKE_C_PAD = 128   # snake input / hidden channels padded to a full lane group
PRED_PAD = 8        # snake offset-pred output columns (2 real + 6 pad)

LINEAR_VMEM_LIMIT = 48 * 1024 * 1024   # headroom below v7x's 64 MiB physical VMEM
SNAKE_VMEM_LIMIT = 32 * 1024 * 1024


# ----------------------------- Pallas kernels ------------------------------

def _mm_kernel(a_ref, w_ref, b_ref, o_ref, *, relu):
    # Fused (A @ W + b) [+ ReLU]; A cast to bf16 for the MXU, accumulate in f32.
    acc = jnp.dot(a_ref[...].astype(jnp.bfloat16), w_ref[...],
                  preferred_element_type=jnp.float32)
    acc = acc + b_ref[...]
    if relu:
        acc = jnp.maximum(acc, 0.0)
    o_ref[...] = acc.astype(o_ref.dtype)


def pallas_linear(a, w, b, relu=False, bm=512, out_dtype=jnp.bfloat16):
    """Fused (a @ w + b) [+ relu]; the matmul engine behind every conv.

    * bm=512 row tiles; ragged last block handled by the pl.cdiv grid (no HBM pad).
    * weight cast to bf16 here; bias stays f32; accumulation f32 in-kernel.
    * dimension_semantics=("parallel",) lets v7x shard row tiles across both TCs.
    """
    M, K = a.shape
    N = w.shape[1]
    bm_eff = min(bm, M)
    if bm_eff != M and bm_eff % 8:
        bm_eff = ((bm_eff + 7) // 8) * 8
    grid = (pl.cdiv(M, bm_eff),)
    kern = functools.partial(_mm_kernel, relu=relu)
    return pl.pallas_call(
        kern,
        out_shape=jax.ShapeDtypeStruct((M, N), out_dtype),
        grid=grid,
        in_specs=[pl.BlockSpec((bm_eff, K), lambda i: (i, 0)),
                  pl.BlockSpec((K, N), lambda i: (0, 0)),      # VMEM-resident weight
                  pl.BlockSpec((1, N), lambda i: (0, 0))],
        out_specs=pl.BlockSpec((bm_eff, N), lambda i: (i, 0)),
        compiler_params=pltpu.CompilerParams(
            dimension_semantics=("parallel",),
            vmem_limit_bytes=LINEAR_VMEM_LIMIT),
    )(a, w.astype(jnp.bfloat16), b.astype(jnp.float32).reshape(1, N))


def lane_packed_linear(a, w, b, relu=False, out_dtype=jnp.bfloat16):
    """(a @ w + b) with lane-dense output packing.

    If N < 128, packs g = 128 // N consecutive rows into the lane dimension via a
    block-diagonal weight (A reshaped (M,K)->(M/g, g*K), W -> kron(I_g, W)), so the
    kernel stores unmasked 128-lane rows; the reshape back in glue is free
    (row-major, layout plumbing only).  MXU has slack here (these convs are
    store/launch-bound), so the g-fold extra zero-block matmul work is hidden.
    """
    M, K = a.shape
    N = w.shape[1]
    g = 1
    if N < 128 and 128 % N == 0 and M % (128 // N) == 0:
        g = 128 // N
    if g > 1:
        a = a.reshape(M // g, g * K)
        w = jnp.kron(jnp.eye(g, dtype=w.dtype), w)
        b = jnp.tile(b, g)
    out = pallas_linear(a, w, b, relu=relu, out_dtype=out_dtype)
    if g > 1:
        out = out.reshape(M, N)
    return out


def _snake_head_kernel(x_ref, ctr_ref, hwh_ref, w1_ref, b1_ref, w2_ref, b2_ref,
                       wp_ref, bp_ref, o_ref):
    """Fused DeepSnake evolution for ONE instance (grid is instance-parallel).

    circ-conv(k=3) -> ReLU -> circ-conv(k=3) -> ReLU -> 1x1 offset pred,
    then refined = contour + off * (wh/2), emitting only the (P, 2) contour.
    Circular neighbours via pltpu.roll (XLU); per-tap dots accumulate on the MXU,
    so no 3x-wide channel concat is ever materialized in VMEM.
    """
    x = x_ref[0]                                  # (P, Cpad) f32
    P = x.shape[0]

    def circ_layer(h, w_ref_, b_ref_):
        h_prev = pltpu.roll(h, 1, 0)              # point i-1 (circular)
        h_next = pltpu.roll(h, P - 1, 0)          # point i+1 (circular)
        acc = jnp.dot(h_prev.astype(jnp.bfloat16), w_ref_[0],
                      preferred_element_type=jnp.float32)
        acc = acc + jnp.dot(h.astype(jnp.bfloat16), w_ref_[1],
                            preferred_element_type=jnp.float32)
        acc = acc + jnp.dot(h_next.astype(jnp.bfloat16), w_ref_[2],
                            preferred_element_type=jnp.float32)
        return jnp.maximum(acc + b_ref_[...], 0.0)

    h = circ_layer(x, w1_ref, b1_ref)             # (P, Hpad) f32
    h = circ_layer(h, w2_ref, b2_ref)             # (P, Hpad) f32
    pred = jnp.dot(h.astype(jnp.bfloat16), wp_ref[...],
                   preferred_element_type=jnp.float32) + bp_ref[...]   # (P, PRED_PAD)
    off = pred[:, :2]                             # (P, 2)
    refined = ctr_ref[0] + off * hwh_ref[0]       # contour + off * (wh * 0.5)
    o_ref[0] = refined


def pallas_snake_head(snake_in, contour, halfwh, w1, b1, w2, b2, wp, bp):
    """Instance-parallel fused snake head; intermediates never leave VMEM."""
    N, P, Cp = snake_in.shape
    Hp = w1.shape[2]
    return pl.pallas_call(
        _snake_head_kernel,
        out_shape=jax.ShapeDtypeStruct((N, P, 2), jnp.float32),
        grid=(N,),
        in_specs=[pl.BlockSpec((1, P, Cp), lambda i: (i, 0, 0)),
                  pl.BlockSpec((1, P, 2), lambda i: (i, 0, 0)),
                  pl.BlockSpec((1, 1, 2), lambda i: (i, 0, 0)),
                  pl.BlockSpec((3, Cp, Hp), lambda i: (0, 0, 0)),
                  pl.BlockSpec((1, Hp), lambda i: (0, 0)),
                  pl.BlockSpec((3, Cp, Hp), lambda i: (0, 0, 0)),
                  pl.BlockSpec((1, Hp), lambda i: (0, 0)),
                  pl.BlockSpec((Cp, PRED_PAD), lambda i: (0, 0)),
                  pl.BlockSpec((1, PRED_PAD), lambda i: (0, 0))],
        out_specs=pl.BlockSpec((1, P, 2), lambda i: (i, 0, 0)),
        compiler_params=pltpu.CompilerParams(
            dimension_semantics=("parallel",),
            vmem_limit_bytes=SNAKE_VMEM_LIMIT),
    )(snake_in, contour, halfwh, w1, b1, w2, b2, wp, bp)


# ------------------------------ JAX glue ------------------------------------

def im2col3x3(x, stride):
    """NHWC 3x3 im2col with padding=1 (glue; the matmul is the Pallas hot path).

    TODO(synk): at real resolutions, form the 9 taps in VMEM via a halo-tiled
    BlockSpec (9 shifted K=C dots into an f32 scratch) to cut activation HBM reads
    ~9x; at these toy shapes launch overhead dominates, so the glue im2col stays.
    """
    B, H, W, C = x.shape
    xp = jnp.pad(x, ((0, 0), (1, 1), (1, 1), (0, 0)))
    Ho = (H + 2 - 3) // stride + 1
    Wo = (W + 2 - 3) // stride + 1
    cols = []
    for dy in range(3):
        for dx in range(3):
            sl = xp[:, dy:dy + (Ho - 1) * stride + 1:stride,
                    dx:dx + (Wo - 1) * stride + 1:stride, :]
            cols.append(sl)
    patches = jnp.concatenate(cols, axis=-1)
    return patches.reshape(B * Ho * Wo, 9 * C), (B, Ho, Wo)


def conv3x3(x, w, b, stride=1, relu=True, out_dtype=jnp.bfloat16):
    patches, (B, Ho, Wo) = im2col3x3(x, stride)
    out = lane_packed_linear(patches, w, b, relu=relu, out_dtype=out_dtype)
    return out.reshape(B, Ho, Wo, -1)


def bilinear_sample(feat, pts, batch_idx):
    """Bilinear gather of per-contour-point features.

    TODO(synk): data-dependent gather has no clean BlockSpec form; stays in XLA glue.
    """
    B, Hf, Wf, C = feat.shape
    x = jnp.clip(pts[..., 0], 0.0, Wf - 1.0)
    y = jnp.clip(pts[..., 1], 0.0, Hf - 1.0)
    x0 = jnp.floor(x).astype(jnp.int32)
    y0 = jnp.floor(y).astype(jnp.int32)
    x1 = jnp.minimum(x0 + 1, Wf - 1)
    y1 = jnp.minimum(y0 + 1, Hf - 1)
    wx = (x - x0.astype(jnp.float32))[..., None]
    wy = (y - y0.astype(jnp.float32))[..., None]
    b = batch_idx[:, None]
    f00 = feat[b, y0, x0]
    f01 = feat[b, y0, x1]
    f10 = feat[b, y1, x0]
    f11 = feat[b, y1, x1]
    top = f00 * (1.0 - wx) + f01 * wx
    bot = f10 * (1.0 - wx) + f11 * wx
    return (top * (1.0 - wy) + bot * wy).astype(jnp.float32)


def snake_tap_weights(w, cin, cin_pad, cout, cout_pad):
    """(3*cin, cout) circular-conv weight -> (3, cin_pad, cout_pad) per-tap blocks.

    Tap order is [prev, center, next].  NOTE: verify against the real PyTorch
    CircConv1d weight layout when porting trained checkpoints.
    """
    wt = jnp.zeros((3, cin_pad, cout_pad), jnp.float32)
    for t in range(3):
        wt = wt.at[t, :cin, :cout].set(w[t * cin:(t + 1) * cin, :])
    return wt


def init_params(key):
    """Deterministic synthetic weights (shapes implied by the module)."""
    def dense(k, fan_in, fan_out):
        k1, k2 = jax.random.split(k)
        w = jax.random.normal(k1, (fan_in, fan_out), jnp.float32) / jnp.sqrt(float(fan_in))
        b = 0.01 * jax.random.normal(k2, (fan_out,), jnp.float32)
        return w, b

    keys = jax.random.split(key, 10)
    p = {}
    # backbone / FPN (tiny synthetic stand-in for build_backbone)
    # TODO(synk): real build_backbone is a full ResNet+FPN; represented by 3 convs here.
    p['stem_w'], p['stem_b'] = dense(keys[0], 9 * 3, 16)
    p['c2_w'], p['c2_b'] = dense(keys[1], 9 * 16, 32)
    p['c3_w'], p['c3_b'] = dense(keys[2], 9 * 32, 32)
    # FCOS proposal generator head (shared across levels)
    p['tower_w'], p['tower_b'] = dense(keys[3], 9 * 32, 32)
    p['cls_w'], p['cls_b'] = dense(keys[4], 9 * 32, NUM_CLASSES)
    p['reg_w'], p['reg_b'] = dense(keys[5], 9 * 32, 4)
    p['ctr_w'], p['ctr_b'] = dense(keys[6], 9 * 32, 1)
    # SnakeFPNHead refinement: circular convs over contour points + offset pred
    p['snake1_w'], p['snake1_b'] = dense(keys[7], 3 * (32 + 2), 64)
    p['snake2_w'], p['snake2_b'] = dense(keys[8], 3 * 64, 64)
    p['pred_w'], p['pred_b'] = dense(keys[9], 64, 2)
    return p


def fcos_snake_forward(images_nchw, params, pixel_mean, pixel_std):
    B, C, H, W = images_nchw.shape
    bf16 = lambda a: a.astype(jnp.bfloat16)

    # --- self.normalizer folded away: mean subtraction fuses into the im2col glue,
    # 1/std is folded into the stem conv weights (zero conv-padding of the mean-
    # subtracted image matches zero padding of the normalized image exactly).
    # NOTE: bf16 stem inputs/weights introduce small drift vs the f32 PyTorch path.
    x = jnp.transpose(images_nchw, (0, 2, 3, 1)).astype(jnp.float32)    # NCHW -> NHWC
    x = bf16(x - pixel_mean[None, None, None, :])
    std_rep = jnp.tile(pixel_std, 9)[:, None]                           # (27, 1)
    stem_w_eff = params['stem_w'] / std_rep

    # --- backbone(images.tensor): tiny conv FPN, two output levels -------------
    c1 = conv3x3(x, stem_w_eff, params['stem_b'], stride=2, relu=True)           # stride 2
    p3 = conv3x3(c1, params['c2_w'], params['c2_b'], stride=2, relu=True)        # stride 4
    p4 = conv3x3(p3, params['c3_w'], params['c3_b'], stride=2, relu=True)        # stride 8
    features = [(p3, 4.0), (p4, 8.0)]

    # --- proposal_generator (FCOS heads + box decode + top-K) ------------------
    # Both FPN levels share the tower/head weights, so their im2col rows are
    # concatenated and each conv is a single pallas_call (fewer launches, bigger M,
    # weights DMA'd once).  cls/reg/ctr are fused into one 128-lane output conv.
    # TODO(synk): fusing tower+head into one kernel (tower activation VMEM-resident)
    # needs in-kernel 3x3 neighbourhood formation; left as a follow-up.
    lvl_patches, lvl_meta, lvl_rows = [], [], []
    for feat, stride in features:
        pt, (Bf, Hf, Wf) = im2col3x3(feat, 1)
        lvl_patches.append(pt)
        lvl_meta.append((Bf, Hf, Wf, stride))
        lvl_rows.append(pt.shape[0])
    tower_in = jnp.concatenate(lvl_patches, axis=0)                      # (sum(HW), 288)
    tower_out = lane_packed_linear(tower_in, params['tower_w'], params['tower_b'],
                                   relu=True, out_dtype=jnp.bfloat16)

    head_w = jnp.concatenate([params['cls_w'], params['reg_w'], params['ctr_w']], axis=1)
    head_w = jnp.pad(head_w, ((0, 0), (0, HEAD_PAD - (NUM_CLASSES + 5))))
    head_b = jnp.pad(jnp.concatenate([params['cls_b'], params['reg_b'], params['ctr_b']]),
                     (0, HEAD_PAD - (NUM_CLASSES + 5)))

    head_in_parts = []
    row0 = 0
    for (Bf, Hf, Wf, stride), sz in zip(lvl_meta, lvl_rows):
        t = tower_out[row0:row0 + sz].reshape(Bf, Hf, Wf, -1)
        hp_, _ = im2col3x3(t, 1)
        head_in_parts.append(hp_)
        row0 += sz
    head_in = jnp.concatenate(head_in_parts, axis=0)
    head_out = lane_packed_linear(head_in, head_w, head_b, relu=False,
                                  out_dtype=jnp.bfloat16)                # (sum(HW), 128)

    all_scores, all_boxes, all_cls = [], [], []
    row0 = 0
    for (Bf, Hf, Wf, stride), sz in zip(lvl_meta, lvl_rows):
        hl = head_out[row0:row0 + sz].astype(jnp.float32).reshape(Bf, Hf, Wf, HEAD_PAD)
        row0 += sz
        cls_logits = hl[..., :NUM_CLASSES]
        reg = hl[..., NUM_CLASSES:NUM_CLASSES + 4]
        ctr = hl[..., NUM_CLASSES + 4:NUM_CLASSES + 5]

        cx = jnp.broadcast_to(((jnp.arange(Wf, dtype=jnp.float32) + 0.5) * stride)[None, :], (Hf, Wf))
        cy = jnp.broadcast_to(((jnp.arange(Hf, dtype=jnp.float32) + 0.5) * stride)[:, None], (Hf, Wf))
        ltrb = jnp.exp(reg) * stride
        x0 = cx[None] - ltrb[..., 0]
        y0 = cy[None] - ltrb[..., 1]
        x1 = cx[None] + ltrb[..., 2]
        y1 = cy[None] + ltrb[..., 3]
        boxes = jnp.stack([x0, y0, x1, y1], axis=-1)
        prob = jax.nn.sigmoid(cls_logits) * jax.nn.sigmoid(ctr)
        all_scores.append(jnp.max(prob, axis=-1).reshape(B, -1))
        all_cls.append(jnp.argmax(prob, axis=-1).reshape(B, -1))
        all_boxes.append(boxes.reshape(B, -1, 4))

    scores = jnp.concatenate(all_scores, axis=1)
    boxes = jnp.concatenate(all_boxes, axis=1)
    labels = jnp.concatenate(all_cls, axis=1)
    # TODO(synk): real FCOS post-processing uses per-class NMS; simple per-image top-K here.
    topv, topi = jax.lax.top_k(scores, TOPK)
    boxes_k = jnp.take_along_axis(boxes, topi[..., None], axis=1)
    labels_k = jnp.take_along_axis(labels, topi, axis=1)

    Ninst = B * TOPK
    pboxes = boxes_k.reshape(Ninst, 4)
    pscores = topv.reshape(Ninst)
    plabels = labels_k.reshape(Ninst)
    batch_idx = jnp.repeat(jnp.arange(B), TOPK)

    bx0 = jnp.clip(jnp.minimum(pboxes[:, 0], pboxes[:, 2]), 0.0, W - 1.0)
    by0 = jnp.clip(jnp.minimum(pboxes[:, 1], pboxes[:, 3]), 0.0, H - 1.0)
    bx1 = jnp.clip(jnp.maximum(pboxes[:, 0], pboxes[:, 2]), 0.0, W - 1.0)
    by1 = jnp.clip(jnp.maximum(pboxes[:, 1], pboxes[:, 3]), 0.0, H - 1.0)
    bx1 = jnp.maximum(bx1, bx0 + 1.0)
    by1 = jnp.maximum(by1, by0 + 1.0)
    pboxes = jnp.stack([bx0, by0, bx1, by1], axis=-1)

    # --- refinement_head (SnakeFPNHead): get_quadrangle -> init contour --------
    ccx = (bx0 + bx1) * 0.5
    ccy = (by0 + by1) * 0.5
    ex_t = jnp.stack([ccx, by0], axis=-1)
    ex_l = jnp.stack([bx0, ccy], axis=-1)
    ex_b = jnp.stack([ccx, by1], axis=-1)
    ex_r = jnp.stack([bx1, ccy], axis=-1)
    quad = jnp.stack([ex_t, ex_l, ex_b, ex_r], axis=1)                  # (Ninst, 4, 2)
    nxt = jnp.roll(quad, -1, axis=1)
    tt = (jnp.arange(NPOINTS // 4, dtype=jnp.float32) / (NPOINTS // 4))[None, None, :, None]
    contour = (quad[:, :, None, :] * (1.0 - tt) + nxt[:, :, None, :] * tt).reshape(Ninst, NPOINTS, 2)

    feat_pts = bilinear_sample(p3, contour / 4.0, batch_idx)            # (Ninst, P, 32)
    wh = jnp.stack([bx1 - bx0, by1 - by0], axis=-1)
    center = jnp.stack([ccx, ccy], axis=-1)
    rel = (contour - center[:, None, :]) / (wh[:, None, :] * 0.5 + 1e-6)
    snake_in = jnp.concatenate([feat_pts, rel], axis=-1)                # (Ninst, P, 34)
    c_in = snake_in.shape[-1]
    snake_in = jnp.pad(snake_in, ((0, 0), (0, 0), (0, SNAKE_C_PAD - c_in)))
    halfwh = (wh * 0.5).reshape(Ninst, 1, 2)

    # Lane-padded per-tap snake weights (one fused, instance-parallel pallas_call).
    w1t = bf16(snake_tap_weights(params['snake1_w'], c_in, SNAKE_C_PAD, 64, SNAKE_C_PAD))
    b1p = jnp.pad(params['snake1_b'], (0, SNAKE_C_PAD - 64)).reshape(1, SNAKE_C_PAD)
    w2t = bf16(snake_tap_weights(params['snake2_w'], 64, SNAKE_C_PAD, 64, SNAKE_C_PAD))
    b2p = jnp.pad(params['snake2_b'], (0, SNAKE_C_PAD - 64)).reshape(1, SNAKE_C_PAD)
    wpp = bf16(jnp.zeros((SNAKE_C_PAD, PRED_PAD), jnp.float32)
               .at[:64, :2].set(params['pred_w']))
    bpp = jnp.pad(params['pred_b'], (0, PRED_PAD - 2)).reshape(1, PRED_PAD)

    refined = pallas_snake_head(snake_in, contour, halfwh, w1t, b1p, w2t, b2p, wpp, bpp)

    # --- detector_postprocess: rescale to requested output size (== input here) ---
    out_h, out_w = H, W
    scale = jnp.array([out_w / float(W), out_h / float(H)], jnp.float32)
    results = []
    for b in range(B):
        sel = slice(b * TOPK, (b + 1) * TOPK)
        results.append({
            'pred_boxes': pboxes[sel] * jnp.concatenate([scale, scale])[None, :],
            'scores': pscores[sel],
            'pred_classes': plabels[sel],
            'pred_polys': refined[sel] * scale[None, None, :],
        })
    return results


if __name__ == "__main__":
    key = jax.random.PRNGKey(0)
    k_img, k_param = jax.random.split(key)
    # batched_inputs: 2 images, each (3, 32, 32) uint8-like NCHW tensors
    images = jax.random.uniform(k_img, (2, 3, 32, 32), jnp.float32, 0.0, 255.0)
    params = init_params(k_param)
    pixel_mean = jnp.array([103.53, 116.28, 123.675], jnp.float32)   # cfg.MODEL.PIXEL_MEAN
    pixel_std = jnp.array([57.375, 57.12, 58.395], jnp.float32)      # cfg.MODEL.PIXEL_STD

    forward = jax.jit(fcos_snake_forward)
    results = forward(images, params, pixel_mean, pixel_std)
    jax.block_until_ready(results)

    # light sanity checks on output shapes / finiteness
    assert results[0]['pred_boxes'].shape == (TOPK, 4)
    assert results[0]['pred_polys'].shape == (TOPK, NPOINTS, 2)
    assert bool(jnp.all(jnp.isfinite(results[0]['pred_polys'])))
    print("KERNEL_OK")
</pallas_src>

<mosaic_0001>
module attributes {stable_mosaic.version = 11 : i64} {
  func.func @_mm_kernel(%arg0: i32, %arg1: memref<64x216xbf16, #tpu.memory_space<vmem>>, %arg2: memref<216x128xbf16, #tpu.memory_space<vmem>>, %arg3: memref<1x128xf32, #tpu.memory_space<vmem>>, %arg4: memref<64x128xbf16, #tpu.memory_space<vmem>>) attributes {dimension_semantics = [#tpu.dimension_semantics<parallel>], iteration_bounds = array<i64: 1>, scalar_prefetch = 0 : i64, scratch_operands = 0 : i64, tpu.core_type = #tpu.core_type<tc>, window_params = [{transform_indices = @transform_0, window_bounds = array<i64: 64, 216>}, {pipeline_mode = #tpu.pipeline_mode<synchronous>, transform_indices = @transform_1, window_bounds = array<i64: 216, 128>}, {pipeline_mode = #tpu.pipeline_mode<synchronous>, transform_indices = @transform_2, window_bounds = array<i64: 1, 128>}, {transform_indices = @transform_3, window_bounds = array<i64: 64, 128>}]} {
    %c0 = arith.constant 0 : index
    %c0_0 = arith.constant 0 : index
    %0 = vector.load %arg1[%c0, %c0_0] : memref<64x216xbf16, #tpu.memory_space<vmem>>, vector<64x216xbf16>
    %c0_1 = arith.constant 0 : index
    %c0_2 = arith.constant 0 : index
    %1 = vector.load %arg2[%c0_1, %c0_2] : memref<216x128xbf16, #tpu.memory_space<vmem>>, vector<216x128xbf16>
    %cst = arith.constant dense<0.000000e+00> : vector<64x128xf32>
    %2 = tpu.matmul %0, %1, %cst {dimension_numbers = #tpu.dot_dimension_numbers<[1], [0], [0], [1], [0, 0, 1, 1], [], []>} : vector<64x216xbf16>, vector<216x128xbf16>, vector<64x128xf32> -> vector<64x128xf32>
    %c0_3 = arith.constant 0 : index
    %c0_4 = arith.constant 0 : index
    %3 = vector.load %arg3[%c0_3, %c0_4] : memref<1x128xf32, #tpu.memory_space<vmem>>, vector<1x128xf32>
    %4 = vector.broadcast %3 : vector<1x128xf32> to vector<64x128xf32>
    %5 = arith.addf %2, %4 : vector<64x128xf32>
    %cst_5 = arith.constant 0.000000e+00 : f32
    %6 = vector.broadcast %cst_5 : f32 to vector<64x128xf32>
    %7 = arith.maximumf %5, %6 : vector<64x128xf32>
    %8 = arith.truncf %7 : vector<64x128xf32> to vector<64x128xbf16>
    %c0_6 = arith.constant 0 : index
    %c0_7 = arith.constant 0 : index
    %9 = vector.load %arg4[%c0_6, %c0_7] : memref<64x128xbf16, #tpu.memory_space<vmem>>, vector<64x128xbf16>
    tpu.vector_store %arg4[%c0_6, %c0_7], %8 {strides = array<i32>} : memref<64x128xbf16, #tpu.memory_space<vmem>>, vector<64x128xbf16>,
    return
  }
  func.func @transform_0(%arg0: i32) -> (i32, i32) {
    %c0_i32 = arith.constant 0 : i32
    %c0_i32_0 = arith.constant 0 : i32
    return %arg0, %c0_i32 : i32, i32
  }
  func.func @transform_1(%arg0: i32) -> (i32, i32) {
    %c0_i32 = arith.constant 0 : i32
    %c0_i32_0 = arith.constant 0 : i32
    %c0_i32_1 = arith.constant 0 : i32
    return %c0_i32, %c0_i32_0 : i32, i32
  }
  func.func @transform_2(%arg0: i32) -> (i32, i32) {
    %c0_i32 = arith.constant 0 : i32
    %c0_i32_0 = arith.constant 0 : i32
    %c0_i32_1 = arith.constant 0 : i32
    return %c0_i32, %c0_i32_0 : i32, i32
  }
  func.func @transform_3(%arg0: i32) -> (i32, i32) {
    %c0_i32 = arith.constant 0 : i32
    %c0_i32_0 = arith.constant 0 : i32
    return %arg0, %c0_i32 : i32, i32
  }
}

module attributes {stable_mosaic.version = 11 : i64} {
  func.func @_mm_kernel(%arg0: i32, %arg1: memref<32x576xbf16, #tpu.memory_space<vmem>>, %arg2: memref<576x128xbf16, #tpu.memory_space<vmem>>, %arg3: memref<1x128xf32, #tpu.memory_space<vmem>>, %arg4: memref<32x128xbf16, #tpu.memory_space<vmem>>) attributes {dimension_semantics = [#tpu.dimension_semantics<parallel>], iteration_bounds = array<i64: 1>, scalar_prefetch = 0 : i64, scratch_operands = 0 : i64, tpu.core_type = #tpu.core_type<tc>, window_params = [{transform_indices = @transform_0, window_bounds = array<i64: 32, 576>}, {pipeline_mode = #tpu.pipeline_mode<synchronous>, transform_indices = @transform_1, window_bounds = array<i64: 576, 128>}, {pipeline_mode = #tpu.pipeline_mode<synchronous>, transform_indices = @transform_2, window_bounds = array<i64: 1, 128>}, {transform_indices = @transform_3, window_bounds = array<i64: 32, 128>}]} {
    %c0 = arith.constant 0 : index
    %c0_0 = arith.constant 0 : index
    %0 = vector.load %arg1[%c0, %c0_0] : memref<32x576xbf16, #tpu.memory_space<vmem>>, vector<32x576xbf16>
    %c0_1 = arith.constant 0 : index
    %c0_2 = arith.constant 0 : index
    %1 = vector.load %arg2[%c0_1, %c0_2] : memref<576x128xbf16, #tpu.memory_space<vmem>>, vector<576x128xbf16>
    %cst = arith.constant dense<0.000000e+00> : vector<32x128xf32>
    %2 = tpu.matmul %0, %1, %cst {dimension_numbers = #tpu.dot_dimension_numbers<[1], [0], [0], [1], [0, 0, 1, 1], [], []>} : vector<32x576xbf16>, vector<576x128xbf16>, vector<32x128xf32> -> vector<32x128xf32>
    %c0_3 = arith.constant 0 : index
    %c0_4 = arith.constant 0 : index
    %3 = vector.load %arg3[%c0_3, %c0_4] : memref<1x128xf32, #tpu.memory_space<vmem>>, vector<1x128xf32>
    %4 = vector.broadcast %3 : vector<1x128xf32> to vector<32x128xf32>
    %5 = arith.addf %2, %4 : vector<32x128xf32>
    %cst_5 = arith.constant 0.000000e+00 : f32
    %6 = vector.broadcast %cst_5 : f32 to vector<32x128xf32>
    %7 = arith.maximumf %5, %6 : vector<32x128xf32>
    %8 = arith.truncf %7 : vector<32x128xf32> to vector<32x128xbf16>
    %c0_6 = arith.constant 0 : index
    %c0_7 = arith.constant 0 : index
    %9 = vector.load %arg4[%c0_6, %c0_7] : memref<32x128xbf16, #tpu.memory_space<vmem>>, vector<32x128xbf16>
    tpu.vector_store %arg4[%c0_6, %c0_7], %8 {strides = array<i32>} : memref<32x128xbf16, #tpu.memory_space<vmem>>, vector<32x128xbf16>,
    return
  }
  func.func @transform_0(%arg0: i32) -> (i32, i32) {
    %c0_i32 = arith.constant 0 : i32
    %c0_i32_0 = arith.constant 0 : i32
    return %arg0, %c0_i32 : i32, i32
  }
  func.func @transform_1(%arg0: i32) -> (i32, i32) {
    %c0_i32 = arith.constant 0 : i32
    %c0_i32_0 = arith.constant 0 : i32
    %c0_i32_1 = arith.constant 0 : i32
    return %c0_i32, %c0_i32_0 : i32, i32
  }
  func.func @transform_2(%arg0: i32) -> (i32, i32) {
    %c0_i32 = arith.constant 0 : i32
    %c0_i32_0 = arith.constant 0 : i32
    %c0_i32_1 = arith.constant 0 : i32
    return %c0_i32, %c0_i32_0 : i32, i32
  }
  func.func @transform_3(%arg0: i32) -> (i32, i32) {
    %c0_i32 = arith.constant 0 : i32
    %c0_i32_0 = arith.constant 0 : i32
    return %arg0, %c0_i32 : i32, i32
  }
}

module attributes {stable_mosaic.version = 11 : i64} {
  func.func @_mm_kernel(%arg0: i32, %arg1: memref<8x1152xbf16, #tpu.memory_space<vmem>>, %arg2: memref<1152x128xbf16, #tpu.memory_space<vmem>>, %arg3: memref<1x128xf32, #tpu.memory_space<vmem>>, %arg4: memref<8x128xbf16, #tpu.memory_space<vmem>>) attributes {dimension_semantics = [#tpu.dimension_semantics<parallel>], iteration_bounds = array<i64: 1>, scalar_prefetch = 0 : i64, scratch_operands = 0 : i64, tpu.core_type = #tpu.core_type<tc>, window_params = [{transform_indices = @transform_0, window_bounds = array<i64: 8, 1152>}, {pipeline_mode = #tpu.pipeline_mode<synchronous>, transform_indices = @transform_1, window_bounds = array<i64: 1152, 128>}, {pipeline_mode = #tpu.pipeline_mode<synchronous>, transform_indices = @transform_2, window_bounds = array<i64: 1, 128>}, {transform_indices = @transform_3, window_bounds = array<i64: 8, 128>}]} {
    %c0 = arith.constant 0 : index
    %c0_0 = arith.constant 0 : index
    %0 = vector.load %arg1[%c0, %c0_0] : memref<8x1152xbf16, #tpu.memory_space<vmem>>, vector<8x1152xbf16>
    %c0_1 = arith.constant 0 : index
    %c0_2 = arith.constant 0 : index
    %1 = vector.load %arg2[%c0_1, %c0_2] : memref<1152x128xbf16, #tpu.memory_space<vmem>>, vector<1152x128xbf16>
    %cst = arith.constant dense<0.000000e+00> : vector<8x128xf32>
    %2 = tpu.matmul %0, %1, %cst {dimension_numbers = #tpu.dot_dimension_numbers<[1], [0], [0], [1], [0, 0, 1, 1], [], []>} : vector<8x1152xbf16>, vector<1152x128xbf16>, vector<8x128xf32> -> vector<8x128xf32>
    %c0_3 = arith.constant 0 : index
    %c0_4 = arith.constant 0 : index
    %3 = vector.load %arg3[%c0_3, %c0_4] : memref<1x128xf32, #tpu.memory_space<vmem>>, vector<1x128xf32>
    %4 = vector.broadcast %3 : vector<1x128xf32> to vector<8x128xf32>
    %5 = arith.addf %2, %4 : vector<8x128xf32>
    %cst_5 = arith.constant 0.000000e+00 : f32
    %6 = vector.broadcast %cst_5 : f32 to vector<8x128xf32>
    %7 = arith.maximumf %5, %6 : vector<8x128xf32>
    %8 = arith.truncf %7 : vector<8x128xf32> to vector<8x128xbf16>
    %c0_6 = arith.constant 0 : index
    %c0_7 = arith.constant 0 : index
    %9 = vector.load %arg4[%c0_6, %c0_7] : memref<8x128xbf16, #tpu.memory_space<vmem>>, vector<8x128xbf16>
    tpu.vector_store %arg4[%c0_6, %c0_7], %8 {strides = array<i32>} : memref<8x128xbf16, #tpu.memory_space<vmem>>, vector<8x128xbf16>,
    return
  }
  func.func @transform_0(%arg0: i32) -> (i32, i32) {
    %c0_i32 = arith.constant 0 : i32
    %c0_i32_0 = arith.constant 0 : i32
    return %arg0, %c0_i32 : i32, i32
  }
  func.func @transform_1(%arg0: i32) -> (i32, i32) {
    %c0_i32 = arith.constant 0 : i32
    %c0_i32_0 = arith.constant 0 : i32
    %c0_i32_1 = arith.constant 0 : i32
    return %c0_i32, %c0_i32_0 : i32, i32
  }
  func.func @transform_2(%arg0: i32) -> (i32, i32) {
    %c0_i32 = arith.constant 0 : i32
    %c0_i32_0 = arith.constant 0 : i32
    %c0_i32_1 = arith.constant 0 : i32
    return %c0_i32, %c0_i32_0 : i32, i32
  }
  func.func @transform_3(%arg0: i32) -> (i32, i32) {
    %c0_i32 = arith.constant 0 : i32
    %c0_i32_0 = arith.constant 0 : i32
    return %arg0, %c0_i32 : i32, i32
  }
}

module attributes {stable_mosaic.version = 11 : i64} {
  func.func @_mm_kernel(%arg0: i32, %arg1: memref<40x1152xbf16, #tpu.memory_space<vmem>>, %arg2: memref<1152x128xbf16, #tpu.memory_space<vmem>>, %arg3: memref<1x128xf32, #tpu.memory_space<vmem>>, %arg4: memref<40x128xbf16, #tpu.memory_space<vmem>>) attributes {dimension_semantics = [#tpu.dimension_semantics<parallel>], iteration_bounds = array<i64: 1>, scalar_prefetch = 0 : i64, scratch_operands = 0 : i64, tpu.core_type = #tpu.core_type<tc>, window_params = [{transform_indices = @transform_0, window_bounds = array<i64: 40, 1152>}, {pipeline_mode = #tpu.pipeline_mode<synchronous>, transform_indices = @transform_1, window_bounds = array<i64: 1152, 128>}, {pipeline_mode = #tpu.pipeline_mode<synchronous>, transform_indices = @transform_2, window_bounds = array<i64: 1, 128>}, {transform_indices = @transform_3, window_bounds = array<i64: 40, 128>}]} {
    %c0 = arith.constant 0 : index
    %c0_0 = arith.constant 0 : index
    %0 = vector.load %arg1[%c0, %c0_0] : memref<40x1152xbf16, #tpu.memory_space<vmem>>, vector<40x1152xbf16>
    %c0_1 = arith.constant 0 : index
    %c0_2 = arith.constant 0 : index
    %1 = vector.load %arg2[%c0_1, %c0_2] : memref<1152x128xbf16, #tpu.memory_space<vmem>>, vector<1152x128xbf16>
    %cst = arith.constant dense<0.000000e+00> : vector<40x128xf32>
    %2 = tpu.matmul %0, %1, %cst {dimension_numbers = #tpu.dot_dimension_numbers<[1], [0], [0], [1], [0, 0, 1, 1], [], []>} : vector<40x1152xbf16>, vector<1152x128xbf16>, vector<40x128xf32> -> vector<40x128xf32>
    %c0_3 = arith.constant 0 : index
    %c0_4 = arith.constant 0 : index
    %3 = vector.load %arg3[%c0_3, %c0_4] : memref<1x128xf32, #tpu.memory_space<vmem>>, vector<1x128xf32>
    %4 = vector.broadcast %3 : vector<1x128xf32> to vector<40x128xf32>
    %5 = arith.addf %2, %4 : vector<40x128xf32>
    %cst_5 = arith.constant 0.000000e+00 : f32
    %6 = vector.broadcast %cst_5 : f32 to vector<40x128xf32>
    %7 = arith.maximumf %5, %6 : vector<40x128xf32>
    %8 = arith.truncf %7 : vector<40x128xf32> to vector<40x128xbf16>
    %c0_6 = arith.constant 0 : index
    %c0_7 = arith.constant 0 : index
    %9 = vector.load %arg4[%c0_6, %c0_7] : memref<40x128xbf16, #tpu.memory_space<vmem>>, vector<40x128xbf16>
    tpu.vector_store %arg4[%c0_6, %c0_7], %8 {strides = array<i32>} : memref<40x128xbf16, #tpu.memory_space<vmem>>, vector<40x128xbf16>,
    return
  }
  func.func @transform_0(%arg0: i32) -> (i32, i32) {
    %c0_i32 = arith.constant 0 : i32
    %c0_i32_0 = arith.constant 0 : i32
    return %arg0, %c0_i32 : i32, i32
  }
  func.func @transform_1(%arg0: i32) -> (i32, i32) {
    %c0_i32 = arith.constant 0 : i32
    %c0_i32_0 = arith.constant 0 : i32
    %c0_i32_1 = arith.constant 0 : i32
    return %c0_i32, %c0_i32_0 : i32, i32
  }
  func.func @transform_2(%arg0: i32) -> (i32, i32) {
    %c0_i32 = arith.constant 0 : i32
    %c0_i32_0 = arith.constant 0 : i32
    %c0_i32_1 = arith.constant 0 : i32
    return %c0_i32, %c0_i32_0 : i32, i32
  }
  func.func @transform_3(%arg0: i32) -> (i32, i32) {
    %c0_i32 = arith.constant 0 : i32
    %c0_i32_0 = arith.constant 0 : i32
    return %arg0, %c0_i32 : i32, i32
  }
}

module attributes {stable_mosaic.version = 11 : i64} {
  func.func @_mm_kernel(%arg0: i32, %arg1: memref<160x288xbf16, #tpu.memory_space<vmem>>, %arg2: memref<288x128xbf16, #tpu.memory_space<vmem>>, %arg3: memref<1x128xf32, #tpu.memory_space<vmem>>, %arg4: memref<160x128xbf16, #tpu.memory_space<vmem>>) attributes {dimension_semantics = [#tpu.dimension_semantics<parallel>], iteration_bounds = array<i64: 1>, scalar_prefetch = 0 : i64, scratch_operands = 0 : i64, tpu.core_type = #tpu.core_type<tc>, window_params = [{transform_indices = @transform_0, window_bounds = array<i64: 160, 288>}, {pipeline_mode = #tpu.pipeline_mode<synchronous>, transform_indices = @transform_1, window_bounds = array<i64: 288, 128>}, {pipeline_mode = #tpu.pipeline_mode<synchronous>, transform_indices = @transform_2, window_bounds = array<i64: 1, 128>}, {transform_indices = @transform_3, window_bounds = array<i64: 160, 128>}]} {
    %c0 = arith.constant 0 : index
    %c0_0 = arith.constant 0 : index
    %0 = vector.load %arg1[%c0, %c0_0] : memref<160x288xbf16, #tpu.memory_space<vmem>>, vector<160x288xbf16>
    %c0_1 = arith.constant 0 : index
    %c0_2 = arith.constant 0 : index
    %1 = vector.load %arg2[%c0_1, %c0_2] : memref<288x128xbf16, #tpu.memory_space<vmem>>, vector<288x128xbf16>
    %cst = arith.constant dense<0.000000e+00> : vector<160x128xf32>
    %2 = tpu.matmul %0, %1, %cst {dimension_numbers = #tpu.dot_dimension_numbers<[1], [0], [0], [1], [0, 0, 1, 1], [], []>} : vector<160x288xbf16>, vector<288x128xbf16>, vector<160x128xf32> -> vector<160x128xf32>
    %c0_3 = arith.constant 0 : index
    %c0_4 = arith.constant 0 : index
    %3 = vector.load %arg3[%c0_3, %c0_4] : memref<1x128xf32, #tpu.memory_space<vmem>>, vector<1x128xf32>
    %4 = vector.broadcast %3 : vector<1x128xf32> to vector<160x128xf32>
    %5 = arith.addf %2, %4 : vector<160x128xf32>
    %6 = arith.truncf %5 : vector<160x128xf32> to vector<160x128xbf16>
    %c0_5 = arith.constant 0 : index
    %c0_6 = arith.constant 0 : index
    %7 = vector.load %arg4[%c0_5, %c0_6] : memref<160x128xbf16, #tpu.memory_space<vmem>>, vector<160x128xbf16>
    tpu.vector_store %arg4[%c0_5, %c0_6], %6 {strides = array<i32>} : memref<160x128xbf16, #tpu.memory_space<vmem>>, vector<160x128xbf16>,
    return
  }
  func.func @transform_0(%arg0: i32) -> (i32, i32) {
    %c0_i32 = arith.constant 0 : i32
    %c0_i32_0 = arith.constant 0 : i32
    return %arg0, %c0_i32 : i32, i32
  }
  func.func @transform_1(%arg0: i32) -> (i32, i32) {
    %c0_i32 = arith.constant 0 : i32
    %c0_i32_0 = arith.constant 0 : i32
    %c0_i32_1 = arith.constant 0 : i32
    return %c0_i32, %c0_i32_0 : i32, i32
  }
  func.func @transform_2(%arg0: i32) -> (i32, i32) {
    %c0_i32 = arith.constant 0 : i32
    %c0_i32_0 = arith.constant 0 : i32
    %c0_i32_1 = arith.constant 0 : i32
    return %c0_i32, %c0_i32_0 : i32, i32
  }
  func.func @transform_3(%arg0: i32) -> (i32, i32) {
    %c0_i32 = arith.constant 0 : i32
    %c0_i32_0 = arith.constant 0 : i32
    return %arg0, %c0_i32 : i32, i32
  }
}

module attributes {stable_mosaic.version = 11 : i64} {
  func.func @_snake_head_kernel(%arg0: i32, %arg1: memref<1x32x128xf32, #tpu.memory_space<vmem>>, %arg2: memref<1x32x2xf32, #tpu.memory_space<vmem>>, %arg3: memref<1x1x2xf32, #tpu.memory_space<vmem>>, %arg4: memref<3x128x128xbf16, #tpu.memory_space<vmem>>, %arg5: memref<1x128xf32, #tpu.memory_space<vmem>>, %arg6: memref<3x128x128xbf16, #tpu.memory_space<vmem>>, %arg7: memref<1x128xf32, #tpu.memory_space<vmem>>, %arg8: memref<128x8xbf16, #tpu.memory_space<vmem>>, %arg9: memref<1x8xf32, #tpu.memory_space<vmem>>, %arg10: memref<1x32x2xf32, #tpu.memory_space<vmem>>) attributes {dimension_semantics = [#tpu.dimension_semantics<parallel>], iteration_bounds = array<i64: 8>, scalar_prefetch = 0 : i64, scratch_operands = 0 : i64, tpu.core_type = #tpu.core_type<tc>, window_params = [{transform_indices = @transform_0, window_bounds = array<i64: 1, 32, 128>}, {transform_indices = @transform_1, window_bounds = array<i64: 1, 32, 2>}, {transform_indices = @transform_2, window_bounds = array<i64: 1, 1, 2>}, {pipeline_mode = #tpu.pipeline_mode<synchronous>, transform_indices = @transform_3, window_bounds = array<i64: 3, 128, 128>}, {pipeline_mode = #tpu.pipeline_mode<synchronous>, transform_indices = @transform_4, window_bounds = array<i64: 1, 128>}, {pipeline_mode = #tpu.pipeline_mode<synchronous>, transform_indices = @transform_5, window_bounds = array<i64: 3, 128, 128>}, {pipeline_mode = #tpu.pipeline_mode<synchronous>, transform_indices = @transform_6, window_bounds = array<i64: 1, 128>}, {pipeline_mode = #tpu.pipeline_mode<synchronous>, transform_indices = @transform_7, window_bounds = array<i64: 128, 8>}, {pipeline_mode = #tpu.pipeline_mode<synchronous>, transform_indices = @transform_8, window_bounds = array<i64: 1, 8>}, {transform_indices = @transform_9, window_bounds = array<i64: 1, 32, 2>}]} {
    %c0 = arith.constant 0 : index
    %c0_0 = arith.constant 0 : index
    %c0_1 = arith.constant 0 : index
    %0 = vector.load %arg1[%c0, %c0_0, %c0_1] : memref<1x32x128xf32, #tpu.memory_space<vmem>>, vector<1x32x128xf32>
    %1 = vector.shape_cast %0 : vector<1x32x128xf32> to vector<32x128xf32>
    %c1_i32 = arith.constant 1 : i32
    %2 = tpu.dynamic_rotate %1 by %c1_i32 dim 0 : vector<32x128xf32>, i32 -> vector<32x128xf32>
    %c31_i32 = arith.constant 31 : i32
    %3 = tpu.dynamic_rotate %1 by %c31_i32 dim 0 : vector<32x128xf32>, i32 -> vector<32x128xf32>
    %4 = arith.truncf %2 : vector<32x128xf32> to vector<32x128xbf16>
    %c0_2 = arith.constant 0 : index
    %c0_3 = arith.constant 0 : index
    %c0_4 = arith.constant 0 : index
    %5 = vector.load %arg4[%c0_2, %c0_3, %c0_4] : memref<3x128x128xbf16, #tpu.memory_space<vmem>>, vector<1x128x128xbf16>
    %6 = vector.shape_cast %5 : vector<1x128x128xbf16> to vector<128x128xbf16>
    %cst = arith.constant dense<0.000000e+00> : vector<32x128xf32>
    %7 = tpu.matmul %4, %6, %cst {dimension_numbers = #tpu.dot_dimension_numbers<[1], [0], [0], [1], [0, 0, 1, 1], [], []>} : vector<32x128xbf16>, vector<128x128xbf16>, vector<32x128xf32> -> vector<32x128xf32>
    %8 = arith.truncf %1 : vector<32x128xf32> to vector<32x128xbf16>
    %c1 = arith.constant 1 : index
    %c0_5 = arith.constant 0 : index
    %c0_6 = arith.constant 0 : index
    %9 = vector.load %arg4[%c1, %c0_5, %c0_6] : memref<3x128x128xbf16, #tpu.memory_space<vmem>>, vector<1x128x128xbf16>
    %10 = vector.shape_cast %9 : vector<1x128x128xbf16> to vector<128x128xbf16>
    %cst_7 = arith.constant dense<0.000000e+00> : vector<32x128xf32>
    %11 = tpu.matmul %8, %10, %cst_7 {dimension_numbers = #tpu.dot_dimension_numbers<[1], [0], [0], [1], [0, 0, 1, 1], [], []>} : vector<32x128xbf16>, vector<128x128xbf16>, vector<32x128xf32> -> vector<32x128xf32>
    %12 = arith.addf %7, %11 : vector<32x128xf32>
    %13 = arith.truncf %3 : vector<32x128xf32> to vector<32x128xbf16>
    %c2 = arith.constant 2 : index
    %c0_8 = arith.constant 0 : index
    %c0_9 = arith.constant 0 : index
    %14 = vector.load %arg4[%c2, %c0_8, %c0_9] : memref<3x128x128xbf16, #tpu.memory_space<vmem>>, vector<1x128x128xbf16>
    %15 = vector.shape_cast %14 : vector<1x128x128xbf16> to vector<128x128xbf16>
    %cst_10 = arith.constant dense<0.000000e+00> : vector<32x128xf32>
    %16 = tpu.matmul %13, %15, %cst_10 {dimension_numbers = #tpu.dot_dimension_numbers<[1], [0], [0], [1], [0, 0, 1, 1], [], []>} : vector<32x128xbf16>, vector<128x128xbf16>, vector<32x128xf32> -> vector<32x128xf32>
    %17 = arith.addf %12, %16 : vector<32x128xf32>
    %c0_11 = arith.constant 0 : index
    %c0_12 = arith.constant 0 : index
    %18 = vector.load %arg5[%c0_11, %c0_12] : memref<1x128xf32, #tpu.memory_space<vmem>>, vector<1x128xf32>
    %19 = vector.broadcast %18 : vector<1x128xf32> to vector<32x128xf32>
    %20 = arith.addf %17, %19 : vector<32x128xf32>
    %cst_13 = arith.constant 0.000000e+00 : f32
    %21 = vector.broadcast %cst_13 : f32 to vector<32x128xf32>
    %22 = arith.maximumf %20, %21 : vector<32x128xf32>
    %c1_i32_14 = arith.constant 1 : i32
    %23 = tpu.dynamic_rotate %22 by %c1_i32_14 dim 0 : vector<32x128xf32>, i32 -> vector<32x128xf32>
    %c31_i32_15 = arith.constant 31 : i32
    %24 = tpu.dynamic_rotate %22 by %c31_i32_15 dim 0 : vector<32x128xf32>, i32 -> vector<32x128xf32>
    %25 = arith.truncf %23 : vector<32x128xf32> to vector<32x128xbf16>
    %c0_16 = arith.constant 0 : index
    %c0_17 = arith.constant 0 : index
    %c0_18 = arith.constant 0 : index
    %26 = vector.load %arg6[%c0_16, %c0_17, %c0_18] : memref<3x128x128xbf16, #tpu.memory_space<vmem>>, vector<1x128x128xbf16>
    %27 = vector.shape_cast %26 : vector<1x128x128xbf16> to vector<128x128xbf16>
    %cst_19 = arith.constant dense<0.000000e+00> : vector<32x128xf32>
    %28 = tpu.matmul %25, %27, %cst_19 {dimension_numbers = #tpu.dot_dimension_numbers<[1], [0], [0], [1], [0, 0, 1, 1], [], []>} : vector<32x128xbf16>, vector<128x128xbf16>, vector<32x128xf32> -> vector<32x128xf32>
    %29 = arith.truncf %22 : vector<32x128xf32> to vector<32x128xbf16>
    %c1_20 = arith.constant 1 : index
    %c0_21 = arith.constant 0 : index
    %c0_22 = arith.constant 0 : index
    %30 = vector.load %arg6[%c1_20, %c0_21, %c0_22] : memref<3x128x128xbf16, #tpu.memory_space<vmem>>, vector<1x128x128xbf16>
    %31 = vector.shape_cast %30 : vector<1x128x128xbf16> to vector<128x128xbf16>
    %cst_23 = arith.constant dense<0.000000e+00> : vector<32x128xf32>
    %32 = tpu.matmul %29, %31, %cst_23 {dimension_numbers = #tpu.dot_dimension_numbers<[1], [0], [0], [1], [0, 0, 1, 1], [], []>} : vector<32x128xbf16>, vector<128x128xbf16>, vector<32x128xf32> -> vector<32x128xf32>
    %33 = arith.addf %28, %32 : vector<32x128xf32>
    %34 = arith.truncf %24 : vector<32x128xf32> to vector<32x128xbf16>
    %c2_24 = arith.constant 2 : index
    %c0_25 = arith.constant 0 : index
    %c0_26 = arith.constant 0 : index
    %35 = vector.load %arg6[%c2_24, %c0_25, %c0_26] : memref<3x128x128xbf16, #tpu.memory_space<vmem>>, vector<1x128x128xbf16>
    %36 = vector.shape_cast %35 : vector<1x128x128xbf16> to vector<128x128xbf16>
    %cst_27 = arith.constant dense<0.000000e+00> : vector<32x128xf32>
    %37 = tpu.matmul %34, %36, %cst_27 {dimension_numbers = #tpu.dot_dimension_numbers<[1], [0], [0], [1], [0, 0, 1, 1], [], []>} : vector<32x128xbf16>, vector<128x128xbf16>, vector<32x128xf32> -> vector<32x128xf32>
    %38 = arith.addf %33, %37 : vector<32x128xf32>
    %c0_28 = arith.constant 0 : index
    %c0_29 = arith.constant 0 : index
    %39 = vector.load %arg7[%c0_28, %c0_29] : memref<1x128xf32, #tpu.memory_space<vmem>>, vector<1x128xf32>
    %40 = vector.broadcast %39 : vector<1x128xf32> to vector<32x128xf32>
    %41 = arith.addf %38, %40 : vector<32x128xf32>
    %cst_30 = arith.constant 0.000000e+00 : f32
    %42 = vector.broadcast %cst_30 : f32 to vector<32x128xf32>
    %43 = arith.maximumf %41, %42 : vector<32x128xf32>
    %44 = arith.truncf %43 : vector<32x128xf32> to vector<32x128xbf16>
    %c0_31 = arith.constant 0 : index
    %c0_32 = arith.constant 0 : index
    %45 = vector.load %arg8[%c0_31, %c0_32] : memref<128x8xbf16, #tpu.memory_space<vmem>>, vector<128x8xbf16>
    %cst_33 = arith.constant dense<0.000000e+00> : vector<32x8xf32>
    %46 = tpu.matmul %44, %45, %cst_33 {dimension_numbers = #tpu.dot_dimension_numbers<[1], [0], [0], [1], [0, 0, 1, 1], [], []>} : vector<32x128xbf16>, vector<128x8xbf16>, vector<32x8xf32> -> vector<32x8xf32>
    %c0_34 = arith.constant 0 : index
    %c0_35 = arith.constant 0 : index
    %47 = vector.load %arg9[%c0_34, %c0_35] : memref<1x8xf32, #tpu.memory_space<vmem>>, vector<1x8xf32>
    %48 = vector.broadcast %47 : vector<1x8xf32> to vector<32x8xf32>
    %49 = arith.addf %46, %48 : vector<32x8xf32>
    %50 = vector.extract_strided_slice %49 {offsets = [0, 0], sizes = [32, 2], strides = [1, 1]} : vector<32x8xf32> to vector<32x2xf32>
    %c0_36 = arith.constant 0 : index
    %c0_37 = arith.constant 0 : index
    %c0_38 = arith.constant 0 : index
    %51 = vector.load %arg2[%c0_36, %c0_37, %c0_38] : memref<1x32x2xf32, #tpu.memory_space<vmem>>, vector<1x32x2xf32>
    %52 = vector.shape_cast %51 : vector<1x32x2xf32> to vector<32x2xf32>
    %c0_39 = arith.constant 0 : index
    %c0_40 = arith.constant 0 : index
    %c0_41 = arith.constant 0 : index
    %53 = vector.load %arg3[%c0_39, %c0_40, %c0_41] : memref<1x1x2xf32, #tpu.memory_space<vmem>>, vector<1x1x2xf32>
    %54 = vector.shape_cast %53 : vector<1x1x2xf32> to vector<1x2xf32>
    %55 = vector.broadcast %54 : vector<1x2xf32> to vector<32x2xf32>
    %56 = arith.mulf %50, %55 : vector<32x2xf32>
    %57 = arith.addf %52, %56 : vector<32x2xf32>
    %c0_42 = arith.constant 0 : index
    %c0_43 = arith.constant 0 : index
    %c0_44 = arith.constant 0 : index
    %58 = vector.load %arg10[%c0_42, %c0_43, %c0_44] : memref<1x32x2xf32, #tpu.memory_space<vmem>>, vector<1x32x2xf32>
    %59 = vector.shape_cast %58 : vector<1x32x2xf32> to vector<32x2xf32>
    %60 = vector.shape_cast %57 : vector<32x2xf32> to vector<1x32x2xf32>
    tpu.vector_store %arg10[%c0_42, %c0_43, %c0_44], %60 {strides = array<i32>} : memref<1x32x2xf32, #tpu.memory_space<vmem>>, vector<1x32x2xf32>,
    return
  }
  func.func @transform_0(%arg0: i32) -> (i32, i32, i32) {
    %c0_i32 = arith.constant 0 : i32
    %c0_i32_0 = arith.constant 0 : i32
    %c0_i32_1 = arith.constant 0 : i32
    return %arg0, %c0_i32, %c0_i32_0 : i32, i32, i32
  }
  func.func @transform_1(%arg0: i32) -> (i32, i32, i32) {
    %c0_i32 = arith.constant 0 : i32
    %c0_i32_0 = arith.constant 0 : i32
    %c0_i32_1 = arith.constant 0 : i32
    return %arg0, %c0_i32, %c0_i32_0 : i32, i32, i32
  }
  func.func @transform_2(%arg0: i32) -> (i32, i32, i32) {
    %c0_i32 = arith.constant 0 : i32
    %c0_i32_0 = arith.constant 0 : i32
    %c0_i32_1 = arith.constant 0 : i32
    return %arg0, %c0_i32, %c0_i32_0 : i32, i32, i32
  }
  func.func @transform_3(%arg0: i32) -> (i32, i32, i32) {
    %c0_i32 = arith.constant 0 : i32
    %c0_i32_0 = arith.constant 0 : i32
    %c0_i32_1 = arith.constant 0 : i32
    %c0_i32_2 = arith.constant 0 : i32
    return %c0_i32, %c0_i32_0, %c0_i32_1 : i32, i32, i32
  }
  func.func @transform_4(%arg0: i32) -> (i32, i32) {
    %c0_i32 = arith.constant 0 : i32
    %c0_i32_0 = arith.constant 0 : i32
    %c0_i32_1 = arith.constant 0 : i32
    return %c0_i32, %c0_i32_0 : i32, i32
  }
  func.func @transform_5(%arg0: i32) -> (i32, i32, i32) {
    %c0_i32 = arith.constant 0 : i32
    %c0_i32_0 = arith.constant 0 : i32
    %c0_i32_1 = arith.constant 0 : i32
    %c0_i32_2 = arith.constant 0 : i32
    return %c0_i32, %c0_i32_0, %c0_i32_1 : i32, i32, i32
  }
  func.func @transform_6(%arg0: i32) -> (i32, i32) {
    %c0_i32 = arith.constant 0 : i32
    %c0_i32_0 = arith.constant 0 : i32
    %c0_i32_1 = arith.constant 0 : i32
    return %c0_i32, %c0_i32_0 : i32, i32
  }
  func.func @transform_7(%arg0: i32) -> (i32, i32) {
    %c0_i32 = arith.constant 0 : i32
    %c0_i32_0 = arith.constant 0 : i32
    %c0_i32_1 = arith.constant 0 : i32
    return %c0_i32, %c0_i32_0 : i32, i32
  }
  func.func @transform_8(%arg0: i32) -> (i32, i32) {
    %c0_i32 = arith.constant 0 : i32
    %c0_i32_0 = arith.constant 0 : i32
    %c0_i32_1 = arith.constant 0 : i32
    return %c0_i32, %c0_i32_0 : i32, i32
  }
  func.func @transform_9(%arg0: i32) -> (i32, i32, i32) {
    %c0_i32 = arith.constant 0 : i32
    %c0_i32_0 = arith.constant 0 : i32
    %c0_i32_1 = arith.constant 0 : i32
    return %arg0, %c0_i32, %c0_i32_0 : i32, i32, i32
  }
}

</mosaic_0001>

<bundles_post_ra>
// kernel: tile.38
= control target key start
LH: loop header
LB: loop body
LE: loop exit
PB: predicated region body
PF: predicated region fallthrough
CT: control target
= control target key end

     0   :  { %s22_s0 = inlined_call_operand.vmem [shape: f32[32], index: 0, kind: input, shape index: {}]   ;;  %s23_s1 = inlined_call_operand.vmem [shape: f32[4,32], index: 1, kind: output, shape index: {}]  }
   0x1   :  { %v4_v0 = vld [vmem:[%s22_s0] ss:$0 sm:$0xff] }
   0x2   :  { %5 = vst [vmem:[%s23_s1] sm:$0xf] %v4_v0 }

// kernel: tile.39
= control target key start
LH: loop header
LB: loop body
LE: loop exit
PB: predicated region body
PF: predicated region fallthrough
CT: control target
= control target key end

     0   :  { %s37_s8 = smov 32   ;;  %s38_s9 = smov 64   ;;  %vm7_vm0 = vcmask 261120   ;;  %vm13_vm1 = vcmask 1048320   ;;  %vm19_vm2 = vcmask 785920   ;;  %vm25_vm3 = vcmask 523520   ;;  %s55_s0 = inlined_call_operand.vmem [shape: f32[4,32], index: 0, kind: input, shape index: {}]   ;;  %s56_s1 = inlined_call_operand.vmem [shape: f32[1,128], index: 1, kind: output, shape index: {}]  }
   0x1   :  { %v4_v0 = vld [vmem:[%s55_s0] sm:$0xf]  ;;  %s36_s0 = smov 96  }
   0x2   :  { %5 = vst [vmem:[#allocation1] sm:$0xf] %v4_v0 }
   0x9   :  { %v10_v1 = vld [vmem:[#allocation1 + $0x3] sm:$0x1]   ;;  %v22_v2 = vld [vmem:[#allocation1 + $0x1] sm:$0x1]   ;;  %v16_v3 = vld [vmem:[#allocation1 + $0x2] sm:$0x1]  }
   0xa   :  { %11 = vrot.lane.b32.xlu0 %v10_v1, %s36_s0  ;;  %23 = vrot.lane.b32.xlu1 %v22_v2, %s37_s8  ;;  %v6_v4 = vld [vmem:[#allocation1] sm:$0x1]  }
   0xb   :  { %8 = vst.msk [vmem:[#allocation0] sm:$0x1] %vm7_vm0, %v6_v4  }
  0x12   :  { %17 = vrot.lane.b32.xlu0 %v16_v3, %s38_s9 }
  0x7c   :  { %v12_v5 = vpop.permute.xlu0 %11   ;;  %v24_v6 = vpop.permute.xlu1 %23  }
  0x7d   :  { %14 = vst.msk [vmem:[#allocation0] sm:$0x1] %vm13_vm1, %v12_v5  }
  0x84   :  { %v18_v7 = vpop.permute.xlu0 %17  }
  0x85   :  { %20 = vst.msk [vmem:[#allocation0] sm:$0x1] %vm19_vm2, %v18_v7  }
  0x86   :  { %26 = vst.msk [vmem:[#allocation0] sm:$0x1] %vm25_vm3, %v24_v6  }
  0x8d   :  { %v29_v8 = vld [vmem:[#allocation0] sm:$0x1] }
  0x8e   :  { %32 = vst [vmem:[%s56_s1] sm:$0x1] %v29_v8 }

// kernel: tile.33
= control target key start
LH: loop header
LB: loop body
LE: loop exit
PB: predicated region body
PF: predicated region fallthrough
CT: control target
= control target key end

     0   :  { %s22_s0 = inlined_call_operand.vmem [shape: f32[16], index: 0, kind: input, shape index: {}]   ;;  %s23_s1 = inlined_call_operand.vmem [shape: f32[8,16], index: 1, kind: output, shape index: {}]  }
   0x1   :  { %v4_v0 = vld [vmem:[%s22_s0] ss:$0 sm:$0xff] }
   0x2   :  { %5 = vst [vmem:[%s23_s1] sm:$0xff] %v4_v0 }

// kernel: tile.34
= control target key start
LH: loop header
LB: loop body
LE: loop exit
PB: predicated region body
PF: predicated region fallthrough
CT: control target
= control target key end

     0   :  { %s67_s10 = smov 112   ;;  %s68_s11 = smov 80   ;;  %vm3_vm0 = vcmask 130048   ;;  %vm9_vm1 = vcmask 1048448   ;;  %vm15_vm2 = vcmask 917248   ;;  %vm21_vm3 = vcmask 786048   ;;  %s111_s0 = inlined_call_operand.vmem [shape: f32[8,16], index: 0, kind: input, shape index: {}]   ;;  %s112_s1 = inlined_call_operand.vmem [shape: f32[1,128], index: 1, kind: output, shape index: {}]  }
   0x1   :  { %v53_v0 = vld [vmem:[%s111_s0 + $0x7] sm:$0x1]   ;;  %v55_v1 = vld [vmem:[%s111_s0 + $0x5] sm:$0x1]   ;;  %v57_v2 = vld [vmem:[%s111_s0 + $0x3] sm:$0x1]  }
   0x2   :  { %7 = vrot.lane.b32.xlu0 %v53_v0, %s67_s10  ;;  %19 = vrot.lane.b32.xlu1 %v55_v1, %s68_s11  ;;  %s69_s14 = smov 48   ;;  %v54_v3 = vld [vmem:[%s111_s0 + $0x6] sm:$0x1]   ;;  %v56_v4 = vld [vmem:[%s111_s0 + $0x4] sm:$0x1]   ;;  %s70_s21 = smov 96  }
   0x3   :  { %31 = vrot.lane.b32.xlu2 %v57_v2, %s69_s14  ;;  %v58_v5 = vld [vmem:[%s111_s0 + $0x2] sm:$0x1]   ;;  %s71_s22 = smov 64   ;;  %s72_s23 = smov 32   ;;  %v59_v6 = vld [vmem:[%s111_s0 + $0x1] sm:$0x1]  }
   0x4   :  { %s73_s26 = smov 16   ;;  %v2_v7 = vld [vmem:[%s111_s0] sm:$0x1]   ;;  %vm27_vm4 = vcmask 654848   ;;  %vm33_vm5 = vcmask 523648   ;;  %vm39_vm6 = vcmask 392448  }
   0x5   :  { %4 = vst.msk [vmem:[#allocation0] sm:$0x1] %vm3_vm0, %v2_v7   ;;  %vm45_vm7 = vcmask 261248  }
   0xa   :  { %13 = vrot.lane.b32.xlu0 %v54_v3, %s70_s21  ;;  %25 = vrot.lane.b32.xlu1 %v56_v4, %s71_s22 }
   0xb   :  { %37 = vrot.lane.b32.xlu2 %v58_v5, %s72_s23 }
  0x12   :  { %43 = vrot.lane.b32.xlu0 %v59_v6, %s73_s26 }
  0x5d   :  { %v32_v8 = vpop.permute.xlu2 %31  }
  0x65   :  { %v38_v9 = vpop.permute.xlu2 %37  }
  0x74   :  { %v8_v10 = vpop.permute.xlu0 %7   ;;  %v20_v11 = vpop.permute.xlu1 %19  }
  0x75   :  { %10 = vst.msk [vmem:[#allocation0] sm:$0x1] %vm9_vm1, %v8_v10  }
  0x7c   :  { %v14_v12 = vpop.permute.xlu0 %13   ;;  %v26_v13 = vpop.permute.xlu1 %25  }
  0x7d   :  { %16 = vst.msk [vmem:[#allocation0] sm:$0x1] %vm15_vm2, %v14_v12  }
  0x7e   :  { %22 = vst.msk [vmem:[#allocation0] sm:$0x1] %vm21_vm3, %v20_v11  }
  0x7f   :  { %28 = vst.msk [vmem:[#allocation0] sm:$0x1] %vm27_vm4, %v26_v13  }
  0x80   :  { %34 = vst.msk [vmem:[#allocation0] sm:$0x1] %vm33_vm5, %v32_v8  }
  0x81   :  { %40 = vst.msk [vmem:[#allocation0] sm:$0x1] %vm39_vm6, %v38_v9  }
  0x84   :  { %v44_v14 = vpop.permute.xlu0 %43  }
  0x85   :  { %46 = vst.msk [vmem:[#allocation0] sm:$0x1] %vm45_vm7, %v44_v14  }
  0x8c   :  { %v49_v15 = vld [vmem:[#allocation0] sm:$0x1] }
  0x8d   :  { %52 = vst [vmem:[%s112_s1] sm:$0x1] %v49_v15 }

// kernel: tile.28
= control target key start
LH: loop header
LB: loop body
LE: loop exit
PB: predicated region body
PF: predicated region fallthrough
CT: control target
= control target key end

     0   :  { %s28_s0 = inlined_call_operand.vmem [shape: f32[3], index: 0, kind: input, shape index: {}]   ;;  %s29_s1 = inlined_call_operand.vmem [shape: f32[9,3], index: 1, kind: output, shape index: {}]  }
   0x1   :  { %v4_v0 = vld [vmem:[%s28_s0] ss:$0 sm:$0xff] }
   0x2   :  { %5 = vst [vmem:[%s29_s1] sm:$0xff] %v4_v0 }
   0x3   :  { %8 = vst [vmem:[%s29_s1 + $0x8] sm:$0xff] %v4_v0 }

// kernel: div.17
= control target key start
LH: loop header
LB: loop body
LE: loop exit
PB: predicated region body
PF: predicated region fallthrough
CT: control target
= control target key end

     0   :  { %s75_s10 = smov 24   ;;  %s76_s11 = smov 18   ;;  %vm3_vm0 = vcmask 23552   ;;  %vm9_vm1 = vcmask 220352   ;;  %vm15_vm2 = vcmask 195752   ;;  %vm21_vm3 = vcmask 171152   ;;  %s123_s0 = inlined_call_operand.vmem [shape: f32[9,3], index: 0, kind: input, shape index: {}]   ;;  %s124_s1 = inlined_call_operand.vmem [shape: f32[27], index: 1, kind: output, shape index: {}]  }
   0x1   :  { %v59_v0 = vld [vmem:[%s123_s0 + $0x8] sm:$0x1]   ;;  %v61_v1 = vld [vmem:[%s123_s0 + $0x6] sm:$0x1]   ;;  %v63_v2 = vld [vmem:[%s123_s0 + $0x4] sm:$0x1]  }
   0x2   :  { %7 = vrot.lane.b32.xlu0 %v59_v0, %s75_s10  ;;  %19 = vrot.lane.b32.xlu1 %v61_v1, %s76_s11  ;;  %s77_s14 = smov 12   ;;  %v60_v3 = vld [vmem:[%s123_s0 + $0x7] sm:$0x1]   ;;  %v62_v4 = vld [vmem:[%s123_s0 + $0x5] sm:$0x1]   ;;  %s78_s19 = smov 21  }
   0x3   :  { %31 = vrot.lane.b32.xlu2 %v63_v2, %s77_s14  ;;  %s79_s20 = smov 15   ;;  %v64_v5 = vld [vmem:[%s123_s0 + $0x3] sm:$0x1]   ;;  %s80_s23 = smov 9   ;;  %v65_v6 = vld [vmem:[%s123_s0 + $0x2] sm:$0x1]  }
   0x4   :  { %v66_v7 = vld [vmem:[%s123_s0 + $0x1] sm:$0x1]   ;;  %s81_s28 = smov 6   ;;  %s82_s29 = smov 3   ;;  %v2_v8 = vld [vmem:[%s123_s0] sm:$0x1]  }
   0x5   :  { %4 = vst.msk [vmem:[#allocation0] sm:$0x1] %vm3_vm0, %v2_v8   ;;  %vm27_vm4 = vcmask 146552   ;;  %vm33_vm5 = vcmask 121952   ;;  %vm39_vm6 = vcmask 97352   ;;  %vm45_vm7 = vcmask 72752  }
   0x6   :  { %vm51_vm8 = vcmask 48152  }
   0xa   :  { %13 = vrot.lane.b32.xlu0 %v60_v3, %s78_s19  ;;  %25 = vrot.lane.b32.xlu1 %v62_v4, %s79_s20 }
   0xb   :  { %37 = vrot.lane.b32.xlu2 %v64_v5, %s80_s23 }
  0x12   :  { %43 = vrot.lane.b32.xlu0 %v65_v6, %s81_s28  ;;  %49 = vrot.lane.b32.xlu1 %v66_v7, %s82_s29 }
  0x5d   :  { %v32_v9 = vpop.permute.xlu2 %31  }
  0x65   :  { %v38_v10 = vpop.permute.xlu2 %37  }
  0x74   :  { %v8_v11 = vpop.permute.xlu0 %7   ;;  %v20_v12 = vpop.permute.xlu1 %19  }
  0x75   :  { %10 = vst.msk [vmem:[#allocation0] sm:$0x1] %vm9_vm1, %v8_v11  }
  0x7c   :  { %v14_v13 = vpop.permute.xlu0 %13   ;;  %v26_v14 = vpop.permute.xlu1 %25  }
  0x7d   :  { %16 = vst.msk [vmem:[#allocation0] sm:$0x1] %vm15_vm2, %v14_v13  }
  0x7e   :  { %22 = vst.msk [vmem:[#allocation0] sm:$0x1] %vm21_vm3, %v20_v12  }
  0x7f   :  { %28 = vst.msk [vmem:[#allocation0] sm:$0x1] %vm27_vm4, %v26_v14  }
  0x80   :  { %34 = vst.msk [vmem:[#allocation0] sm:$0x1] %vm33_vm5, %v32_v9  }
  0x81   :  { %40 = vst.msk [vmem:[#allocation0] sm:$0x1] %vm39_vm6, %v38_v10  }
  0x84   :  { %v44_v15 = vpop.permute.xlu0 %43   ;;  %v50_v16 = vpop.permute.xlu1 %49  }
  0x85   :  { %46 = vst.msk [vmem:[#allocation0] sm:$0x1] %vm45_vm7, %v44_v15  }
  0x86   :  { %52 = vst.msk [vmem:[#allocation0] sm:$0x1] %vm51_vm8, %v50_v16  }
  0x8d   :  { %v55_v17 = vld [vmem:[#allocation0] sm:$0x1] }
  0x8e   :  { %58 = vst [vmem:[%s124_s1] sm:$0x1] %v55_v17 }

// kernel: fcos_snake_forward.6
= control target key start
LH: loop header
LB: loop body
LE: loop exit
PB: predicated region body
PF: predicated region fallthrough
CT: control target
= control target key end

     0   :  { %vm184_vm0 = vcmask 1043456   ;;  %vm171_vm1 = vcmask 719872   ;;  %s550_s1 = inlined_call_operand.vmem [shape: bf16[216,128], index: 1, kind: input, shape index: {}]   ;;  %s551_s2 = inlined_call_operand.vmem [shape: f32[1,128], index: 2, kind: input, shape index: {}]   ;;  %s552_s0 = inlined_call_operand.vmem [shape: bf16[64,216], index: 0, kind: input, shape index: {}]   ;;  %s553_s3 = inlined_call_operand.vmem [shape: bf16[64,128], index: 3, kind: output, shape index: {}]  }
   0x1   :  { %v377_v0 = vld [vmem:[%s550_s1 + $0x38] sm:$0xff]  ;;  %v49_v1 = vld [vmem:[%s550_s1 + $0x68] sm:$0xf]  ;;  %v376_v3 = vld [vmem:[%s550_s1 + $0x30] sm:$0xff] }
   0x2   :  { %v143_v2 = vunpack.c.l.b16 %v49_v1  ;;  %188 = vmatpush.bf16.msra.mxu0 %v377_v0  ;;  %406 = vmatpush.bf16.msra.mxu2 %v377_v0  ;;  %v382_v6 = vld [vmem:[%s550_s1 + $0x60] sm:$0xff]  ;;  %v375_v7 = vld [vmem:[%s550_s1 + $0x28] sm:$0xff]  ;;  %v381_v8 = vld [vmem:[%s550_s1 + $0x58] sm:$0xff] }
   0x3   :  { %v374_v9 = vld [vmem:[%s550_s1 + $0x20] sm:$0xff]  ;;  %v380_v10 = vld [vmem:[%s550_s1 + $0x50] sm:$0xff]  ;;  %v373_v11 = vld [vmem:[%s550_s1 + $0x18] sm:$0xff] }
   0x4   :  { %v157_v4 = vpack.c.b16 %v143_v2, %v143_v2  ;;  %v379_v12 = vld [vmem:[%s550_s1 + $0x48] sm:$0xff]  ;;  %v372_v13 = vld [vmem:[%s550_s1 + $0x10] sm:$0xff]  ;;  %v378_v14 = vld [vmem:[%s550_s1 + $0x40] sm:$0xff] }
   0x5   :  { %v371_v15 = vld [vmem:[%s550_s1 + $0x8] sm:$0xff]  ;;  %v364_v16 = vld [vmem:[%s552_s0 + $0x14] sm:$0xf]  ;;  %v286_v17 = vld [vmem:[%s552_s0 + $0x18] sm:$0xf0] }
   0x6   :  { %v186_v5 = vsel %vm184_vm0, %v157_v4, 0  ;;  %189 = vmatpush.bf16.msra.mxu0 %v376_v3  ;;  %407 = vmatpush.bf16.msra.mxu2 %v376_v3  ;;  %v362_v18 = vld [vmem:[%s552_s0 + $0x4] sm:$0xf]  ;;  %v278_v19 = vld [vmem:[%s552_s0 + $0x8] sm:$0xf0]  ;;  %v289_v20 = vor.u32 %v364_v16, %v286_v17 }
   0x7   :  { %414 = vmatpush.bf16.msra.mxu3 %v186_v5  ;;  %219 = vmatpush.bf16.msra.mxu1 %v186_v5  ;;  %v370_v21 = vld [vmem:[%s550_s1] sm:$0xff]  ;;  %v363_v23 = vld [vmem:[%s552_s0 + $0x4] sm:$0xf0]  ;;  %v281_v24 = vor.u32 %v362_v18, %v278_v19  ;;  %v294_v30 = vld [vmem:[%s552_s0 + $0x28] sm:$0xf0] }
   0x8   :  { %v276_v22 = vld [vmem:[%s552_s0] sm:$0xf]  ;;  %v367_v26 = vld [vmem:[%s552_s0 + $0x24] sm:$0xf0]  ;;  %v366_v29 = vld [vmem:[%s552_s0 + $0x24] sm:$0xf] }
   0x9   :  { %v292_v25 = vld [vmem:[%s552_s0 + $0x20] sm:$0xf]  ;;  %v277_v27 = vor.u32 %v363_v23, %v276_v22  ;;  %v297_v31 = vor.u32 %v366_v29, %v294_v30  ;;  %v284_v32 = vld [vmem:[%s552_s0 + $0x10] sm:$0xf]  ;;  %v365_v33 = vld [vmem:[%s552_s0 + $0x14] sm:$0xf0] }
   0xa   :  { %190 = vmatpush.bf16.msra.mxu0 %v375_v7  ;;  %408 = vmatpush.bf16.msra.mxu2 %v375_v7  ;;  %v293_v28 = vor.u32 %v367_v26, %v292_v25  ;;  %v300_v34 = vld [vmem:[%s552_s0 + $0x30] sm:$0xf]  ;;  %v369_v35 = vld [vmem:[%s552_s0 + $0x34] sm:$0xf0]  ;;  %v285_v36 = vor.u32 %v365_v33, %v284_v32  ;;  %v368_v38 = vld [vmem:[%s552_s0 + $0x34] sm:$0xf] }
   0xb   :  { %415 = vmatpush.bf16.msra.mxu3 %v382_v6  ;;  %220 = vmatpush.bf16.msra.mxu1 %v382_v6  ;;  %v301_v37 = vor.u32 %v369_v35, %v300_v34  ;;  %v302_v39 = vld [vmem:[%s552_s0 + $0x38] sm:$0xf0]  ;;  %v420_v42 = vld [vmem:[%s551_s2] ss:$0 sm:$0xff] }
   0xc   :  { %v305_v40 = vor.u32 %v368_v38, %v302_v39 }
   0xe   :  { %191 = vmatpush.bf16.msra.mxu0 %v374_v9  ;;  %409 = vmatpush.bf16.msra.mxu2 %v374_v9 }
   0xf   :  { %416 = vmatpush.bf16.msra.mxu3 %v381_v8  ;;  %221 = vmatpush.bf16.msra.mxu1 %v381_v8 }
  0x12   :  { %192 = vmatpush.bf16.msra.mxu0 %v373_v11  ;;  %410 = vmatpush.bf16.msra.mxu2 %v373_v11 }
  0x13   :  { %417 = vmatpush.bf16.msra.mxu3 %v380_v10  ;;  %222 = vmatpush.bf16.msra.mxu1 %v380_v10 }
  0x16   :  { %193 = vmatpush.bf16.msra.mxu0 %v372_v13  ;;  %411 = vmatpush.bf16.msra.mxu2 %v372_v13 }
  0x17   :  { %418 = vmatpush.bf16.msra.mxu3 %v379_v12  ;;  %223 = vmatpush.bf16.msra.mxu1 %v379_v12 }
  0x1a   :  { %194 = vmatpush.bf16.msra.mxu0 %v371_v15  ;;  %412 = vmatpush.bf16.msra.mxu2 %v371_v15 }
  0x1b   :  { %419 = vmatpush.bf16.msra.mxu3 %v378_v14  ;;  %224 = vmatpush.bf16.msra.mxu1 %v378_v14 }
  0x1e   :  { %359 = vmatmul.msk.bf16.vlgmr.msra.gmra.mxu3 %vm171_vm1, %v289_v20  ;;  %195 = vmatpush.bf16.msra.mxu0 %v370_v21 }
  0x1f   :  { %358 = vmatmul.msk.bf16.vlgmr.msra.gmra.mxu1 %vm171_vm1, %v281_v24  ;;  %413 = vmatpush.bf16.msra.mxu2 %v370_v21 }
  0x21   :  { %196 = vmatmul.bf16.vlgmr.msra.gmra.mxu0 %v277_v27 }
  0x22   :  { %206 = vmatmul.bf16.vlgmr.msra.gmra.mxu2 %v293_v28 }
  0x2e   :  { %360 = vmatmul.msk.bf16.gmra.mxu3 %vm171_vm1, %v297_v31 }
  0x31   :  { %201 = vmatmul.bf16.gmra.mxu0 %v285_v36 }
  0x32   :  { %211 = vmatmul.bf16.gmra.mxu2 %v301_v37 }
  0x3e   :  { %361 = vmatmul.msk.bf16.gmra.mxu3 %vm171_vm1, %v305_v40 }
  0x9c   :  { %v226_v41 = vpop.f32.mrf.mxu1 }
  0x9e   :  { %v197_v43 = vpop.f32.mrf.mxu0 }
  0x9f   :  { %v198_v45 = vadd.f32 %v420_v42, %v197_v43 }
  0xa1   :  { %v231_v44 = vpop.f32.mrf.mxu3  ;;  %v227_v46 = vadd.f32 %v226_v41, %v198_v45 }
  0xa3   :  { %v246_v52 = vmax.f32 %v227_v46, 0.0 }
  0xa4   :  { %v228_v47 = vpop.f32.mrf.mxu1 }
  0xa5   :  { %v207_v48 = vpop.f32.mrf.mxu2 }
  0xa6   :  { %v199_v49 = vpop.f32.mrf.mxu0  ;;  %v208_v59 = vadd.f32 %v420_v42, %v207_v48 }
  0xa7   :  { %v200_v50 = vadd.f32 %v420_v42, %v199_v49 }
  0xa9   :  { %v233_v51 = vpop.f32.mrf.mxu3  ;;  %v229_v53 = vadd.f32 %v228_v47, %v200_v50 }
  0xab   :  { %v247_v54 = vmax.f32 %v229_v53, 0.0 }
  0xad   :  { %v386_v55 = vpack.c.bf16 %v247_v54, %v246_v52  ;;  %v209_v57 = vpop.f32.mrf.mxu2 }
  0xae   :  { %v202_v56 = vpop.f32.mrf.mxu0  ;;  %v210_v62 = vadd.f32 %v420_v42, %v209_v57 }
  0xaf   :  { %387 = vst [vmem:[%s553_s3] sm:$0xff] %v386_v55   ;;  %v203_v60 = vadd.f32 %v420_v42, %v202_v56 }
  0xb1   :  { %v236_v58 = vpop.f32.mrf.mxu3  ;;  %v232_v63 = vadd.f32 %v231_v44, %v203_v60 }
  0xb2   :  { %v237_v0 = vadd.f32 %v236_v58, %v208_v59 }
  0xb3   :  { %v248_v6 = vmax.f32 %v232_v63, 0.0 }
  0xb4   :  { %v250_v7 = vmax.f32 %v237_v0, 0.0 }
  0xb5   :  { %v212_v5 = vpop.f32.mrf.mxu2 }
  0xb6   :  { %v204_v61 = vpop.f32.mrf.mxu0  ;;  %v213_v13 = vadd.f32 %v420_v42, %v212_v5 }
  0xb7   :  { %v205_v1 = vadd.f32 %v420_v42, %v204_v61 }
  0xb9   :  { %v238_v2 = vpop.f32.mrf.mxu3  ;;  %v234_v3 = vadd.f32 %v233_v51, %v205_v1 }
  0xba   :  { %v239_v4 = vadd.f32 %v238_v2, %v210_v62 }
  0xbb   :  { %v249_v8 = vmax.f32 %v234_v3, 0.0 }
  0xbc   :  { %v251_v9 = vmax.f32 %v239_v4, 0.0 }
  0xbd   :  { %v391_v10 = vpack.c.bf16 %v249_v8, %v248_v6  ;;  %v214_v14 = vpop.f32.mrf.mxu2 }
  0xbe   :  { %v396_v11 = vpack.c.bf16 %v251_v9, %v250_v7  ;;  %v215_v15 = vadd.f32 %v420_v42, %v214_v14 }
  0xbf   :  { %403 = vst [vmem:[%s553_s3 + $0x8] sm:$0xff] %v391_v10  }
  0xc0   :  { %404 = vst [vmem:[%s553_s3 + $0x10] sm:$0xff] %v396_v11  }
  0xc1   :  { %v241_v12 = vpop.f32.mrf.mxu3 }
  0xc2   :  { %v242_v16 = vadd.f32 %v241_v12, %v213_v13 }
  0xc4   :  { %v252_v19 = vmax.f32 %v242_v16, 0.0 }
  0xc9   :  { %v243_v17 = vpop.f32.mrf.mxu3 }
  0xca   :  { %v244_v18 = vadd.f32 %v243_v17, %v215_v15 }
  0xcc   :  { %v253_v20 = vmax.f32 %v244_v18, 0.0 }
  0xce   :  { %v401_v21 = vpack.c.bf16 %v253_v20, %v252_v19 }
  0xd0   :  { %405 = vst [vmem:[%s553_s3 + $0x18] sm:$0xff] %v401_v21  }

// kernel: fcos_snake_forward.7
= control target key start
LH: loop header
LB: loop body
LE: loop exit
PB: predicated region body
PF: predicated region fallthrough
CT: control target
= control target key end

     0   :  { %vm369_vm0 = vcmask 523264   ;;  %s932_s1 = inlined_call_operand.vmem [shape: bf16[576,128], index: 1, kind: input, shape index: {}]   ;;  %s933_s2 = inlined_call_operand.vmem [shape: f32[1,128], index: 2, kind: input, shape index: {}]   ;;  %s934_s0 = inlined_call_operand.vmem [shape: bf16[32,576], index: 0, kind: input, shape index: {}]   ;;  %s935_s3 = inlined_call_operand.vmem [shape: bf16[32,128], index: 3, kind: output, shape index: {}]  }
   0x1   :  { %v690_v0 = vld [vmem:[%s932_s1 + $0x38] sm:$0xff]  ;;  %v689_v4 = vld [vmem:[%s932_s1 + $0x30] sm:$0xff]  ;;  %v688_v8 = vld [vmem:[%s932_s1 + $0x28] sm:$0xff] }
   0x2   :  { %v698_v1 = vld [vmem:[%s932_s1 + $0x78] sm:$0xff]  ;;  %376 = vmatpush.bf16.msra.mxu0 %v690_v0  ;;  %v697_v5 = vld [vmem:[%s932_s1 + $0x70] sm:$0xff]  ;;  %v696_v9 = vld [vmem:[%s932_s1 + $0x68] sm:$0xff] }
   0x3   :  { %v706_v2 = vld [vmem:[%s932_s1 + $0xb8] sm:$0xff]  ;;  %395 = vmatpush.bf16.msra.mxu1 %v698_v1  ;;  %v705_v6 = vld [vmem:[%s932_s1 + $0xb0] sm:$0xff]  ;;  %v704_v10 = vld [vmem:[%s932_s1 + $0xa8] sm:$0xff] }
   0x4   :  { %v714_v3 = vld [vmem:[%s932_s1 + $0xf8] sm:$0xff]  ;;  %414 = vmatpush.bf16.msra.mxu2 %v706_v2  ;;  %v713_v7 = vld [vmem:[%s932_s1 + $0xf0] sm:$0xff]  ;;  %v712_v11 = vld [vmem:[%s932_s1 + $0xe8] sm:$0xff] }
   0x5   :  { %433 = vmatpush.bf16.msra.mxu3 %v714_v3  ;;  %v687_v12 = vld [vmem:[%s932_s1 + $0x20] sm:$0xff]  ;;  %v686_v16 = vld [vmem:[%s932_s1 + $0x18] sm:$0xff]  ;;  %v685_v20 = vld [vmem:[%s932_s1 + $0x10] sm:$0xff] }
   0x6   :  { %377 = vmatpush.bf16.msra.mxu0 %v689_v4  ;;  %v695_v13 = vld [vmem:[%s932_s1 + $0x60] sm:$0xff]  ;;  %v694_v17 = vld [vmem:[%s932_s1 + $0x58] sm:$0xff]  ;;  %v693_v21 = vld [vmem:[%s932_s1 + $0x50] sm:$0xff] }
   0x7   :  { %396 = vmatpush.bf16.msra.mxu1 %v697_v5  ;;  %v703_v14 = vld [vmem:[%s932_s1 + $0xa0] sm:$0xff]  ;;  %v702_v18 = vld [vmem:[%s932_s1 + $0x98] sm:$0xff]  ;;  %v701_v22 = vld [vmem:[%s932_s1 + $0x90] sm:$0xff] }
   0x8   :  { %415 = vmatpush.bf16.msra.mxu2 %v705_v6  ;;  %v711_v15 = vld [vmem:[%s932_s1 + $0xe0] sm:$0xff]  ;;  %v710_v19 = vld [vmem:[%s932_s1 + $0xd8] sm:$0xff]  ;;  %v709_v23 = vld [vmem:[%s932_s1 + $0xd0] sm:$0xff] }
   0x9   :  { %434 = vmatpush.bf16.msra.mxu3 %v713_v7  ;;  %v684_v24 = vld [vmem:[%s932_s1 + $0x8] sm:$0xff]  ;;  %v683_v28 = vld [vmem:[%s932_s1] sm:$0xff]  ;;  %v675_v33 = vld [vmem:[%s934_s0 + $0x10] sm:$0xf0] }
   0xa   :  { %378 = vmatpush.bf16.msra.mxu0 %v688_v8  ;;  %v692_v25 = vld [vmem:[%s932_s1 + $0x48] sm:$0xff]  ;;  %v691_v29 = vld [vmem:[%s932_s1 + $0x40] sm:$0xff]  ;;  %v491_v35 = vld [vmem:[%s934_s0 + $0x14] sm:$0xf0] }
   0xb   :  { %397 = vmatpush.bf16.msra.mxu1 %v696_v9  ;;  %v700_v26 = vld [vmem:[%s932_s1 + $0x88] sm:$0xff]  ;;  %v699_v30 = vld [vmem:[%s932_s1 + $0x80] sm:$0xff]  ;;  %v676_v37 = vld [vmem:[%s934_s0 + $0x18] sm:$0xf0] }
   0xc   :  { %416 = vmatpush.bf16.msra.mxu2 %v704_v10  ;;  %v708_v27 = vld [vmem:[%s932_s1 + $0xc8] sm:$0xff]  ;;  %v707_v31 = vld [vmem:[%s932_s1 + $0xc0] sm:$0xff]  ;;  %v718_v40 = vld [vmem:[%s932_s1 + $0x118] sm:$0xff] }
   0xd   :  { %435 = vmatpush.bf16.msra.mxu3 %v712_v11  ;;  %v489_v32 = vld [vmem:[%s934_s0] sm:$0xf]  ;;  %v673_v34 = vld [vmem:[%s934_s0 + $0x4] sm:$0xf]  ;;  %v497_v36 = vld [vmem:[%s934_s0 + $0x8] sm:$0xf] }
   0xe   :  { %379 = vmatpush.bf16.msra.mxu0 %v687_v12  ;;  %v674_v38 = vld [vmem:[%s934_s0 + $0xc] sm:$0xf]  ;;  %v499_v39 = vld [vmem:[%s934_s0 + $0x1c] sm:$0xf0]  ;;  %v490_v41 = vor.u32 %v675_v33, %v489_v32  ;;  %v494_v42 = vor.u32 %v673_v34, %v491_v35  ;;  %v498_v43 = vor.u32 %v676_v37, %v497_v36  ;;  %v717_v45 = vld [vmem:[%s932_s1 + $0x110] sm:$0xff] }
   0xf   :  { %398 = vmatpush.bf16.msra.mxu1 %v695_v13  ;;  %v502_v44 = vor.u32 %v674_v38, %v499_v39  ;;  %v716_v46 = vld [vmem:[%s932_s1 + $0x108] sm:$0xff]  ;;  %v715_v47 = vld [vmem:[%s932_s1 + $0x100] sm:$0xff]  ;;  %v680_v49 = vld [vmem:[%s934_s0 + $0x38] sm:$0xf0] }
  0x10   :  { %417 = vmatpush.bf16.msra.mxu2 %v703_v14  ;;  %v509_v48 = vld [vmem:[%s934_s0 + $0x28] sm:$0xf]  ;;  %v678_v50 = vld [vmem:[%s934_s0 + $0x2c] sm:$0xf]  ;;  %v511_v51 = vld [vmem:[%s934_s0 + $0x3c] sm:$0xf0] }
  0x11   :  { %436 = vmatpush.bf16.msra.mxu3 %v711_v15  ;;  %v517_v52 = vld [vmem:[%s934_s0 + $0x30] sm:$0xf]  ;;  %v681_v53 = vld [vmem:[%s934_s0 + $0x40] sm:$0xf0]  ;;  %v679_v54 = vld [vmem:[%s934_s0 + $0x34] sm:$0xf]  ;;  %v510_v56 = vor.u32 %v680_v49, %v509_v48  ;;  %v514_v57 = vor.u32 %v678_v50, %v511_v51 }
  0x12   :  { %380 = vmatpush.bf16.msra.mxu0 %v686_v16  ;;  %v519_v55 = vld [vmem:[%s934_s0 + $0x44] sm:$0xf0]  ;;  %v518_v58 = vor.u32 %v681_v53, %v517_v52  ;;  %v505_v60 = vld [vmem:[%s934_s0 + $0x10] sm:$0xf]  ;;  %v677_v61 = vld [vmem:[%s934_s0 + $0x20] sm:$0xf0] }
  0x13   :  { %399 = vmatpush.bf16.msra.mxu1 %v694_v17  ;;  %v522_v59 = vor.u32 %v679_v54, %v519_v55  ;;  %v525_v62 = vld [vmem:[%s934_s0 + $0x38] sm:$0xf]  ;;  %v682_v63 = vld [vmem:[%s934_s0 + $0x48] sm:$0xf0]  ;;  %v506_v0 = vor.u32 %v677_v61, %v505_v60  ;;  %v734_v12 = vld [vmem:[%s933_s2] ss:$0 sm:$0xff] }
  0x14   :  { %418 = vmatpush.bf16.msra.mxu2 %v702_v18  ;;  %v526_v1 = vor.u32 %v682_v63, %v525_v62 }
  0x15   :  { %437 = vmatpush.bf16.msra.mxu3 %v710_v19 }
  0x16   :  { %381 = vmatpush.bf16.msra.mxu0 %v685_v20 }
  0x17   :  { %400 = vmatpush.bf16.msra.mxu1 %v693_v21 }
  0x18   :  { %419 = vmatpush.bf16.msra.mxu2 %v701_v22 }
  0x19   :  { %438 = vmatpush.bf16.msra.mxu3 %v709_v23 }
  0x1a   :  { %382 = vmatpush.bf16.msra.mxu0 %v684_v24 }
  0x1b   :  { %401 = vmatpush.bf16.msra.mxu1 %v692_v25 }
  0x1c   :  { %420 = vmatpush.bf16.msra.mxu2 %v700_v26 }
  0x1d   :  { %439 = vmatpush.bf16.msra.mxu3 %v708_v27 }
  0x1e   :  { %383 = vmatpush.bf16.msra.mxu0 %v683_v28 }
  0x1f   :  { %402 = vmatpush.bf16.msra.mxu1 %v691_v29 }
  0x20   :  { %421 = vmatpush.bf16.msra.mxu2 %v699_v30 }
  0x21   :  { %440 = vmatpush.bf16.msra.mxu3 %v707_v31  ;;  %384 = vmatmul.bf16.vlgmr.msra.gmra.mxu0 %v490_v41 }
  0x22   :  { %456 = vmatpush.bf16.msrb.mxu0 %v718_v40  ;;  %403 = vmatmul.bf16.vlgmr.msra.gmra.mxu1 %v494_v42 }
  0x23   :  { %730 = vmatpush.bf16.msrb.mxu1 %v718_v40  ;;  %422 = vmatmul.bf16.vlgmr.msra.gmra.mxu2 %v498_v43 }
  0x24   :  { %441 = vmatmul.bf16.vlgmr.msra.gmra.mxu3 %v502_v44 }
  0x26   :  { %457 = vmatpush.bf16.msrb.mxu0 %v717_v45 }
  0x27   :  { %731 = vmatpush.bf16.msrb.mxu1 %v717_v45 }
  0x2a   :  { %458 = vmatpush.bf16.msrb.mxu0 %v716_v46 }
  0x2b   :  { %732 = vmatpush.bf16.msrb.mxu1 %v716_v46 }
  0x2e   :  { %459 = vmatpush.bf16.msrb.mxu0 %v715_v47 }
  0x2f   :  { %733 = vmatpush.bf16.msrb.mxu1 %v715_v47 }
  0x31   :  { %389 = vmatmul.bf16.gmra.mxu0 %v510_v56 }
  0x32   :  { %408 = vmatmul.bf16.gmra.mxu1 %v514_v57 }
  0x33   :  { %427 = vmatmul.bf16.gmra.mxu2 %v518_v58 }
  0x34   :  { %446 = vmatmul.bf16.gmra.mxu3 %v522_v59 }
  0x41   :  { %671 = vmatmul.msk.bf16.vlgmr.msrb.gmra.mxu0 %vm369_vm0, %v506_v0 }
  0x42   :  { %672 = vmatmul.msk.bf16.vlgmr.msrb.gmra.mxu1 %vm369_vm0, %v526_v1 }
  0x9e   :  { %v385_v2 = vpop.f32.mrf.mxu0 }
  0x9f   :  { %v404_v3 = vpop.f32.mrf.mxu1  ;;  %v386_v16 = vadd.f32 %v734_v12, %v385_v2 }
  0xa1   :  { %v405_v21 = vadd.f32 %v404_v3, %v386_v16 }
  0xa6   :  { %v423_v4 = vpop.f32.mrf.mxu2  ;;  %v387_v6 = vpop.f32.mrf.mxu0 }
  0xa7   :  { %v442_v5 = vpop.f32.mrf.mxu3  ;;  %v406_v7 = vpop.f32.mrf.mxu1  ;;  %v388_v19 = vadd.f32 %v734_v12, %v387_v6  ;;  %v424_v26 = vadd.f32 %v423_v4, %v405_v21 }
  0xa9   :  { %v407_v27 = vadd.f32 %v406_v7, %v388_v19  ;;  %v443_v32 = vadd.f32 %v442_v5, %v424_v26 }
  0xae   :  { %v425_v8 = vpop.f32.mrf.mxu2  ;;  %v390_v9 = vpop.f32.mrf.mxu0 }
  0xaf   :  { %v409_v10 = vpop.f32.mrf.mxu1  ;;  %v444_v11 = vpop.f32.mrf.mxu3  ;;  %v391_v17 = vadd.f32 %v734_v12, %v390_v9  ;;  %v426_v30 = vadd.f32 %v425_v8, %v407_v27 }
  0xb1   :  { %v410_v22 = vadd.f32 %v409_v10, %v391_v17  ;;  %v445_v35 = vadd.f32 %v444_v11, %v426_v30 }
  0xb6   :  { %v428_v13 = vpop.f32.mrf.mxu2  ;;  %v392_v14 = vpop.f32.mrf.mxu0 }
  0xb7   :  { %v411_v15 = vpop.f32.mrf.mxu1  ;;  %v447_v18 = vpop.f32.mrf.mxu3  ;;  %v393_v20 = vadd.f32 %v734_v12, %v392_v14  ;;  %v429_v28 = vadd.f32 %v428_v13, %v410_v22 }
  0xb9   :  { %v412_v29 = vadd.f32 %v411_v15, %v393_v20  ;;  %v448_v33 = vadd.f32 %v447_v18, %v429_v28 }
  0xbe   :  { %v430_v23 = vpop.f32.mrf.mxu2  ;;  %v461_v24 = vpop.f32.mrf.mxu0 }
  0xbf   :  { %v466_v25 = vpop.f32.mrf.mxu1  ;;  %v431_v31 = vadd.f32 %v430_v23, %v412_v29  ;;  %v449_v34 = vpop.f32.mrf.mxu3  ;;  %v462_v37 = vadd.f32 %v461_v24, %v443_v32 }
  0xc0   :  { %v467_v38 = vadd.f32 %v466_v25, %v448_v33 }
  0xc1   :  { %v450_v36 = vadd.f32 %v449_v34, %v431_v31  ;;  %v471_v43 = vmax.f32 %v462_v37, 0.0 }
  0xc2   :  { %v473_v44 = vmax.f32 %v467_v38, 0.0 }
  0xc6   :  { %v463_v39 = vpop.f32.mrf.mxu0 }
  0xc7   :  { %v468_v40 = vpop.f32.mrf.mxu1  ;;  %v464_v41 = vadd.f32 %v463_v39, %v445_v35 }
  0xc8   :  { %v469_v42 = vadd.f32 %v468_v40, %v450_v36 }
  0xc9   :  { %v472_v45 = vmax.f32 %v464_v41, 0.0 }
  0xca   :  { %v474_v46 = vmax.f32 %v469_v42, 0.0 }
  0xcb   :  { %v722_v47 = vpack.c.bf16 %v472_v45, %v471_v43 }
  0xcc   :  { %v727_v48 = vpack.c.bf16 %v474_v46, %v473_v44 }
  0xcd   :  { %723 = vst [vmem:[%s935_s3] sm:$0xff] %v722_v47  }
  0xce   :  { %729 = vst [vmem:[%s935_s3 + $0x8] sm:$0xff] %v727_v48  }

// kernel: fcos_snake_forward.8
= control target key start
LH: loop header
LB: loop body
LE: loop exit
PB: predicated region body
PF: predicated region fallthrough
CT: control target
= control target key end

     0   :  { %s1373_s1 = inlined_call_operand.vmem [shape: bf16[1152,128], index: 1, kind: input, shape index: {}]   ;;  %s1374_s2 = inlined_call_operand.vmem [shape: f32[1,128], index: 2, kind: input, shape index: {}]   ;;  %s1375_s0 = inlined_call_operand.vmem [shape: bf16[8,1152], index: 0, kind: input, shape index: {}]   ;;  %s1376_s3 = inlined_call_operand.vmem [shape: bf16[8,128], index: 3, kind: output, shape index: {}]  }
   0x1   :  { %v1050_v0 = vld [vmem:[%s1373_s1 + $0x38] sm:$0xff]  ;;  %v1049_v4 = vld [vmem:[%s1373_s1 + $0x30] sm:$0xff]  ;;  %v1048_v8 = vld [vmem:[%s1373_s1 + $0x28] sm:$0xff] }
   0x2   :  { %v1066_v1 = vld [vmem:[%s1373_s1 + $0xb8] sm:$0xff]  ;;  %631 = vmatpush.bf16.msra.mxu0 %v1050_v0  ;;  %v1065_v5 = vld [vmem:[%s1373_s1 + $0xb0] sm:$0xff]  ;;  %v1064_v9 = vld [vmem:[%s1373_s1 + $0xa8] sm:$0xff] }
   0x3   :  { %v1074_v2 = vld [vmem:[%s1373_s1 + $0xf8] sm:$0xff]  ;;  %657 = vmatpush.bf16.msra.mxu2 %v1066_v1  ;;  %v1073_v6 = vld [vmem:[%s1373_s1 + $0xf0] sm:$0xff]  ;;  %v1072_v10 = vld [vmem:[%s1373_s1 + $0xe8] sm:$0xff] }
   0x4   :  { %v1058_v3 = vld [vmem:[%s1373_s1 + $0x78] sm:$0xff]  ;;  %670 = vmatpush.bf16.msra.mxu3 %v1074_v2  ;;  %v1057_v7 = vld [vmem:[%s1373_s1 + $0x70] sm:$0xff]  ;;  %v1056_v11 = vld [vmem:[%s1373_s1 + $0x68] sm:$0xff] }
   0x5   :  { %644 = vmatpush.bf16.msra.mxu1 %v1058_v3  ;;  %v1047_v12 = vld [vmem:[%s1373_s1 + $0x20] sm:$0xff]  ;;  %v1046_v16 = vld [vmem:[%s1373_s1 + $0x18] sm:$0xff]  ;;  %v1045_v20 = vld [vmem:[%s1373_s1 + $0x10] sm:$0xff] }
   0x6   :  { %632 = vmatpush.bf16.msra.mxu0 %v1049_v4  ;;  %v1063_v13 = vld [vmem:[%s1373_s1 + $0xa0] sm:$0xff]  ;;  %v1062_v17 = vld [vmem:[%s1373_s1 + $0x98] sm:$0xff]  ;;  %v1061_v21 = vld [vmem:[%s1373_s1 + $0x90] sm:$0xff] }
   0x7   :  { %658 = vmatpush.bf16.msra.mxu2 %v1065_v5  ;;  %v1071_v14 = vld [vmem:[%s1373_s1 + $0xe0] sm:$0xff]  ;;  %v1070_v18 = vld [vmem:[%s1373_s1 + $0xd8] sm:$0xff]  ;;  %v1069_v22 = vld [vmem:[%s1373_s1 + $0xd0] sm:$0xff] }
   0x8   :  { %671 = vmatpush.bf16.msra.mxu3 %v1073_v6  ;;  %v1055_v15 = vld [vmem:[%s1373_s1 + $0x60] sm:$0xff]  ;;  %v1054_v19 = vld [vmem:[%s1373_s1 + $0x58] sm:$0xff]  ;;  %v1053_v23 = vld [vmem:[%s1373_s1 + $0x50] sm:$0xff] }
   0x9   :  { %645 = vmatpush.bf16.msra.mxu1 %v1057_v7  ;;  %v1044_v24 = vld [vmem:[%s1373_s1 + $0x8] sm:$0xff]  ;;  %v14_v29 = vld [vmem:[%s1375_s0] sm:$0xff]  ;;  %v1082_v34 = vld [vmem:[%s1373_s1 + $0x138] sm:$0xff] }
   0xa   :  { %633 = vmatpush.bf16.msra.mxu0 %v1048_v8  ;;  %v1060_v25 = vld [vmem:[%s1373_s1 + $0x88] sm:$0xff]  ;;  %v1043_v30 = vld [vmem:[%s1373_s1] sm:$0xff]  ;;  %v172_v33 = vunpack.c.l.b16 %v14_v29  ;;  %v1098_v35 = vld [vmem:[%s1373_s1 + $0x1b8] sm:$0xff]  ;;  %v173_v39 = vunpack.c.h.b16 %v14_v29 }
   0xb   :  { %659 = vmatpush.bf16.msra.mxu2 %v1064_v9  ;;  %v1068_v26 = vld [vmem:[%s1373_s1 + $0xc8] sm:$0xff]  ;;  %v1059_v31 = vld [vmem:[%s1373_s1 + $0x80] sm:$0xff]  ;;  %v1106_v40 = vld [vmem:[%s1373_s1 + $0x1f8] sm:$0xff] }
   0xc   :  { %672 = vmatpush.bf16.msra.mxu3 %v1072_v10  ;;  %v1052_v27 = vld [vmem:[%s1373_s1 + $0x48] sm:$0xff]  ;;  %v1067_v36 = vld [vmem:[%s1373_s1 + $0xc0] sm:$0xff]  ;;  %v1090_v41 = vld [vmem:[%s1373_s1 + $0x178] sm:$0xff]  ;;  %v181_v43 = vpack.c.b16 %v172_v33, %v172_v33  ;;  %v182_v47 = vpack.c.b16 %v173_v39, %v173_v39 }
   0xd   :  { %646 = vmatpush.bf16.msra.mxu1 %v1056_v11  ;;  %v15_v28 = vld [vmem:[%s1375_s0 + $0x8] sm:$0xff]  ;;  %v1051_v37 = vld [vmem:[%s1373_s1 + $0x40] sm:$0xff]  ;;  %v1081_v44 = vld [vmem:[%s1373_s1 + $0x130] sm:$0xff] }
   0xe   :  { %634 = vmatpush.bf16.msra.mxu0 %v1047_v12  ;;  %v174_v32 = vunpack.c.l.b16 %v15_v28  ;;  %v175_v38 = vunpack.c.h.b16 %v15_v28  ;;  %v1097_v45 = vld [vmem:[%s1373_s1 + $0x1b0] sm:$0xff]  ;;  %v1080_v50 = vld [vmem:[%s1373_s1 + $0x128] sm:$0xff]  ;;  %v1079_v54 = vld [vmem:[%s1373_s1 + $0x120] sm:$0xff] }
   0xf   :  { %660 = vmatpush.bf16.msra.mxu2 %v1063_v13  ;;  %v1105_v48 = vld [vmem:[%s1373_s1 + $0x1f0] sm:$0xff]  ;;  %v1096_v51 = vld [vmem:[%s1373_s1 + $0x1a8] sm:$0xff]  ;;  %v1095_v55 = vld [vmem:[%s1373_s1 + $0x1a0] sm:$0xff] }
  0x10   :  { %673 = vmatpush.bf16.msra.mxu3 %v1071_v14  ;;  %v183_v42 = vpack.c.b16 %v174_v32, %v174_v32  ;;  %v184_v46 = vpack.c.b16 %v175_v38, %v175_v38  ;;  %v1089_v49 = vld [vmem:[%s1373_s1 + $0x170] sm:$0xff]  ;;  %v1104_v52 = vld [vmem:[%s1373_s1 + $0x1e8] sm:$0xff]  ;;  %v1103_v56 = vld [vmem:[%s1373_s1 + $0x1e0] sm:$0xff] }
  0x11   :  { %647 = vmatpush.bf16.msra.mxu1 %v1055_v15  ;;  %v1088_v53 = vld [vmem:[%s1373_s1 + $0x168] sm:$0xff]  ;;  %v1087_v57 = vld [vmem:[%s1373_s1 + $0x160] sm:$0xff]  ;;  %v1078_v58 = vld [vmem:[%s1373_s1 + $0x118] sm:$0xff] }
  0x12   :  { %635 = vmatpush.bf16.msra.mxu0 %v1046_v16  ;;  %v1094_v59 = vld [vmem:[%s1373_s1 + $0x198] sm:$0xff]  ;;  %v1077_v62 = vld [vmem:[%s1373_s1 + $0x110] sm:$0xff]  ;;  %v1076_v2 = vld [vmem:[%s1373_s1 + $0x108] sm:$0xff] }
  0x13   :  { %661 = vmatpush.bf16.msra.mxu2 %v1062_v17  ;;  %v1102_v60 = vld [vmem:[%s1373_s1 + $0x1d8] sm:$0xff]  ;;  %v1093_v63 = vld [vmem:[%s1373_s1 + $0x190] sm:$0xff]  ;;  %v1092_v3 = vld [vmem:[%s1373_s1 + $0x188] sm:$0xff] }
  0x14   :  { %674 = vmatpush.bf16.msra.mxu3 %v1070_v18  ;;  %v1086_v61 = vld [vmem:[%s1373_s1 + $0x158] sm:$0xff]  ;;  %v1101_v0 = vld [vmem:[%s1373_s1 + $0x1d0] sm:$0xff]  ;;  %v1100_v6 = vld [vmem:[%s1373_s1 + $0x1c8] sm:$0xff] }
  0x15   :  { %648 = vmatpush.bf16.msra.mxu1 %v1054_v19  ;;  %v1085_v1 = vld [vmem:[%s1373_s1 + $0x150] sm:$0xff]  ;;  %v17_v4 = vld [vmem:[%s1375_s0 + $0x18] sm:$0xff]  ;;  %v1084_v7 = vld [vmem:[%s1373_s1 + $0x148] sm:$0xff] }
  0x16   :  { %636 = vmatpush.bf16.msra.mxu0 %v1045_v20  ;;  %v16_v5 = vld [vmem:[%s1375_s0 + $0x10] sm:$0xff]  ;;  %v178_v8 = vunpack.c.l.b16 %v17_v4  ;;  %v1075_v10 = vld [vmem:[%s1373_s1 + $0x100] sm:$0xff]  ;;  %v1114_v12 = vld [vmem:[%s1373_s1 + $0x238] sm:$0xff]  ;;  %v179_v13 = vunpack.c.h.b16 %v17_v4 }
  0x17   :  { %662 = vmatpush.bf16.msra.mxu2 %v1061_v21  ;;  %v176_v9 = vunpack.c.l.b16 %v16_v5  ;;  %v1091_v11 = vld [vmem:[%s1373_s1 + $0x180] sm:$0xff]  ;;  %v177_v16 = vunpack.c.h.b16 %v16_v5  ;;  %v1113_v19 = vld [vmem:[%s1373_s1 + $0x230] sm:$0xff] }
  0x18   :  { %675 = vmatpush.bf16.msra.mxu3 %v1069_v22  ;;  %v1099_v14 = vld [vmem:[%s1373_s1 + $0x1c0] sm:$0xff]  ;;  %v187_v17 = vpack.c.b16 %v178_v8, %v178_v8  ;;  %v188_v20 = vpack.c.b16 %v179_v13, %v179_v13  ;;  %v1112_v22 = vld [vmem:[%s1373_s1 + $0x228] sm:$0xff] }
  0x19   :  { %649 = vmatpush.bf16.msra.mxu1 %v1053_v23  ;;  %v1083_v15 = vld [vmem:[%s1373_s1 + $0x140] sm:$0xff]  ;;  %v185_v18 = vpack.c.b16 %v176_v9, %v176_v9  ;;  %v186_v21 = vpack.c.b16 %v177_v16, %v177_v16 }
  0x1a   :  { %637 = vmatpush.bf16.msra.mxu0 %v1044_v24  ;;  %v1111_v23 = vld [vmem:[%s1373_s1 + $0x220] sm:$0xff]  ;;  %v1110_v24 = vld [vmem:[%s1373_s1 + $0x218] sm:$0xff] }
  0x1b   :  { %663 = vmatpush.bf16.msra.mxu2 %v1060_v25  ;;  %v1109_v25 = vld [vmem:[%s1373_s1 + $0x210] sm:$0xff]  ;;  %v1107_v29 = vld [vmem:[%s1373_s1 + $0x200] sm:$0xff] }
  0x1c   :  { %676 = vmatpush.bf16.msra.mxu3 %v1068_v26  ;;  %v1108_v26 = vld [vmem:[%s1373_s1 + $0x208] sm:$0xff]  ;;  %v1115_v39 = vld [vmem:[%s1374_s2] ss:$0 sm:$0xff] }
  0x1d   :  { %650 = vmatpush.bf16.msra.mxu1 %v1052_v27  ;;  %v18_v27 = vld [vmem:[%s1375_s0 + $0x20] sm:$0xf] }
  0x1e   :  { %638 = vmatpush.bf16.msra.mxu0 %v1043_v30  ;;  %v180_v28 = vunpack.c.l.b16 %v18_v27 }
  0x1f   :  { %664 = vmatpush.bf16.msra.mxu2 %v1059_v31 }
  0x20   :  { %677 = vmatpush.bf16.msra.mxu3 %v1067_v36  ;;  %v189_v30 = vpack.c.b16 %v180_v28, %v180_v28 }
  0x21   :  { %651 = vmatpush.bf16.msra.mxu1 %v1051_v37  ;;  %639 = vmatmul.bf16.vlgmr.msra.gmra.mxu0 %v181_v43 }
  0x22   :  { %683 = vmatpush.bf16.msrb.mxu0 %v1082_v34  ;;  %665 = vmatmul.bf16.vlgmr.msra.gmra.mxu2 %v183_v42 }
  0x23   :  { %709 = vmatpush.bf16.msrb.mxu2 %v1098_v35  ;;  %678 = vmatmul.bf16.vlgmr.msra.gmra.mxu3 %v184_v46 }
  0x24   :  { %722 = vmatpush.bf16.msrb.mxu3 %v1106_v40  ;;  %652 = vmatmul.bf16.vlgmr.msra.gmra.mxu1 %v182_v47 }
  0x25   :  { %696 = vmatpush.bf16.msrb.mxu1 %v1090_v41 }
  0x26   :  { %684 = vmatpush.bf16.msrb.mxu0 %v1081_v44 }
  0x27   :  { %710 = vmatpush.bf16.msrb.mxu2 %v1097_v45 }
  0x28   :  { %723 = vmatpush.bf16.msrb.mxu3 %v1105_v48 }
  0x29   :  { %697 = vmatpush.bf16.msrb.mxu1 %v1089_v49 }
  0x2a   :  { %685 = vmatpush.bf16.msrb.mxu0 %v1080_v50 }
  0x2b   :  { %711 = vmatpush.bf16.msrb.mxu2 %v1096_v51 }
  0x2c   :  { %724 = vmatpush.bf16.msrb.mxu3 %v1104_v52 }
  0x2d   :  { %698 = vmatpush.bf16.msrb.mxu1 %v1088_v53 }
  0x2e   :  { %686 = vmatpush.bf16.msrb.mxu0 %v1079_v54 }
  0x2f   :  { %712 = vmatpush.bf16.msrb.mxu2 %v1095_v55 }
  0x30   :  { %725 = vmatpush.bf16.msrb.mxu3 %v1103_v56 }
  0x31   :  { %699 = vmatpush.bf16.msrb.mxu1 %v1087_v57 }
  0x32   :  { %687 = vmatpush.bf16.msrb.mxu0 %v1078_v58 }
  0x33   :  { %713 = vmatpush.bf16.msrb.mxu2 %v1094_v59 }
  0x34   :  { %726 = vmatpush.bf16.msrb.mxu3 %v1102_v60 }
  0x35   :  { %700 = vmatpush.bf16.msrb.mxu1 %v1086_v61 }
  0x36   :  { %688 = vmatpush.bf16.msrb.mxu0 %v1077_v62 }
  0x37   :  { %714 = vmatpush.bf16.msrb.mxu2 %v1093_v63 }
  0x38   :  { %727 = vmatpush.bf16.msrb.mxu3 %v1101_v0 }
  0x39   :  { %701 = vmatpush.bf16.msrb.mxu1 %v1085_v1 }
  0x3a   :  { %689 = vmatpush.bf16.msrb.mxu0 %v1076_v2 }
  0x3b   :  { %715 = vmatpush.bf16.msrb.mxu2 %v1092_v3 }
  0x3c   :  { %728 = vmatpush.bf16.msrb.mxu3 %v1100_v6 }
  0x3d   :  { %702 = vmatpush.bf16.msrb.mxu1 %v1084_v7 }
  0x3e   :  { %690 = vmatpush.bf16.msrb.mxu0 %v1075_v10 }
  0x3f   :  { %716 = vmatpush.bf16.msrb.mxu2 %v1091_v11 }
  0x40   :  { %729 = vmatpush.bf16.msrb.mxu3 %v1099_v14 }
  0x41   :  { %703 = vmatpush.bf16.msrb.mxu1 %v1083_v15  ;;  %691 = vmatmul.bf16.vlgmr.msrb.gmra.mxu0 %v185_v18 }
  0x42   :  { %735 = vmatpush.bf16.msra.mxu0 %v1114_v12  ;;  %717 = vmatmul.bf16.vlgmr.msrb.gmra.mxu2 %v187_v17 }
  0x43   :  { %730 = vmatmul.bf16.vlgmr.msrb.gmra.mxu3 %v188_v20 }
  0x44   :  { %704 = vmatmul.bf16.vlgmr.msrb.gmra.mxu1 %v186_v21 }
  0x46   :  { %736 = vmatpush.bf16.msra.mxu0 %v1113_v19 }
  0x4a   :  { %737 = vmatpush.bf16.msra.mxu0 %v1112_v22 }
  0x4e   :  { %738 = vmatpush.bf16.msra.mxu0 %v1111_v23 }
  0x52   :  { %739 = vmatpush.bf16.msra.mxu0 %v1110_v24 }
  0x56   :  { %740 = vmatpush.bf16.msra.mxu0 %v1109_v25 }
  0x5a   :  { %741 = vmatpush.bf16.msra.mxu0 %v1108_v26 }
  0x5e   :  { %742 = vmatpush.bf16.msra.mxu0 %v1107_v29 }
  0x61   :  { %743 = vmatmul.bf16.vlgmr.msra.gmra.mxu0 %v189_v30 }
  0x9e   :  { %v640_v31 = vpop.f32.mrf.mxu0 }
  0x9f   :  { %v641_v40 = vadd.f32 %v1115_v39, %v640_v31 }
  0xa1   :  { %v653_v32 = vpop.f32.mrf.mxu1 }
  0xa2   :  { %v654_v43 = vadd.f32 %v653_v32, %v641_v40 }
  0xa5   :  { %v666_v33 = vpop.f32.mrf.mxu2 }
  0xa6   :  { %v679_v34 = vpop.f32.mrf.mxu3  ;;  %v642_v35 = vpop.f32.mrf.mxu0  ;;  %v667_v45 = vadd.f32 %v666_v33, %v654_v43 }
  0xa8   :  { %v680_v49 = vadd.f32 %v679_v34, %v667_v45 }
  0xa9   :  { %v655_v36 = vpop.f32.mrf.mxu1 }
  0xad   :  { %v668_v37 = vpop.f32.mrf.mxu2 }
  0xae   :  { %v681_v38 = vpop.f32.mrf.mxu3 }
  0xbe   :  { %v692_v41 = vpop.f32.mrf.mxu0 }
  0xbf   :  { %v693_v51 = vadd.f32 %v692_v41, %v680_v49 }
  0xc1   :  { %v705_v42 = vpop.f32.mrf.mxu1 }
  0xc2   :  { %v706_v53 = vadd.f32 %v705_v42, %v693_v51 }
  0xc5   :  { %v718_v44 = vpop.f32.mrf.mxu2 }
  0xc6   :  { %v731_v46 = vpop.f32.mrf.mxu3  ;;  %v694_v47 = vpop.f32.mrf.mxu0  ;;  %v719_v54 = vadd.f32 %v718_v44, %v706_v53 }
  0xc8   :  { %v732_v55 = vadd.f32 %v731_v46, %v719_v54 }
  0xc9   :  { %v707_v48 = vpop.f32.mrf.mxu1 }
  0xcd   :  { %v720_v50 = vpop.f32.mrf.mxu2 }
  0xce   :  { %v733_v52 = vpop.f32.mrf.mxu3 }
  0xde   :  { %v744_v56 = vpop.f32.mrf.mxu0 }
  0xdf   :  { %v745_v57 = vadd.f32 %v744_v56, %v732_v55 }
  0xe1   :  { %v748_v58 = vmax.f32 %v745_v57, 0.0 }
  0xe3   :  { %v749_v59 = vpack.c.bf16 %v748_v58, %v748_v58 }
  0xe5   :  { %750 = vst [vmem:[%s1376_s3] sm:$0xf] %v749_v59 }
  0xe6   :  { %v746_v60 = vpop.f32.mrf.mxu0 }

// kernel: fcos_snake_forward.9
= control target key start
LH: loop header
LB: loop body
LE: loop exit
PB: predicated region body
PF: predicated region fallthrough
CT: control target
= control target key end

     0   :  { %s1825_s1 = inlined_call_operand.vmem [shape: bf16[1152,128], index: 1, kind: input, shape index: {}]   ;;  %s1826_s2 = inlined_call_operand.vmem [shape: f32[1,128], index: 2, kind: input, shape index: {}]   ;;  %s1827_s0 = inlined_call_operand.vmem [shape: bf16[40,1152], index: 0, kind: input, shape index: {}]   ;;  %s1828_s3 = inlined_call_operand.vmem [shape: bf16[40,128], index: 3, kind: output, shape index: {}]  }
   0x1   :  { %v1354_v0 = vld [vmem:[%s1825_s1 + $0x38] sm:$0xff]  ;;  %v1353_v2 = vld [vmem:[%s1825_s1 + $0x30] sm:$0xff]  ;;  %v1352_v6 = vld [vmem:[%s1825_s1 + $0x28] sm:$0xff] }
   0x2   :  { %v1370_v1 = vld [vmem:[%s1825_s1 + $0xb8] sm:$0xff]  ;;  %1430 = vmatpush.bf16.msra.mxu1 %v1354_v0  ;;  %743 = vmatpush.bf16.msra.mxu0 %v1354_v0  ;;  %v1369_v3 = vld [vmem:[%s1825_s1 + $0xb0] sm:$0xff]  ;;  %v1368_v7 = vld [vmem:[%s1825_s1 + $0xa8] sm:$0xff] }
   0x3   :  { %789 = vmatpush.bf16.msra.mxu2 %v1370_v1  ;;  %v1378_v4 = vld [vmem:[%s1825_s1 + $0xf8] sm:$0xff]  ;;  %v1377_v5 = vld [vmem:[%s1825_s1 + $0xf0] sm:$0xff]  ;;  %v1376_v8 = vld [vmem:[%s1825_s1 + $0xe8] sm:$0xff] }
   0x4   :  { %812 = vmatpush.bf16.msra.mxu3 %v1378_v4  ;;  %v1351_v9 = vld [vmem:[%s1825_s1 + $0x20] sm:$0xff]  ;;  %v1350_v12 = vld [vmem:[%s1825_s1 + $0x18] sm:$0xff]  ;;  %v1349_v15 = vld [vmem:[%s1825_s1 + $0x10] sm:$0xff] }
   0x5   :  { %v1367_v10 = vld [vmem:[%s1825_s1 + $0xa0] sm:$0xff]  ;;  %v1366_v13 = vld [vmem:[%s1825_s1 + $0x98] sm:$0xff]  ;;  %v1365_v16 = vld [vmem:[%s1825_s1 + $0x90] sm:$0xff] }
   0x6   :  { %1431 = vmatpush.bf16.msra.mxu1 %v1353_v2  ;;  %744 = vmatpush.bf16.msra.mxu0 %v1353_v2  ;;  %v1375_v11 = vld [vmem:[%s1825_s1 + $0xe0] sm:$0xff]  ;;  %v1374_v14 = vld [vmem:[%s1825_s1 + $0xd8] sm:$0xff]  ;;  %v1373_v17 = vld [vmem:[%s1825_s1 + $0xd0] sm:$0xff] }
   0x7   :  { %790 = vmatpush.bf16.msra.mxu2 %v1369_v3  ;;  %v1348_v18 = vld [vmem:[%s1825_s1 + $0x8] sm:$0xff]  ;;  %v1527_v19 = vld [vmem:[%s1827_s0 + $0x90] sm:$0xff]  ;;  %v1347_v21 = vld [vmem:[%s1825_s1] sm:$0xff] }
   0x8   :  { %813 = vmatpush.bf16.msra.mxu3 %v1377_v5  ;;  %v1364_v20 = vld [vmem:[%s1825_s1 + $0x88] sm:$0xff]  ;;  %v248_v22 = vunpack.c.l.b16 %v1527_v19  ;;  %v1362_v24 = vld [vmem:[%s1825_s1 + $0x78] sm:$0xff]  ;;  %v971_v25 = vld [vmem:[%s1827_s0] sm:$0xf] }
   0x9   :  { %v1372_v23 = vld [vmem:[%s1825_s1 + $0xc8] sm:$0xff]  ;;  %v1333_v26 = vld [vmem:[%s1827_s0 + $0x20] sm:$0xf0]  ;;  %v1386_v30 = vld [vmem:[%s1825_s1 + $0x138] sm:$0xff] }
   0xa   :  { %1432 = vmatpush.bf16.msra.mxu1 %v1352_v6  ;;  %745 = vmatpush.bf16.msra.mxu0 %v1352_v6  ;;  %v1363_v27 = vld [vmem:[%s1825_s1 + $0x80] sm:$0xff]  ;;  %v979_v28 = vld [vmem:[%s1827_s0 + $0x8] sm:$0xf]  ;;  %v1334_v29 = vld [vmem:[%s1827_s0 + $0x28] sm:$0xf0]  ;;  %v972_v32 = vor.u32 %v1333_v26, %v971_v25  ;;  %v275_v33 = vpack.c.b16 %v248_v22, %v248_v22 }
   0xb   :  { %791 = vmatpush.bf16.msra.mxu2 %v1368_v7  ;;  %v1402_v31 = vld [vmem:[%s1825_s1 + $0x1b8] sm:$0xff]  ;;  %v980_v34 = vor.u32 %v1334_v29, %v979_v28  ;;  %v1371_v35 = vld [vmem:[%s1825_s1 + $0xc0] sm:$0xff]  ;;  %v1330_v36 = vld [vmem:[%s1827_s0 + $0xc] sm:$0xf] }
   0xc   :  { %814 = vmatpush.bf16.msra.mxu3 %v1376_v8  ;;  %v981_v37 = vld [vmem:[%s1827_s0 + $0x2c] sm:$0xf0]  ;;  %v1410_v39 = vld [vmem:[%s1825_s1 + $0x1f8] sm:$0xff]  ;;  %v1360_v43 = vld [vmem:[%s1825_s1 + $0x68] sm:$0xff] }
   0xd   :  { %v1361_v38 = vld [vmem:[%s1825_s1 + $0x70] sm:$0xff]  ;;  %v984_v42 = vor.u32 %v1330_v36, %v981_v37  ;;  %v1384_v45 = vld [vmem:[%s1825_s1 + $0x128] sm:$0xff]  ;;  %v1359_v47 = vld [vmem:[%s1825_s1 + $0x60] sm:$0xff] }
   0xe   :  { %1433 = vmatpush.bf16.msra.mxu1 %v1351_v9  ;;  %746 = vmatpush.bf16.msra.mxu0 %v1351_v9  ;;  %v1385_v40 = vld [vmem:[%s1825_s1 + $0x130] sm:$0xff]  ;;  %v1400_v46 = vld [vmem:[%s1825_s1 + $0x1a8] sm:$0xff]  ;;  %v1383_v49 = vld [vmem:[%s1825_s1 + $0x120] sm:$0xff] }
   0xf   :  { %792 = vmatpush.bf16.msra.mxu2 %v1367_v10  ;;  %v1401_v41 = vld [vmem:[%s1825_s1 + $0x1b0] sm:$0xff]  ;;  %v1408_v48 = vld [vmem:[%s1825_s1 + $0x1e8] sm:$0xff]  ;;  %v1399_v50 = vld [vmem:[%s1825_s1 + $0x1a0] sm:$0xff] }
  0x10   :  { %815 = vmatpush.bf16.msra.mxu3 %v1375_v11  ;;  %v1409_v44 = vld [vmem:[%s1825_s1 + $0x1f0] sm:$0xff]  ;;  %v1007_v51 = vld [vmem:[%s1827_s0 + $0x48] sm:$0xf]  ;;  %v1342_v52 = vld [vmem:[%s1827_s0 + $0x68] sm:$0xf0] }
  0x11   :  { %v1358_v53 = vld [vmem:[%s1825_s1 + $0x58] sm:$0xff]  ;;  %v1015_v54 = vld [vmem:[%s1827_s0 + $0x50] sm:$0xf]  ;;  %v1343_v55 = vld [vmem:[%s1827_s0 + $0x70] sm:$0xf0]  ;;  %v1008_v58 = vor.u32 %v1342_v52, %v1007_v51  ;;  %v249_v52 = vunpack.c.h.b16 %v1527_v19 }
  0x12   :  { %1434 = vmatpush.bf16.msra.mxu1 %v1350_v12  ;;  %747 = vmatpush.bf16.msra.mxu0 %v1350_v12  ;;  %v1382_v56 = vld [vmem:[%s1825_s1 + $0x118] sm:$0xff]  ;;  %v1016_v59 = vor.u32 %v1343_v55, %v1015_v54  ;;  %v1339_v60 = vld [vmem:[%s1827_s0 + $0x54] sm:$0xf]  ;;  %v1407_v62 = vld [vmem:[%s1825_s1 + $0x1e0] sm:$0xff] }
  0x13   :  { %793 = vmatpush.bf16.msra.mxu2 %v1366_v13  ;;  %v1398_v57 = vld [vmem:[%s1825_s1 + $0x198] sm:$0xff]  ;;  %v1357_v63 = vld [vmem:[%s1825_s1 + $0x50] sm:$0xff]  ;;  %v1356_v4 = vld [vmem:[%s1825_s1 + $0x48] sm:$0xff] }
  0x14   :  { %816 = vmatpush.bf16.msra.mxu3 %v1374_v14  ;;  %v1017_v61 = vld [vmem:[%s1827_s0 + $0x74] sm:$0xf0]  ;;  %v1381_v0 = vld [vmem:[%s1825_s1 + $0x110] sm:$0xff]  ;;  %v1380_v5 = vld [vmem:[%s1825_s1 + $0x108] sm:$0xff] }
  0x15   :  { %v1397_v1 = vld [vmem:[%s1825_s1 + $0x190] sm:$0xff]  ;;  %v1020_v2 = vor.u32 %v1339_v60, %v1017_v61  ;;  %v1406_v3 = vld [vmem:[%s1825_s1 + $0x1d8] sm:$0xff]  ;;  %v1396_v6 = vld [vmem:[%s1825_s1 + $0x188] sm:$0xff] }
  0x16   :  { %1435 = vmatpush.bf16.msra.mxu1 %v1349_v15  ;;  %748 = vmatpush.bf16.msra.mxu0 %v1349_v15  ;;  %v1355_v7 = vld [vmem:[%s1825_s1 + $0x40] sm:$0xff]  ;;  %v1405_v8 = vld [vmem:[%s1825_s1 + $0x1d0] sm:$0xff]  ;;  %v973_v10 = vld [vmem:[%s1827_s0 + $0x24] sm:$0xf0] }
  0x17   :  { %794 = vmatpush.bf16.msra.mxu2 %v1365_v16  ;;  %v1329_v9 = vld [vmem:[%s1827_s0 + $0x4] sm:$0xf]  ;;  %v35_v11 = vld [vmem:[%s1827_s0 + $0x98] sm:$0xff]  ;;  %v1393_v22 = vld [vmem:[%s1825_s1 + $0x170] sm:$0xff] }
  0x18   :  { %817 = vmatpush.bf16.msra.mxu3 %v1373_v17  ;;  %v1394_v12 = vld [vmem:[%s1825_s1 + $0x178] sm:$0xff]  ;;  %v1379_v13 = vld [vmem:[%s1825_s1 + $0x100] sm:$0xff]  ;;  %v976_v16 = vor.u32 %v1329_v9, %v973_v10  ;;  %v987_v17 = vld [vmem:[%s1827_s0 + $0x10] sm:$0xf] }
  0x19   :  { %v1418_v14 = vld [vmem:[%s1825_s1 + $0x238] sm:$0xff]  ;;  %v1395_v15 = vld [vmem:[%s1825_s1 + $0x180] sm:$0xff]  ;;  %v1417_v26 = vld [vmem:[%s1825_s1 + $0x230] sm:$0xff] }
  0x1a   :  { %1436 = vmatpush.bf16.msra.mxu1 %v1348_v18  ;;  %749 = vmatpush.bf16.msra.mxu0 %v1348_v18  ;;  %v1335_v18 = vld [vmem:[%s1827_s0 + $0x30] sm:$0xf0]  ;;  %v1392_v28 = vld [vmem:[%s1825_s1 + $0x168] sm:$0xff]  ;;  %v1023_v37 = vld [vmem:[%s1827_s0 + $0x58] sm:$0xf] }
  0x1b   :  { %795 = vmatpush.bf16.msra.mxu2 %v1364_v20  ;;  %v250_v20 = vunpack.c.l.b16 %v35_v11  ;;  %v1387_v51 = vld [vmem:[%s1825_s1 + $0x140] sm:$0xff]  ;;  %v1033_v61 = vld [vmem:[%s1827_s0 + $0x84] sm:$0xf0]  ;;  %v1340_v10 = vld [vmem:[%s1827_s0 + $0x5c] sm:$0xf] }
  0x1c   :  { %818 = vmatpush.bf16.msra.mxu3 %v1372_v23  ;;  %v988_v23 = vor.u32 %v1335_v18, %v987_v17  ;;  %v1411_v54 = vld [vmem:[%s1825_s1 + $0x200] sm:$0xff] }
  0x1d   :  { %v277_v25 = vpack.c.b16 %v250_v20, %v250_v20  ;;  %v1345_v19 = vld [vmem:[%s1827_s0 + $0x80] sm:$0xf0] }
  0x1e   :  { %1437 = vmatpush.bf16.msra.mxu1 %v1347_v21  ;;  %750 = vmatpush.bf16.msra.mxu0 %v1347_v21  ;;  %v1404_v21 = vld [vmem:[%s1825_s1 + $0x1c8] sm:$0xff]  ;;  %v1341_v60 = vld [vmem:[%s1827_s0 + $0x64] sm:$0xf] }
  0x1f   :  { %796 = vmatpush.bf16.msra.mxu2 %v1363_v27  ;;  %v1403_v27 = vld [vmem:[%s1825_s1 + $0x1c0] sm:$0xff] }
  0x20   :  { %819 = vmatpush.bf16.msra.mxu3 %v1371_v35  ;;  %v1390_v35 = vld [vmem:[%s1825_s1 + $0x158] sm:$0xff] }
  0x21   :  { %751 = vmatmul.bf16.vlgmr.msra.gmra.mxu0 %v972_v32  ;;  %761 = vmatmul.bf16.vlgmr.msra.gmra.mxu1 %v275_v33  ;;  %v1415_v32 = vld [vmem:[%s1825_s1 + $0x220] sm:$0xff]  ;;  %v1338_v33 = vld [vmem:[%s1827_s0 + $0x4c] sm:$0xf] }
  0x22   :  { %766 = vmatpush.bf16.msrb.mxu1 %v1362_v24  ;;  %835 = vmatpush.bf16.msrb.mxu0 %v1386_v30  ;;  %v251_v24 = vunpack.c.h.b16 %v35_v11  ;;  %v1416_v30 = vld [vmem:[%s1825_s1 + $0x228] sm:$0xff]  ;;  %v1025_v11 = vld [vmem:[%s1827_s0 + $0x7c] sm:$0xf0] }
  0x23   :  { %881 = vmatpush.bf16.msrb.mxu2 %v1402_v31  ;;  %820 = vmatmul.bf16.vlgmr.msra.gmra.mxu3 %v984_v42  ;;  %v1391_v31 = vld [vmem:[%s1825_s1 + $0x160] sm:$0xff]  ;;  %v1389_v42 = vld [vmem:[%s1825_s1 + $0x150] sm:$0xff] }
  0x24   :  { %797 = vmatmul.bf16.vlgmr.msra.gmra.mxu2 %v980_v34  ;;  %904 = vmatpush.bf16.msrb.mxu3 %v1410_v39  ;;  %v278_v29 = vpack.c.b16 %v251_v24, %v251_v24  ;;  %v1009_v34 = vld [vmem:[%s1827_s0 + $0x6c] sm:$0xf0]  ;;  %v1414_v39 = vld [vmem:[%s1825_s1 + $0x218] sm:$0xff] }
  0x25   :  { %v1012_v36 = vor.u32 %v1338_v33, %v1009_v34 }
  0x26   :  { %767 = vmatpush.bf16.msrb.mxu1 %v1361_v38  ;;  %836 = vmatpush.bf16.msrb.mxu0 %v1385_v40  ;;  %v1344_v38 = vld [vmem:[%s1827_s0 + $0x78] sm:$0xf0]  ;;  %v995_v40 = vld [vmem:[%s1827_s0 + $0x18] sm:$0xf] }
  0x27   :  { %882 = vmatpush.bf16.msrb.mxu2 %v1401_v41  ;;  %v1336_v41 = vld [vmem:[%s1827_s0 + $0x38] sm:$0xf0] }
  0x28   :  { %905 = vmatpush.bf16.msrb.mxu3 %v1409_v44  ;;  %v996_v44 = vor.u32 %v1336_v41, %v995_v40 }
  0x2a   :  { %768 = vmatpush.bf16.msrb.mxu1 %v1360_v43  ;;  %837 = vmatpush.bf16.msrb.mxu0 %v1384_v45  ;;  %v1024_v43 = vor.u32 %v1344_v38, %v1023_v37  ;;  %v1332_v45 = vld [vmem:[%s1827_s0 + $0x1c] sm:$0xf] }
  0x2b   :  { %883 = vmatpush.bf16.msrb.mxu2 %v1400_v46  ;;  %v997_v46 = vld [vmem:[%s1827_s0 + $0x3c] sm:$0xf0] }
  0x2c   :  { %906 = vmatpush.bf16.msrb.mxu3 %v1408_v48  ;;  %v1388_v48 = vld [vmem:[%s1825_s1 + $0x148] sm:$0xff] }
  0x2e   :  { %769 = vmatpush.bf16.msrb.mxu1 %v1359_v47  ;;  %838 = vmatpush.bf16.msrb.mxu0 %v1383_v49  ;;  %v1413_v47 = vld [vmem:[%s1825_s1 + $0x210] sm:$0xff]  ;;  %v1000_v49 = vor.u32 %v1332_v45, %v997_v46 }
  0x2f   :  { %884 = vmatpush.bf16.msrb.mxu2 %v1399_v50  ;;  %v1412_v50 = vld [vmem:[%s1825_s1 + $0x208] sm:$0xff] }
  0x30   :  { %907 = vmatpush.bf16.msrb.mxu3 %v1407_v62  ;;  %v1036_v62 = vor.u32 %v1341_v60, %v1033_v61 }
  0x31   :  { %756 = vmatmul.bf16.gmra.mxu0 %v1008_v58 }
  0x32   :  { %770 = vmatpush.bf16.msrb.mxu1 %v1358_v53  ;;  %839 = vmatpush.bf16.msrb.mxu0 %v1382_v56  ;;  %v36_v53 = vld [vmem:[%s1827_s0 + $0xa0] sm:$0xff]  ;;  %v276_v56 = vpack.c.b16 %v249_v52, %v249_v52 }
  0x33   :  { %885 = vmatpush.bf16.msrb.mxu2 %v1398_v57  ;;  %825 = vmatmul.bf16.gmra.mxu3 %v1020_v2  ;;  %v252_v55 = vunpack.c.l.b16 %v36_v53  ;;  %v1031_v57 = vld [vmem:[%s1827_s0 + $0x60] sm:$0xf]  ;;  %v253_v20 = vunpack.c.h.b16 %v36_v53 }
  0x34   :  { %802 = vmatmul.bf16.gmra.mxu2 %v1016_v59  ;;  %908 = vmatpush.bf16.msrb.mxu3 %v1406_v3  ;;  %v1032_v59 = vor.u32 %v1345_v19, %v1031_v57  ;;  %v1003_v3 = vld [vmem:[%s1827_s0 + $0x20] sm:$0xf] }
  0x35   :  { %v279_v58 = vpack.c.b16 %v252_v55, %v252_v55 }
  0x36   :  { %771 = vmatpush.bf16.msrb.mxu1 %v1357_v63  ;;  %840 = vmatpush.bf16.msrb.mxu0 %v1381_v0  ;;  %v1331_v63 = vld [vmem:[%s1827_s0 + $0x14] sm:$0xf]  ;;  %v989_v0 = vld [vmem:[%s1827_s0 + $0x34] sm:$0xf0] }
  0x37   :  { %886 = vmatpush.bf16.msrb.mxu2 %v1397_v1  ;;  %v37_v1 = vld [vmem:[%s1827_s0 + $0xa8] sm:$0xff]  ;;  %v992_v2 = vor.u32 %v1331_v63, %v989_v0 }
  0x38   :  { %909 = vmatpush.bf16.msrb.mxu3 %v1405_v8 }
  0x3a   :  { %772 = vmatpush.bf16.msrb.mxu1 %v1356_v4  ;;  %841 = vmatpush.bf16.msrb.mxu0 %v1380_v5  ;;  %v1337_v4 = vld [vmem:[%s1827_s0 + $0x40] sm:$0xf0]  ;;  %v254_v5 = vunpack.c.l.b16 %v37_v1 }
  0x3b   :  { %887 = vmatpush.bf16.msrb.mxu2 %v1396_v6  ;;  %v1004_v6 = vor.u32 %v1337_v4, %v1003_v3 }
  0x3c   :  { %910 = vmatpush.bf16.msrb.mxu3 %v1404_v21  ;;  %v281_v8 = vpack.c.b16 %v254_v5, %v254_v5  ;;  %v280_v21 = vpack.c.b16 %v253_v20, %v253_v20 }
  0x3e   :  { %773 = vmatpush.bf16.msrb.mxu1 %v1355_v7  ;;  %842 = vmatpush.bf16.msrb.mxu0 %v1379_v13  ;;  %v255_v7 = vunpack.c.h.b16 %v37_v1  ;;  %v1028_v13 = vor.u32 %v1340_v10, %v1025_v11 }
  0x3f   :  { %888 = vmatpush.bf16.msrb.mxu2 %v1395_v15  ;;  %v1346_v15 = vld [vmem:[%s1827_s0 + $0x88] sm:$0xf0] }
  0x40   :  { %911 = vmatpush.bf16.msrb.mxu3 %v1403_v27  ;;  %v282_v9 = vpack.c.b16 %v255_v7, %v255_v7 }
  0x41   :  { %774 = vmatmul.bf16.vlgmr.msrb.gmra.mxu1 %v976_v16  ;;  %843 = vmatmul.bf16.vlgmr.msrb.gmra.mxu0 %v988_v23 }
  0x42   :  { %858 = vmatpush.bf16.msra.mxu1 %v1394_v12  ;;  %927 = vmatpush.bf16.msra.mxu0 %v1418_v14  ;;  %v38_v12 = vld [vmem:[%s1827_s0 + $0xb0] sm:$0xf] }
  0x43   :  { %1438 = vmatpush.bf16.msra.mxu2 %v1418_v14  ;;  %830 = vmatmul.bf16.gmra.mxu3 %v278_v29  ;;  %v1039_v14 = vld [vmem:[%s1827_s0 + $0x68] sm:$0xf]  ;;  %v256_v16 = vunpack.c.l.b16 %v38_v12 }
  0x44   :  { %807 = vmatmul.bf16.gmra.mxu2 %v277_v25  ;;  %v1040_v17 = vor.u32 %v1346_v15, %v1039_v14 }
  0x45   :  { %v283_v18 = vpack.c.b16 %v256_v16, %v256_v16 }
  0x46   :  { %859 = vmatpush.bf16.msra.mxu1 %v1393_v22  ;;  %928 = vmatpush.bf16.msra.mxu0 %v1417_v26 }
  0x47   :  { %1439 = vmatpush.bf16.msra.mxu2 %v1417_v26 }
  0x4a   :  { %860 = vmatpush.bf16.msra.mxu1 %v1392_v28  ;;  %929 = vmatpush.bf16.msra.mxu0 %v1416_v30 }
  0x4b   :  { %1440 = vmatpush.bf16.msra.mxu2 %v1416_v30 }
  0x4e   :  { %861 = vmatpush.bf16.msra.mxu1 %v1391_v31  ;;  %930 = vmatpush.bf16.msra.mxu0 %v1415_v32 }
  0x4f   :  { %1441 = vmatpush.bf16.msra.mxu2 %v1415_v32  ;;  %v1446_v32 = vld [vmem:[%s1826_s2] ss:$0 sm:$0xff] }
  0x51   :  { %779 = vmatmul.bf16.gmra.mxu1 %v1012_v36  ;;  %848 = vmatmul.bf16.gmra.mxu0 %v1024_v43 }
  0x52   :  { %862 = vmatpush.bf16.msra.mxu1 %v1390_v35  ;;  %931 = vmatpush.bf16.msra.mxu0 %v1414_v39 }
  0x53   :  { %1442 = vmatpush.bf16.msra.mxu2 %v1414_v39  ;;  %912 = vmatmul.bf16.vlgmr.msrb.gmra.mxu3 %v1000_v49 }
  0x54   :  { %889 = vmatmul.bf16.vlgmr.msrb.gmra.mxu2 %v996_v44 }
  0x56   :  { %863 = vmatpush.bf16.msra.mxu1 %v1389_v42  ;;  %932 = vmatpush.bf16.msra.mxu0 %v1413_v47 }
  0x57   :  { %1443 = vmatpush.bf16.msra.mxu2 %v1413_v47 }
  0x5a   :  { %864 = vmatpush.bf16.msra.mxu1 %v1388_v48  ;;  %933 = vmatpush.bf16.msra.mxu0 %v1412_v50 }
  0x5b   :  { %1444 = vmatpush.bf16.msra.mxu2 %v1412_v50 }
  0x5e   :  { %865 = vmatpush.bf16.msra.mxu1 %v1387_v51  ;;  %934 = vmatpush.bf16.msra.mxu0 %v1411_v54 }
  0x5f   :  { %1445 = vmatpush.bf16.msra.mxu2 %v1411_v54 }
  0x61   :  { %784 = vmatmul.bf16.gmra.mxu1 %v276_v56  ;;  %853 = vmatmul.bf16.gmra.mxu0 %v279_v58 }
  0x63   :  { %917 = vmatmul.bf16.gmra.mxu3 %v1036_v62 }
  0x64   :  { %894 = vmatmul.bf16.gmra.mxu2 %v1032_v59 }
  0x71   :  { %866 = vmatmul.bf16.vlgmr.msra.gmra.mxu1 %v992_v2  ;;  %935 = vmatmul.bf16.vlgmr.msra.gmra.mxu0 %v1004_v6 }
  0x73   :  { %922 = vmatmul.bf16.gmra.mxu3 %v282_v9 }
  0x74   :  { %899 = vmatmul.bf16.gmra.mxu2 %v281_v8 }
  0x81   :  { %871 = vmatmul.bf16.gmra.mxu1 %v1028_v13  ;;  %940 = vmatmul.bf16.gmra.mxu0 %v1040_v17 }
  0x84   :  { %945 = vmatmul.bf16.vlgmr.msra.gmra.mxu2 %v283_v18 }
  0x91   :  { %876 = vmatmul.bf16.gmra.mxu1 %v280_v21 }
  0x9e   :  { %v752_v22 = vpop.f32.mrf.mxu0  ;;  %v762_v23 = vpop.f32.mrf.mxu1 }
  0x9f   :  { %v753_v35 = vadd.f32 %v1446_v32, %v752_v22  ;;  %v763_v0 = vadd.f32 %v1446_v32, %v762_v23 }
  0xa6   :  { %v754_v25 = vpop.f32.mrf.mxu0  ;;  %v764_v26 = vpop.f32.mrf.mxu1 }
  0xa7   :  { %v798_v24 = vpop.f32.mrf.mxu2  ;;  %v821_v27 = vpop.f32.mrf.mxu3  ;;  %v755_v43 = vadd.f32 %v1446_v32, %v754_v25 }
  0xae   :  { %v757_v29 = vpop.f32.mrf.mxu0 }
  0xaf   :  { %v800_v28 = vpop.f32.mrf.mxu2  ;;  %v823_v30 = vpop.f32.mrf.mxu3  ;;  %v758_v50 = vadd.f32 %v1446_v32, %v757_v29 }
  0xb6   :  { %v759_v33 = vpop.f32.mrf.mxu0 }
  0xb7   :  { %v803_v31 = vpop.f32.mrf.mxu2  ;;  %v826_v34 = vpop.f32.mrf.mxu3  ;;  %v760_v19 = vadd.f32 %v1446_v32, %v759_v33 }
  0xbe   :  { %v775_v36 = vpop.f32.mrf.mxu1  ;;  %v844_v40 = vpop.f32.mrf.mxu0 }
  0xbf   :  { %v776_v37 = vadd.f32 %v775_v36, %v753_v35  ;;  %v805_v38 = vpop.f32.mrf.mxu2  ;;  %v828_v42 = vpop.f32.mrf.mxu3 }
  0xc1   :  { %v799_v39 = vadd.f32 %v798_v24, %v776_v37 }
  0xc3   :  { %v822_v41 = vadd.f32 %v821_v27, %v799_v39 }
  0xc5   :  { %v845_v11 = vadd.f32 %v844_v40, %v822_v41 }
  0xc6   :  { %v777_v44 = vpop.f32.mrf.mxu1  ;;  %v846_v48 = vpop.f32.mrf.mxu0 }
  0xc7   :  { %v778_v45 = vadd.f32 %v777_v44, %v755_v43  ;;  %v808_v46 = vpop.f32.mrf.mxu2  ;;  %v1813_v49 = vpop.f32.mrf.mxu3 }
  0xc9   :  { %v801_v47 = vadd.f32 %v800_v28, %v778_v45 }
  0xcb   :  { %v824_v15 = vadd.f32 %v823_v30, %v801_v47 }
  0xcd   :  { %v847_v20 = vadd.f32 %v846_v48, %v824_v15 }
  0xce   :  { %v780_v51 = vpop.f32.mrf.mxu1  ;;  %v849_v55 = vpop.f32.mrf.mxu0 }
  0xcf   :  { %v781_v52 = vadd.f32 %v780_v51, %v758_v50  ;;  %v810_v53 = vpop.f32.mrf.mxu2  ;;  %v833_v57 = vpop.f32.mrf.mxu3 }
  0xd1   :  { %v804_v54 = vadd.f32 %v803_v31, %v781_v52 }
  0xd3   :  { %v827_v56 = vadd.f32 %v826_v34, %v804_v54 }
  0xd5   :  { %v850_v31 = vadd.f32 %v849_v55, %v827_v56 }
  0xd6   :  { %v782_v58 = vpop.f32.mrf.mxu1  ;;  %v851_v62 = vpop.f32.mrf.mxu0 }
  0xd7   :  { %v783_v59 = vadd.f32 %v782_v58, %v760_v19  ;;  %v890_v60 = vpop.f32.mrf.mxu2  ;;  %v913_v63 = vpop.f32.mrf.mxu3 }
  0xd9   :  { %v806_v61 = vadd.f32 %v805_v38, %v783_v59 }
  0xdb   :  { %v829_v37 = vadd.f32 %v828_v42, %v806_v61 }
  0xdd   :  { %v852_v43 = vadd.f32 %v851_v62, %v829_v37 }
  0xde   :  { %v785_v1 = vpop.f32.mrf.mxu1  ;;  %v854_v5 = vpop.f32.mrf.mxu0 }
  0xdf   :  { %v786_v2 = vadd.f32 %v785_v1, %v763_v0  ;;  %v892_v3 = vpop.f32.mrf.mxu2  ;;  %v915_v6 = vpop.f32.mrf.mxu3 }
  0xe1   :  { %v809_v4 = vadd.f32 %v808_v46, %v786_v2 }
  0xe3   :  { %v832_v48 = vadd.f32 %v1813_v49, %v809_v4 }
  0xe5   :  { %v855_v42 = vadd.f32 %v854_v5, %v832_v48 }
  0xe6   :  { %v787_v7 = vpop.f32.mrf.mxu1  ;;  %v856_v9 = vpop.f32.mrf.mxu0 }
  0xe7   :  { %v895_v8 = vpop.f32.mrf.mxu2  ;;  %v918_v10 = vpop.f32.mrf.mxu3 }
  0xee   :  { %v867_v12 = vpop.f32.mrf.mxu1  ;;  %v936_v16 = vpop.f32.mrf.mxu0 }
  0xef   :  { %v868_v13 = vadd.f32 %v867_v12, %v845_v11  ;;  %v897_v14 = vpop.f32.mrf.mxu2  ;;  %v920_v18 = vpop.f32.mrf.mxu3 }
  0xf1   :  { %v891_v17 = vadd.f32 %v890_v60, %v868_v13 }
  0xf3   :  { %v914_v22 = vadd.f32 %v913_v63, %v891_v17 }
  0xf5   :  { %v937_v27 = vadd.f32 %v936_v16, %v914_v22 }
  0xf6   :  { %v869_v21 = vpop.f32.mrf.mxu1  ;;  %v938_v26 = vpop.f32.mrf.mxu0 }
  0xf7   :  { %v870_v23 = vadd.f32 %v869_v21, %v847_v20  ;;  %v900_v24 = vpop.f32.mrf.mxu2  ;;  %v923_v29 = vpop.f32.mrf.mxu3  ;;  %v950_v34 = vmax.f32 %v937_v27, 0.0 }
  0xf9   :  { %v893_v25 = vadd.f32 %v892_v3, %v870_v23 }
  0xfb   :  { %v916_v28 = vadd.f32 %v915_v6, %v893_v25 }
  0xfd   :  { %v939_v32 = vadd.f32 %v938_v26, %v916_v28 }
  0xfe   :  { %v872_v33 = vpop.f32.mrf.mxu1  ;;  %v941_v39 = vpop.f32.mrf.mxu0 }
  0xff   :  { %v951_v35 = vmax.f32 %v939_v32, 0.0  ;;  %v873_v36 = vadd.f32 %v872_v33, %v850_v31  ;;  %v902_v30 = vpop.f32.mrf.mxu2  ;;  %v925_v41 = vpop.f32.mrf.mxu3 }
 0x101   :  { %v1422_v38 = vpack.c.bf16 %v951_v35, %v950_v34  ;;  %v896_v40 = vadd.f32 %v895_v8, %v873_v36 }
 0x103   :  { %1423 = vst [vmem:[%s1828_s3] sm:$0xff] %v1422_v38   ;;  %v919_v45 = vadd.f32 %v918_v10, %v896_v40 }
 0x105   :  { %v942_v52 = vadd.f32 %v941_v39, %v919_v45 }
 0x106   :  { %v874_v44 = vpop.f32.mrf.mxu1  ;;  %v943_v51 = vpop.f32.mrf.mxu0 }
 0x107   :  { %v875_v46 = vadd.f32 %v874_v44, %v852_v43  ;;  %v946_v47 = vpop.f32.mrf.mxu2  ;;  %v952_v56 = vmax.f32 %v942_v52, 0.0 }
 0x109   :  { %v898_v50 = vadd.f32 %v897_v14, %v875_v46 }
 0x10b   :  { %v921_v53 = vadd.f32 %v920_v18, %v898_v50 }
 0x10d   :  { %v944_v54 = vadd.f32 %v943_v51, %v921_v53 }
 0x10e   :  { %v877_v55 = vpop.f32.mrf.mxu1 }
 0x10f   :  { %v953_v57 = vmax.f32 %v944_v54, 0.0  ;;  %v878_v19 = vadd.f32 %v877_v55, %v855_v42  ;;  %v948_v58 = vpop.f32.mrf.mxu2 }
 0x111   :  { %v1427_v59 = vpack.c.bf16 %v953_v57, %v952_v56  ;;  %v901_v60 = vadd.f32 %v900_v24, %v878_v19 }
 0x113   :  { %1429 = vst [vmem:[%s1828_s3 + $0x8] sm:$0xff] %v1427_v59   ;;  %v924_v61 = vadd.f32 %v923_v29, %v901_v60 }
 0x115   :  { %v947_v62 = vadd.f32 %v946_v47, %v924_v61 }
 0x116   :  { %v879_v49 = vpop.f32.mrf.mxu1 }
 0x117   :  { %v954_v63 = vmax.f32 %v947_v62, 0.0 }
 0x119   :  { %v959_v0 = vpack.c.bf16 %v954_v63, %v954_v63 }
 0x11b   :  { %964 = vst [vmem:[%s1828_s3 + $0x10] sm:$0xf] %v959_v0 }

// kernel: fcos_snake_forward.10
= control target key start
LH: loop header
LB: loop body
LE: loop exit
PB: predicated region body
PF: predicated region fallthrough
CT: control target
= control target key end

     0   :  { %vm353_vm0 = vcmask 261120   ;;  %s1266_s1 = inlined_call_operand.vmem [shape: bf16[288,128], index: 1, kind: input, shape index: {}]   ;;  %s1267_s0 = inlined_call_operand.vmem [shape: bf16[160,288], index: 0, kind: input, shape index: {}]   ;;  %s1268_s2 = inlined_call_operand.vmem [shape: f32[1,128], index: 2, kind: input, shape index: {}]   ;;  %s1269_s3 = inlined_call_operand.vmem [shape: bf16[160,128], index: 3, kind: output, shape index: {}]  }
   0x1   :  { %v844_v0 = vld [vmem:[%s1266_s1 + $0x38] sm:$0xff]  ;;  %v962_v2 = vld [vmem:[%s1266_s1 + $0x88] sm:$0xff]  ;;  %v843_v3 = vld [vmem:[%s1266_s1 + $0x30] sm:$0xff] }
   0x2   :  { %v852_v1 = vld [vmem:[%s1266_s1 + $0x78] sm:$0xff]  ;;  %384 = vmatpush.bf16.msra.mxu0 %v844_v0  ;;  %914 = vmatpush.bf16.msra.mxu3 %v844_v0  ;;  %v851_v4 = vld [vmem:[%s1266_s1 + $0x70] sm:$0xff]  ;;  %v974_v5 = vld [vmem:[%s1266_s1 + $0x80] sm:$0xff] }
   0x3   :  { %443 = vmatpush.bf16.msra.mxu1 %v852_v1  ;;  %508 = vmatpush.bf16.msra.mxu2 %v962_v2  ;;  %v615_v6 = vld [vmem:[%s1267_s0 + $0x8] sm:$0xf]  ;;  %v809_v7 = vld [vmem:[%s1267_s0 + $0x10] sm:$0xf0]  ;;  %v841_v11 = vld [vmem:[%s1266_s1 + $0x20] sm:$0xff] }
   0x4   :  { %v616_v8 = vor.u32 %v809_v7, %v615_v6  ;;  %v842_v9 = vld [vmem:[%s1266_s1 + $0x28] sm:$0xff]  ;;  %v849_v12 = vld [vmem:[%s1266_s1 + $0x60] sm:$0xff]  ;;  %v840_v13 = vld [vmem:[%s1266_s1 + $0x18] sm:$0xff] }
   0x5   :  { %v850_v10 = vld [vmem:[%s1266_s1 + $0x68] sm:$0xff]  ;;  %v848_v14 = vld [vmem:[%s1266_s1 + $0x58] sm:$0xff]  ;;  %v839_v15 = vld [vmem:[%s1266_s1 + $0x10] sm:$0xff] }
   0x6   :  { %385 = vmatpush.bf16.msra.mxu0 %v843_v3  ;;  %915 = vmatpush.bf16.msra.mxu3 %v843_v3  ;;  %v847_v16 = vld [vmem:[%s1266_s1 + $0x50] sm:$0xff]  ;;  %v627_v17 = vld [vmem:[%s1267_s0 + $0x20] sm:$0xf]  ;;  %v812_v18 = vld [vmem:[%s1267_s0 + $0x28] sm:$0xf0] }
   0x7   :  { %444 = vmatpush.bf16.msra.mxu1 %v851_v4  ;;  %509 = vmatpush.bf16.msra.mxu2 %v974_v5  ;;  %v628_v19 = vor.u32 %v812_v18, %v627_v17  ;;  %v838_v20 = vld [vmem:[%s1266_s1 + $0x8] sm:$0xff]  ;;  %v837_v22 = vld [vmem:[%s1266_s1] sm:$0xff]  ;;  %v609_v29 = vld [vmem:[%s1267_s0 + $0xc] sm:$0xf0] }
   0x8   :  { %v846_v21 = vld [vmem:[%s1266_s1 + $0x48] sm:$0xff]  ;;  %v845_v23 = vld [vmem:[%s1266_s1 + $0x40] sm:$0xff]  ;;  %v639_v33 = vld [vmem:[%s1267_s0 + $0x38] sm:$0xf] }
   0x9   :  { %v607_v24 = vld [vmem:[%s1267_s0] sm:$0xf]  ;;  %v808_v25 = vld [vmem:[%s1267_s0 + $0x8] sm:$0xf0]  ;;  %v807_v28 = vld [vmem:[%s1267_s0 + $0x4] sm:$0xf] }
   0xa   :  { %797 = vmatmul.msk.bf16.vlgmr.msra.gmra.mxu2 %vm353_vm0, %v616_v8  ;;  %386 = vmatpush.bf16.msra.mxu0 %v842_v9  ;;  %v703_v26 = vld [vmem:[%s1267_s0 + $0xc0] sm:$0xf]  ;;  %v832_v27 = vld [vmem:[%s1267_s0 + $0xc8] sm:$0xf0]  ;;  %v608_v30 = vor.u32 %v808_v25, %v607_v24  ;;  %v612_v32 = vor.u32 %v807_v28, %v609_v29  ;;  %v815_v34 = vld [vmem:[%s1267_s0 + $0x40] sm:$0xf0] }
   0xb   :  { %916 = vmatpush.bf16.msra.mxu3 %v842_v9  ;;  %445 = vmatpush.bf16.msra.mxu1 %v850_v10  ;;  %v704_v31 = vor.u32 %v832_v27, %v703_v26  ;;  %v640_v35 = vor.u32 %v815_v34, %v639_v33  ;;  %v619_v36 = vld [vmem:[%s1267_s0 + $0x18] sm:$0xf]  ;;  %v811_v37 = vld [vmem:[%s1267_s0 + $0x20] sm:$0xf0]  ;;  %v810_v40 = vld [vmem:[%s1267_s0 + $0x1c] sm:$0xf] }
   0xc   :  { %v715_v38 = vld [vmem:[%s1267_s0 + $0xd8] sm:$0xf]  ;;  %v835_v39 = vld [vmem:[%s1267_s0 + $0xe0] sm:$0xf0]  ;;  %v621_v41 = vld [vmem:[%s1267_s0 + $0x24] sm:$0xf0]  ;;  %v620_v42 = vor.u32 %v811_v37, %v619_v36 }
   0xd   :  { %v716_v43 = vor.u32 %v835_v39, %v715_v38  ;;  %v624_v44 = vor.u32 %v810_v40, %v621_v41  ;;  %v651_v45 = vld [vmem:[%s1267_s0 + $0x50] sm:$0xf]  ;;  %v818_v46 = vld [vmem:[%s1267_s0 + $0x58] sm:$0xf0]  ;;  %v813_v50 = vld [vmem:[%s1267_s0 + $0x34] sm:$0xf] }
   0xe   :  { %387 = vmatpush.bf16.msra.mxu0 %v841_v11  ;;  %v652_v47 = vor.u32 %v818_v46, %v651_v45  ;;  %v631_v48 = vld [vmem:[%s1267_s0 + $0x30] sm:$0xf]  ;;  %v814_v49 = vld [vmem:[%s1267_s0 + $0x38] sm:$0xf0]  ;;  %v633_v51 = vld [vmem:[%s1267_s0 + $0x3c] sm:$0xf0] }
   0xf   :  { %917 = vmatpush.bf16.msra.mxu3 %v841_v11  ;;  %446 = vmatpush.bf16.msra.mxu1 %v849_v12  ;;  %v831_v52 = vld [vmem:[%s1267_s0 + $0xc4] sm:$0xf]  ;;  %v705_v53 = vld [vmem:[%s1267_s0 + $0xcc] sm:$0xf0]  ;;  %v632_v54 = vor.u32 %v814_v49, %v631_v48  ;;  %v636_v55 = vor.u32 %v813_v50, %v633_v51  ;;  %v663_v57 = vld [vmem:[%s1267_s0 + $0x68] sm:$0xf] }
  0x10   :  { %v708_v56 = vor.u32 %v831_v52, %v705_v53  ;;  %v821_v58 = vld [vmem:[%s1267_s0 + $0x70] sm:$0xf0]  ;;  %v643_v60 = vld [vmem:[%s1267_s0 + $0x48] sm:$0xf]  ;;  %v816_v62 = vld [vmem:[%s1267_s0 + $0x4c] sm:$0xf] }
  0x11   :  { %v664_v59 = vor.u32 %v821_v58, %v663_v57  ;;  %v817_v61 = vld [vmem:[%s1267_s0 + $0x50] sm:$0xf0]  ;;  %v645_v63 = vld [vmem:[%s1267_s0 + $0x54] sm:$0xf0]  ;;  %v834_v0 = vld [vmem:[%s1267_s0 + $0xdc] sm:$0xf] }
  0x12   :  { %388 = vmatpush.bf16.msra.mxu0 %v840_v13  ;;  %v648_v3 = vor.u32 %v816_v62, %v645_v63  ;;  %v824_v6 = vld [vmem:[%s1267_s0 + $0x88] sm:$0xf0]  ;;  %v655_v8 = vld [vmem:[%s1267_s0 + $0x60] sm:$0xf]  ;;  %v657_v11 = vld [vmem:[%s1267_s0 + $0x6c] sm:$0xf0] }
  0x13   :  { %918 = vmatpush.bf16.msra.mxu3 %v840_v13  ;;  %447 = vmatpush.bf16.msra.mxu1 %v848_v14  ;;  %v820_v9 = vld [vmem:[%s1267_s0 + $0x68] sm:$0xf0]  ;;  %v687_v17 = vld [vmem:[%s1267_s0 + $0x98] sm:$0xf]  ;;  %v827_v18 = vld [vmem:[%s1267_s0 + $0xa0] sm:$0xf0] }
  0x14   :  { %v836_v13 = vld [vmem:[%s1267_s0 + $0xe8] sm:$0xf0]  ;;  %v699_v26 = vld [vmem:[%s1267_s0 + $0xb0] sm:$0xf]  ;;  %v830_v27 = vld [vmem:[%s1267_s0 + $0xb8] sm:$0xf0] }
  0x15   :  { %v700_v28 = vor.u32 %v830_v27, %v699_v26  ;;  %v679_v29 = vld [vmem:[%s1267_s0 + $0x90] sm:$0xf]  ;;  %v833_v36 = vld [vmem:[%s1267_s0 + $0xd0] sm:$0xf0]  ;;  %v691_v38 = vld [vmem:[%s1267_s0 + $0xa8] sm:$0xf] }
  0x16   :  { %389 = vmatpush.bf16.msra.mxu0 %v839_v15  ;;  %v829_v39 = vld [vmem:[%s1267_s0 + $0xb0] sm:$0xf0]  ;;  %v828_v40 = vld [vmem:[%s1267_s0 + $0xac] sm:$0xf]  ;;  %v693_v41 = vld [vmem:[%s1267_s0 + $0xb4] sm:$0xf0] }
  0x17   :  { %919 = vmatpush.bf16.msra.mxu3 %v839_v15  ;;  %448 = vmatpush.bf16.msra.mxu1 %v847_v16  ;;  %v1208_v48 = vld [vmem:[%s1268_s2] ss:$0 sm:$0xff] }
  0x1a   :  { %798 = vmatmul.msk.bf16.gmra.mxu2 %vm353_vm0, %v628_v19  ;;  %390 = vmatpush.bf16.msra.mxu0 %v838_v20  ;;  %v688_v19 = vor.u32 %v827_v18, %v687_v17 }
  0x1b   :  { %920 = vmatpush.bf16.msra.mxu3 %v838_v20  ;;  %449 = vmatpush.bf16.msra.mxu1 %v846_v21  ;;  %v667_v20 = vld [vmem:[%s1267_s0 + $0x78] sm:$0xf] }
  0x1e   :  { %391 = vmatpush.bf16.msra.mxu0 %v837_v22 }
  0x1f   :  { %921 = vmatpush.bf16.msra.mxu3 %v837_v22  ;;  %450 = vmatpush.bf16.msra.mxu1 %v845_v23  ;;  %v822_v22 = vld [vmem:[%s1267_s0 + $0x7c] sm:$0xf] }
  0x21   :  { %392 = vmatmul.bf16.vlgmr.msra.gmra.mxu0 %v608_v30  ;;  %v826_v30 = vld [vmem:[%s1267_s0 + $0x98] sm:$0xf0] }
  0x22   :  { %432 = vmatmul.bf16.vlgmr.msra.gmra.mxu3 %v704_v31  ;;  %451 = vmatmul.bf16.vlgmr.msra.gmra.mxu1 %v612_v32  ;;  %v825_v31 = vld [vmem:[%s1267_s0 + $0x94] sm:$0xf]  ;;  %v681_v32 = vld [vmem:[%s1267_s0 + $0x9c] sm:$0xf0]  ;;  %v680_v33 = vor.u32 %v826_v30, %v679_v29 }
  0x23   :  { %922 = vmatpush.bf16.msrb.mxu3 %v852_v1  ;;  %v717_v1 = vld [vmem:[%s1267_s0 + $0xe4] sm:$0xf0]  ;;  %v684_v34 = vor.u32 %v825_v31, %v681_v32 }
  0x27   :  { %923 = vmatpush.bf16.msrb.mxu3 %v851_v4  ;;  %v720_v4 = vor.u32 %v834_v0, %v717_v1 }
  0x2a   :  { %799 = vmatmul.msk.bf16.gmra.mxu2 %vm353_vm0, %v640_v35  ;;  %v711_v35 = vld [vmem:[%s1267_s0 + $0xc8] sm:$0xf] }
  0x2b   :  { %924 = vmatpush.bf16.msrb.mxu3 %v850_v10  ;;  %v819_v10 = vld [vmem:[%s1267_s0 + $0x64] sm:$0xf]  ;;  %v712_v37 = vor.u32 %v833_v36, %v711_v35 }
  0x2c   :  { %v660_v15 = vor.u32 %v819_v10, %v657_v11 }
  0x2f   :  { %925 = vmatpush.bf16.msrb.mxu3 %v849_v12  ;;  %v723_v12 = vld [vmem:[%s1267_s0 + $0xe0] sm:$0xf] }
  0x31   :  { %397 = vmatmul.bf16.gmra.mxu0 %v620_v42 }
  0x32   :  { %437 = vmatmul.bf16.gmra.mxu3 %v716_v43  ;;  %456 = vmatmul.bf16.gmra.mxu1 %v624_v44  ;;  %v692_v43 = vor.u32 %v829_v39, %v691_v38  ;;  %v696_v44 = vor.u32 %v828_v40, %v693_v41 }
  0x33   :  { %926 = vmatpush.bf16.msrb.mxu3 %v848_v14  ;;  %v656_v14 = vor.u32 %v820_v9, %v655_v8 }
  0x37   :  { %927 = vmatpush.bf16.msrb.mxu3 %v847_v16  ;;  %v724_v16 = vor.u32 %v836_v13, %v723_v12 }
  0x3a   :  { %800 = vmatmul.msk.bf16.gmra.mxu2 %vm353_vm0, %v652_v47 }
  0x3b   :  { %928 = vmatpush.bf16.msrb.mxu3 %v846_v21  ;;  %v823_v21 = vld [vmem:[%s1267_s0 + $0x80] sm:$0xf0] }
  0x3c   :  { %v668_v24 = vor.u32 %v823_v21, %v667_v20 }
  0x3f   :  { %929 = vmatpush.bf16.msrb.mxu3 %v845_v23  ;;  %v669_v23 = vld [vmem:[%s1267_s0 + $0x84] sm:$0xf0] }
  0x40   :  { %v672_v25 = vor.u32 %v822_v22, %v669_v23 }
  0x41   :  { %402 = vmatmul.bf16.gmra.mxu0 %v632_v54 }
  0x42   :  { %461 = vmatmul.bf16.gmra.mxu1 %v636_v55  ;;  %491 = vmatmul.bf16.vlgmr.msrb.gmra.mxu3 %v708_v56 }
  0x43   :  { %930 = vmatpush.bf16.msra.mxu3 %v962_v2  ;;  %v644_v2 = vor.u32 %v817_v61, %v643_v60 }
  0x47   :  { %931 = vmatpush.bf16.msra.mxu3 %v974_v5  ;;  %v675_v5 = vld [vmem:[%s1267_s0 + $0x80] sm:$0xf] }
  0x48   :  { %v676_v7 = vor.u32 %v824_v6, %v675_v5 }
  0x4a   :  { %801 = vmatmul.msk.bf16.gmra.mxu2 %vm353_vm0, %v664_v59 }
  0x51   :  { %407 = vmatmul.bf16.gmra.mxu0 %v644_v2 }
  0x52   :  { %466 = vmatmul.bf16.gmra.mxu1 %v648_v3  ;;  %496 = vmatmul.bf16.gmra.mxu3 %v720_v4 }
  0x5a   :  { %802 = vmatmul.msk.bf16.gmra.mxu2 %vm353_vm0, %v676_v7 }
  0x61   :  { %412 = vmatmul.bf16.gmra.mxu0 %v656_v14 }
  0x62   :  { %471 = vmatmul.bf16.gmra.mxu1 %v660_v15  ;;  %806 = vmatmul.msk.bf16.vlgmr.msra.gmra.mxu3 %vm353_vm0, %v724_v16 }
  0x6a   :  { %803 = vmatmul.msk.bf16.gmra.mxu2 %vm353_vm0, %v688_v19 }
  0x71   :  { %417 = vmatmul.bf16.gmra.mxu0 %v668_v24 }
  0x72   :  { %476 = vmatmul.bf16.gmra.mxu1 %v672_v25 }
  0x7a   :  { %804 = vmatmul.msk.bf16.gmra.mxu2 %vm353_vm0, %v700_v28 }
  0x81   :  { %422 = vmatmul.bf16.gmra.mxu0 %v680_v33 }
  0x82   :  { %481 = vmatmul.bf16.gmra.mxu1 %v684_v34 }
  0x8a   :  { %805 = vmatmul.msk.bf16.gmra.mxu2 %vm353_vm0, %v712_v37 }
  0x8d   :  { %v511_v42 = vpop.f32.mrf.mxu2 }
  0x91   :  { %427 = vmatmul.bf16.gmra.mxu0 %v692_v43 }
  0x92   :  { %486 = vmatmul.bf16.gmra.mxu1 %v696_v44 }
  0x95   :  { %v513_v45 = vpop.f32.mrf.mxu2 }
  0x9d   :  { %v516_v46 = vpop.f32.mrf.mxu2 }
  0x9e   :  { %v393_v47 = vpop.f32.mrf.mxu0 }
  0x9f   :  { %v452_v49 = vpop.f32.mrf.mxu1  ;;  %v394_v50 = vadd.f32 %v1208_v48, %v393_v47 }
  0xa1   :  { %v453_v54 = vadd.f32 %v452_v49, %v394_v50 }
  0xa3   :  { %v512_v58 = vadd.f32 %v511_v42, %v453_v54 }
  0xa5   :  { %v433_v51 = vpop.f32.mrf.mxu3  ;;  %v518_v52 = vpop.f32.mrf.mxu2 }
  0xa6   :  { %v395_v53 = vpop.f32.mrf.mxu0  ;;  %v434_v16 = vadd.f32 %v1208_v48, %v433_v51 }
  0xa7   :  { %v396_v55 = vadd.f32 %v1208_v48, %v395_v53  ;;  %v454_v56 = vpop.f32.mrf.mxu1 }
  0xa9   :  { %v455_v57 = vadd.f32 %v454_v56, %v396_v55 }
  0xab   :  { %v514_v59 = vadd.f32 %v513_v45, %v455_v57 }
  0xad   :  { %v858_v60 = vpack.c.bf16 %v514_v59, %v512_v58  ;;  %v435_v61 = vpop.f32.mrf.mxu3  ;;  %v521_v62 = vpop.f32.mrf.mxu2 }
  0xae   :  { %v398_v63 = vpop.f32.mrf.mxu0  ;;  %v436_v26 = vadd.f32 %v1208_v48, %v435_v61 }
  0xaf   :  { %859 = vst [vmem:[%s1269_s3] sm:$0xff] %v858_v60   ;;  %v457_v0 = vpop.f32.mrf.mxu1  ;;  %v399_v1 = vadd.f32 %v1208_v48, %v398_v63 }
  0xb1   :  { %v458_v5 = vadd.f32 %v457_v0, %v399_v1 }
  0xb3   :  { %v517_v9 = vadd.f32 %v516_v46, %v458_v5 }
  0xb5   :  { %v438_v2 = vpop.f32.mrf.mxu3  ;;  %v523_v3 = vpop.f32.mrf.mxu2 }
  0xb6   :  { %v400_v4 = vpop.f32.mrf.mxu0  ;;  %v439_v54 = vadd.f32 %v1208_v48, %v438_v2 }
  0xb7   :  { %v401_v6 = vadd.f32 %v1208_v48, %v400_v4  ;;  %v459_v7 = vpop.f32.mrf.mxu1 }
  0xb9   :  { %v460_v8 = vadd.f32 %v459_v7, %v401_v6 }
  0xbb   :  { %v519_v10 = vadd.f32 %v518_v52, %v460_v8 }
  0xbd   :  { %v863_v11 = vpack.c.bf16 %v519_v10, %v517_v9  ;;  %v440_v12 = vpop.f32.mrf.mxu3  ;;  %v526_v13 = vpop.f32.mrf.mxu2 }
  0xbe   :  { %v403_v14 = vpop.f32.mrf.mxu0  ;;  %v441_v59 = vadd.f32 %v1208_v48, %v440_v12 }
  0xbf   :  { %905 = vst [vmem:[%s1269_s3 + $0x8] sm:$0xff] %v863_v11   ;;  %v462_v15 = vpop.f32.mrf.mxu1  ;;  %v404_v17 = vadd.f32 %v1208_v48, %v403_v14 }
  0xc1   :  { %v463_v22 = vadd.f32 %v462_v15, %v404_v17 }
  0xc3   :  { %v522_v27 = vadd.f32 %v521_v62, %v463_v22 }
  0xc5   :  { %v492_v18 = vpop.f32.mrf.mxu3  ;;  %v528_v19 = vpop.f32.mrf.mxu2 }
  0xc6   :  { %v1222_v20 = vadd.f32 %v492_v18, %v434_v16  ;;  %v405_v21 = vpop.f32.mrf.mxu0 }
  0xc7   :  { %v406_v23 = vadd.f32 %v1208_v48, %v405_v21  ;;  %v464_v24 = vpop.f32.mrf.mxu1 }
  0xc9   :  { %v465_v25 = vadd.f32 %v464_v24, %v406_v23 }
  0xcb   :  { %v524_v28 = vadd.f32 %v523_v3, %v465_v25 }
  0xcd   :  { %v868_v29 = vpack.c.bf16 %v524_v28, %v522_v27  ;;  %v494_v30 = vpop.f32.mrf.mxu3  ;;  %v531_v31 = vpop.f32.mrf.mxu2 }
  0xce   :  { %v1226_v32 = vadd.f32 %v494_v30, %v436_v26  ;;  %v408_v33 = vpop.f32.mrf.mxu0 }
  0xcf   :  { %906 = vst [vmem:[%s1269_s3 + $0x10] sm:$0xff] %v868_v29   ;;  %v467_v34 = vpop.f32.mrf.mxu1  ;;  %v409_v35 = vadd.f32 %v1208_v48, %v408_v33 }
  0xd1   :  { %v468_v39 = vadd.f32 %v467_v34, %v409_v35 }
  0xd3   :  { %v527_v43 = vadd.f32 %v526_v13, %v468_v39 }
  0xd5   :  { %v497_v36 = vpop.f32.mrf.mxu3  ;;  %v533_v37 = vpop.f32.mrf.mxu2 }
  0xd6   :  { %v410_v38 = vpop.f32.mrf.mxu0  ;;  %v498_v61 = vadd.f32 %v497_v36, %v439_v54 }
  0xd7   :  { %v411_v40 = vadd.f32 %v1208_v48, %v410_v38  ;;  %v469_v41 = vpop.f32.mrf.mxu1 }
  0xd9   :  { %v470_v42 = vadd.f32 %v469_v41, %v411_v40 }
  0xdb   :  { %v529_v44 = vadd.f32 %v528_v19, %v470_v42 }
  0xdd   :  { %v873_v45 = vpack.c.bf16 %v529_v44, %v527_v43  ;;  %v499_v46 = vpop.f32.mrf.mxu3  ;;  %v536_v47 = vpop.f32.mrf.mxu2 }
  0xde   :  { %v413_v49 = vpop.f32.mrf.mxu0  ;;  %v500_v0 = vadd.f32 %v499_v46, %v441_v59 }
  0xdf   :  { %907 = vst [vmem:[%s1269_s3 + $0x18] sm:$0xff] %v873_v45   ;;  %v472_v50 = vpop.f32.mrf.mxu1  ;;  %v414_v51 = vadd.f32 %v1208_v48, %v413_v49 }
  0xe1   :  { %v473_v56 = vadd.f32 %v472_v50, %v414_v51 }
  0xe3   :  { %v532_v62 = vadd.f32 %v531_v31, %v473_v56 }
  0xe5   :  { %v538_v52 = vpop.f32.mrf.mxu2  ;;  %v556_v53 = vpop.f32.mrf.mxu3 }
  0xe6   :  { %v415_v55 = vpop.f32.mrf.mxu0  ;;  %v557_v5 = vadd.f32 %v556_v53, %v498_v61 }
  0xe7   :  { %v416_v57 = vadd.f32 %v1208_v48, %v415_v55  ;;  %v474_v58 = vpop.f32.mrf.mxu1 }
  0xe9   :  { %v475_v60 = vadd.f32 %v474_v58, %v416_v57 }
  0xeb   :  { %v534_v63 = vadd.f32 %v533_v37, %v475_v60 }
  0xed   :  { %v878_v1 = vpack.c.bf16 %v534_v63, %v532_v62  ;;  %v541_v3 = vpop.f32.mrf.mxu2  ;;  %v558_v4 = vpop.f32.mrf.mxu3 }
  0xee   :  { %v559_v6 = vadd.f32 %v558_v4, %v500_v0  ;;  %v418_v7 = vpop.f32.mrf.mxu0 }
  0xef   :  { %908 = vst [vmem:[%s1269_s3 + $0x20] sm:$0xff] %v878_v1   ;;  %v477_v2 = vpop.f32.mrf.mxu1  ;;  %v419_v9 = vadd.f32 %v1208_v48, %v418_v7 }
  0xf0   :  { %v903_v8 = vpack.c.bf16 %v559_v6, %v557_v5 }
  0xf1   :  { %v478_v12 = vadd.f32 %v477_v2, %v419_v9 }
  0xf2   :  { %913 = vst [vmem:[%s1269_s3 + $0x48] sm:$0xff] %v903_v8  }
  0xf3   :  { %v537_v16 = vadd.f32 %v536_v47, %v478_v12 }
  0xf5   :  { %v543_v10 = vpop.f32.mrf.mxu2 }
  0xf6   :  { %v420_v11 = vpop.f32.mrf.mxu0 }
  0xf7   :  { %v421_v13 = vadd.f32 %v1208_v48, %v420_v11  ;;  %v479_v14 = vpop.f32.mrf.mxu1 }
  0xf9   :  { %v480_v15 = vadd.f32 %v479_v14, %v421_v13 }
  0xfb   :  { %v539_v17 = vadd.f32 %v538_v52, %v480_v15 }
  0xfd   :  { %v883_v18 = vpack.c.bf16 %v539_v17, %v537_v16  ;;  %v546_v19 = vpop.f32.mrf.mxu2 }
  0xfe   :  { %v423_v21 = vpop.f32.mrf.mxu0 }
  0xff   :  { %909 = vst [vmem:[%s1269_s3 + $0x28] sm:$0xff] %v883_v18   ;;  %v482_v22 = vpop.f32.mrf.mxu1  ;;  %v424_v23 = vadd.f32 %v1208_v48, %v423_v21 }
 0x101   :  { %v483_v26 = vadd.f32 %v482_v22, %v424_v23 }
 0x103   :  { %v542_v30 = vadd.f32 %v541_v3, %v483_v26 }
 0x105   :  { %v548_v24 = vpop.f32.mrf.mxu2 }
 0x106   :  { %v425_v25 = vpop.f32.mrf.mxu0 }
 0x107   :  { %v426_v27 = vadd.f32 %v1208_v48, %v425_v25  ;;  %v484_v28 = vpop.f32.mrf.mxu1 }
 0x109   :  { %v485_v29 = vadd.f32 %v484_v28, %v426_v27 }
 0x10b   :  { %v544_v31 = vadd.f32 %v543_v10, %v485_v29 }
 0x10d   :  { %v888_v33 = vpack.c.bf16 %v544_v31, %v542_v30  ;;  %v551_v34 = vpop.f32.mrf.mxu2 }
 0x10e   :  { %v428_v35 = vpop.f32.mrf.mxu0  ;;  %v552_v39 = vadd.f32 %v551_v34, %v1222_v20 }
 0x10f   :  { %910 = vst [vmem:[%s1269_s3 + $0x30] sm:$0xff] %v888_v33   ;;  %v487_v36 = vpop.f32.mrf.mxu1  ;;  %v429_v37 = vadd.f32 %v1208_v48, %v428_v35 }
 0x111   :  { %v488_v42 = vadd.f32 %v487_v36, %v429_v37 }
 0x113   :  { %v547_v47 = vadd.f32 %v546_v19, %v488_v42 }
 0x115   :  { %v553_v38 = vpop.f32.mrf.mxu2 }
 0x116   :  { %v554_v40 = vadd.f32 %v553_v38, %v1226_v32  ;;  %v430_v41 = vpop.f32.mrf.mxu0 }
 0x117   :  { %v431_v43 = vadd.f32 %v1208_v48, %v430_v41  ;;  %v489_v45 = vpop.f32.mrf.mxu1 }
 0x118   :  { %v898_v44 = vpack.c.bf16 %v554_v40, %v552_v39 }
 0x119   :  { %v490_v46 = vadd.f32 %v489_v45, %v431_v43 }
 0x11a   :  { %912 = vst [vmem:[%s1269_s3 + $0x40] sm:$0xff] %v898_v44  }
 0x11b   :  { %v549_v49 = vadd.f32 %v548_v24, %v490_v46 }
 0x11d   :  { %v893_v50 = vpack.c.bf16 %v549_v49, %v547_v47 }
 0x11f   :  { %911 = vst [vmem:[%s1269_s3 + $0x38] sm:$0xff] %v893_v50  }

// kernel: fcos_snake_forward.11
= control target key start
LH: loop header
LB: loop body
LE: loop exit
PB: predicated region body
PF: predicated region fallthrough
CT: control target
= control target key end

     0   :  { %s1577_s30 = smov 0   ;;  %s1831_s0 = inlined_call_operand.vmem [shape: f32[8,32,128], index: 0, kind: input, shape index: {}]   ;;  %s1832_s1 = inlined_call_operand.vmem [shape: f32[8,32,2], index: 1, kind: input, shape index: {}]   ;;  %s1833_s2 = inlined_call_operand.vmem [shape: f32[8,1,2], index: 2, kind: input, shape index: {}]   ;;  %s1834_s3 = inlined_call_operand.vmem [shape: bf16[3,128,128], index: 3, kind: input, shape index: {}]   ;;  %s1835_s4 = inlined_call_operand.vmem [shape: f32[1,128], index: 4, kind: input, shape index: {}]   ;;  %s1836_s5 = inlined_call_operand.vmem [shape: bf16[3,128,128], index: 5, kind: input, shape index: {}]   ;;  %s1837_s6 = inlined_call_operand.vmem [shape: f32[1,128], index: 6, kind: input, shape index: {}]   ;;  %s1838_s7 = inlined_call_operand.vmem [shape: bf16[128,8], index: 7, kind: input, shape index: {}]   ;;  %s1839_s8 = inlined_call_operand.vmem [shape: f32[1,8], index: 8, kind: input, shape index: {}]   ;;  %s1840_s9 = inlined_call_operand.vmem [shape: f32[8,32,2], index: 9, kind: output, shape index: {}]  }
   0x1 LB: > { %s1139_s10 = sadd.s32 4294967295, %s1525_s30   ;;  %p1143_p0 = scmp.ge.s32.totalorder %s1525_s30, 1  ;;  %s1525_s30 = sphi %s1577_s30, %s19_s30  }
   0x2   : > { %p305_p1 = scmp.lt.s32.totalorder %s1525_s30, 9 }
   0x4   : > { %p306_p2 = pnand %p1143_p0, %p305_p1 }
   0x5   : > { %p349_p3 = scmp.lt.s32.totalorder (!%p306_p2), %s1139_s10, 7 }
   0x6   : > { %309 = sbr.rel (%p306_p2) target bundleno = 522 (0x20a), region = 56 }
   0xb   : > { %v1458_v0 = vld [vmem:[%s1834_s3 + $0x78] sm:$0xff]  ;;  %v1457_v3 = vld [vmem:[%s1834_s3 + $0x70] sm:$0xff]  ;;  %v1456_v6 = vld [vmem:[%s1834_s3 + $0x68] sm:$0xff]  ;;  %s1842_s10 = smov (!%p349_p3, %s1139_s10), 7  ;;  %v375_v15 = vlaneseq  ;;  %vm1058_vm2 = vcmask 15360  }
   0xc   : > { %v1450_v1 = vld [vmem:[%s1834_s3 + $0x38] sm:$0xff]  ;;  %476 = vmatpush.bf16.msra.mxu0 %v1458_v0  ;;  %v1449_v4 = vld [vmem:[%s1834_s3 + $0x30] sm:$0xff]  ;;  %v1448_v7 = vld [vmem:[%s1834_s3 + $0x28] sm:$0xff]  ;;  %s1624_s16 = sshll.u32 %s1842_s10, 5  ;;  %s361_s24 = scalar_lea.vmem %s1833_s2, %s1842_s10 }
   0xd   : > { %v1466_v2 = vld [vmem:[%s1834_s3 + $0xb8] sm:$0xff]  ;;  %543 = vmatpush.bf16.msra.mxu1 %v1450_v1  ;;  %v1465_v5 = vld [vmem:[%s1834_s3 + $0xb0] sm:$0xff]  ;;  %v1464_v8 = vld [vmem:[%s1834_s3 + $0xa8] sm:$0xff]  ;;  %s353_s25 = scalar_lea.vmem %s1831_s0, %s1624_s16  ;;  %v1651_v23 = vshrl.u32 %v375_v15, 7  ;;  %s358_s11 = scalar_lea.vmem %s1832_s1, %s1624_s16 }
   0xe   : > { %629 = vmatpush.bf16.msra.mxu2 %v1466_v2  ;;  %v1455_v9 = vld [vmem:[%s1834_s3 + $0x60] sm:$0xff]  ;;  %v1454_v12 = vld [vmem:[%s1834_s3 + $0x58] sm:$0xff]  ;;  %v1453_v16 = vld [vmem:[%s1834_s3 + $0x50] sm:$0xff]  ;;  %s366_s17 = scalar_lea.vmem %s1840_s9, %s1624_s16 }
   0xf   : > { %v1447_v10 = vld [vmem:[%s1834_s3 + $0x20] sm:$0xff]  ;;  %v1446_v13 = vld [vmem:[%s1834_s3 + $0x18] sm:$0xff]  ;;  %v1445_v17 = vld [vmem:[%s1834_s3 + $0x10] sm:$0xff]  ;;  %vm377_vm0 = vcmp.lt.s32.totalorder %v1651_v23, 1  ;;  %vm386_vm1 = vcmp.lt.s32.totalorder %v1651_v23, 7 }
  0x10   : > { %477 = vmatpush.bf16.msra.mxu0 %v1457_v3  ;;  %v1463_v11 = vld [vmem:[%s1834_s3 + $0xa0] sm:$0xff]  ;;  %v1462_v14 = vld [vmem:[%s1834_s3 + $0x98] sm:$0xff]  ;;  %v1461_v18 = vld [vmem:[%s1834_s3 + $0x90] sm:$0xff] }
  0x11   : > { %544 = vmatpush.bf16.msra.mxu1 %v1449_v4  ;;  %v1482_v19 = vld [vmem:[%s1836_s5 + $0x78] sm:$0xff]  ;;  %v367_v20 = vld [vmem:[%s353_s25] sm:$0xff]  ;;  %v368_v21 = vld [vmem:[%s353_s25 + $0x8] sm:$0xff] }
  0x12   : > { %630 = vmatpush.bf16.msra.mxu2 %v1465_v5  ;;  %v370_v22 = vld [vmem:[%s353_s25 + $0x18] sm:$0xff]  ;;  %v369_v24 = vld [vmem:[%s353_s25 + $0x10] sm:$0xff]  ;;  %765 = vmatpush.bf16.msra.mxu3 %v1482_v19  ;;  %v1452_v26 = vld [vmem:[%s1834_s3 + $0x48] sm:$0xff]  ;;  %v371_v28 = vrot.slane %v367_v20, 7  ;;  %v372_v29 = vrot.slane %v368_v21, 7  ;;  %v382_v32 = vrot.slane %v367_v20, 1  ;;  %v409_v42 = vpack.c.bf16 %v368_v21, %v367_v20 }
  0x13   : > { %v1481_v25 = vld [vmem:[%s1836_s5 + $0x70] sm:$0xff]  ;;  %v1444_v27 = vld [vmem:[%s1834_s3 + $0x8] sm:$0xff]  ;;  %v374_v30 = vrot.slane %v370_v22, 7  ;;  %v383_v33 = vrot.slane %v368_v21, 1  ;;  %v384_v34 = vrot.slane %v369_v24, 1  ;;  %v1451_v35 = vld [vmem:[%s1834_s3 + $0x40] sm:$0xff]  ;;  %v410_v51 = vpack.c.bf16 %v370_v22, %v369_v24 }
  0x14   : > { %478 = vmatpush.bf16.msra.mxu0 %v1456_v6  ;;  %v1460_v31 = vld [vmem:[%s1834_s3 + $0x88] sm:$0xff]  ;;  %v1443_v36 = vld [vmem:[%s1834_s3] sm:$0xff]  ;;  %v380_v37 = vsel %vm377_vm0, %v371_v28, %v372_v29  ;;  %v373_v45 = vrot.slane %v369_v24, 7  ;;  %v385_v46 = vrot.slane %v370_v22, 1  ;;  %v1490_v55 = vld [vmem:[%s1836_s5 + $0xb8] sm:$0xff] }
  0x15   : > { %545 = vmatpush.bf16.msra.mxu1 %v1448_v7  ;;  %v381_v38 = vsel %vm377_vm0, %v374_v30, %v371_v28  ;;  %v1459_v39 = vld [vmem:[%s1834_s3 + $0x80] sm:$0xff]  ;;  %v388_v40 = vsel %vm386_vm1, %v383_v33, %v384_v34  ;;  %v389_v41 = vsel %vm386_vm1, %v382_v32, %v383_v33  ;;  %v1480_v54 = vld [vmem:[%s1836_s5 + $0x68] sm:$0xff]  ;;  %v1489_v57 = vld [vmem:[%s1836_s5 + $0xb0] sm:$0xff] }
  0x16   : > { %631 = vmatpush.bf16.msra.mxu2 %v1464_v8  ;;  %766 = vmatpush.bf16.msra.mxu3 %v1481_v25  ;;  %v391_v43 = vpack.c.bf16 %v380_v37, %v381_v38  ;;  %v562_v44 = vpack.c.bf16 %v388_v40, %v389_v41  ;;  %v378_v47 = vsel %vm377_vm0, %v373_v45, %v374_v30  ;;  %v1479_v56 = vld [vmem:[%s1836_s5 + $0x60] sm:$0xff]  ;;  %v1478_v58 = vld [vmem:[%s1836_s5 + $0x58] sm:$0xff]  ;;  %v1488_v60 = vld [vmem:[%s1836_s5 + $0xa8] sm:$0xff] }
  0x17   : > { %v379_v48 = vsel %vm377_vm0, %v372_v29, %v373_v45  ;;  %v387_v49 = vsel %vm386_vm1, %v384_v34, %v385_v46  ;;  %v390_v50 = vsel %vm386_vm1, %v385_v46, %v382_v32  ;;  %v1474_v59 = vld [vmem:[%s1836_s5 + $0x38] sm:$0xff]  ;;  %v1477_v61 = vld [vmem:[%s1836_s5 + $0x50] sm:$0xff]  ;;  %v1487_v63 = vld [vmem:[%s1836_s5 + $0xa0] sm:$0xff] }
  0x18   : > { %479 = vmatpush.bf16.msra.mxu0 %v1455_v9  ;;  %v392_v52 = vpack.c.bf16 %v378_v47, %v379_v48  ;;  %v563_v53 = vpack.c.bf16 %v390_v50, %v387_v49  ;;  %v1473_v62 = vld [vmem:[%s1836_s5 + $0x30] sm:$0xff]  ;;  %v1476_v0 = vld [vmem:[%s1836_s5 + $0x48] sm:$0xff]  ;;  %v1486_v2 = vld [vmem:[%s1836_s5 + $0x98] sm:$0xff] }
  0x19   : > { %546 = vmatpush.bf16.msra.mxu1 %v1447_v10  ;;  %v1472_v1 = vld [vmem:[%s1836_s5 + $0x28] sm:$0xff]  ;;  %v1475_v3 = vld [vmem:[%s1836_s5 + $0x40] sm:$0xff]  ;;  %v1485_v5 = vld [vmem:[%s1836_s5 + $0x90] sm:$0xff] }
  0x1a   : > { %632 = vmatpush.bf16.msra.mxu2 %v1463_v11  ;;  %767 = vmatpush.bf16.msra.mxu3 %v1480_v54  ;;  %v1471_v4 = vld [vmem:[%s1836_s5 + $0x20] sm:$0xff]  ;;  %v1470_v6 = vld [vmem:[%s1836_s5 + $0x18] sm:$0xff]  ;;  %v1484_v7 = vld [vmem:[%s1836_s5 + $0x88] sm:$0xff] }
  0x1b   : > { %v1469_v8 = vld [vmem:[%s1836_s5 + $0x10] sm:$0xff]  ;;  %v1483_v9 = vld [vmem:[%s1836_s5 + $0x80] sm:$0xff]  ;;  %v1496_v23 = vld [vmem:[%s1838_s7 + $0x28] sm:$0xff] }
  0x1c   : > { %480 = vmatpush.bf16.msra.mxu0 %v1454_v12  ;;  %v1468_v12 = vld [vmem:[%s1836_s5 + $0x8] sm:$0xff]  ;;  %v1515_v19 = vld [vmem:[%s1835_s4] ss:$0 sm:$0xff] }
  0x1d   : > { %547 = vmatpush.bf16.msra.mxu1 %v1446_v13  ;;  %v1467_v13 = vld [vmem:[%s1836_s5] sm:$0xff] }
  0x1e   : > { %633 = vmatpush.bf16.msra.mxu2 %v1462_v14  ;;  %768 = vmatpush.bf16.msra.mxu3 %v1479_v56 }
  0x20   : > { %481 = vmatpush.bf16.msra.mxu0 %v1453_v16 }
  0x21   : > { %548 = vmatpush.bf16.msra.mxu1 %v1445_v17 }
  0x22   : > { %634 = vmatpush.bf16.msra.mxu2 %v1461_v18  ;;  %769 = vmatpush.bf16.msra.mxu3 %v1478_v58 }
  0x24   : > { %482 = vmatpush.bf16.msra.mxu0 %v1452_v26 }
  0x25   : > { %549 = vmatpush.bf16.msra.mxu1 %v1444_v27 }
  0x26   : > { %635 = vmatpush.bf16.msra.mxu2 %v1460_v31  ;;  %770 = vmatpush.bf16.msra.mxu3 %v1477_v61 }
  0x28   : > { %483 = vmatpush.bf16.msra.mxu0 %v1451_v35 }
  0x29   : > { %550 = vmatpush.bf16.msra.mxu1 %v1443_v36 }
  0x2a   : > { %636 = vmatpush.bf16.msra.mxu2 %v1459_v39  ;;  %771 = vmatpush.bf16.msra.mxu3 %v1476_v0  ;;  %v1498_v0 = vld [vmem:[%s1838_s7 + $0x38] sm:$0xff] }
  0x2b   : > { %484 = vmatmul.bf16.vlgmr.msra.gmra.mxu0 %v409_v42 }
  0x2c   : > { %551 = vmatmul.bf16.vlgmr.msra.gmra.mxu1 %v391_v43  ;;  %832 = vmatpush.bf16.msrb.mxu0 %v1474_v59 }
  0x2d   : > { %637 = vmatmul.bf16.vlgmr.msra.gmra.mxu2 %v562_v44  ;;  %918 = vmatpush.bf16.msrb.mxu1 %v1490_v55 }
  0x2e   : > { %772 = vmatpush.bf16.msra.mxu3 %v1475_v3  ;;  %1023 = vmatpush.bf16.msrb.mxu2 %v1498_v0  ;;  %v1494_v3 = vld [vmem:[%s1838_s7 + $0x18] sm:$0xff] }
  0x30   : > { %833 = vmatpush.bf16.msrb.mxu0 %v1473_v62 }
  0x31   : > { %919 = vmatpush.bf16.msrb.mxu1 %v1489_v57 }
  0x32   : > { %1499 = vmatpush.bf16.msrb.mxu3 %v1474_v59 }
  0x34   : > { %834 = vmatpush.bf16.msrb.mxu0 %v1472_v1 }
  0x35   : > { %920 = vmatpush.bf16.msrb.mxu1 %v1488_v60 }
  0x36   : > { %1500 = vmatpush.bf16.msrb.mxu3 %v1473_v62 }
  0x38   : > { %835 = vmatpush.bf16.msrb.mxu0 %v1471_v4 }
  0x39   : > { %921 = vmatpush.bf16.msrb.mxu1 %v1487_v63 }
  0x3a   : > { %1501 = vmatpush.bf16.msrb.mxu3 %v1472_v1  ;;  %v1497_v1 = vld [vmem:[%s1838_s7 + $0x30] sm:$0xff] }
  0x3b   : > { %489 = vmatmul.bf16.gmra.mxu0 %v410_v51  ;;  %1024 = vmatpush.bf16.msrb.mxu2 %v1497_v1 }
  0x3c   : > { %556 = vmatmul.bf16.gmra.mxu1 %v392_v52  ;;  %836 = vmatpush.bf16.msrb.mxu0 %v1470_v6 }
  0x3d   : > { %642 = vmatmul.bf16.gmra.mxu2 %v563_v53  ;;  %922 = vmatpush.bf16.msrb.mxu1 %v1486_v2  ;;  %v1495_v2 = vld [vmem:[%s1838_s7 + $0x20] sm:$0xff] }
  0x3e   : > { %1502 = vmatpush.bf16.msrb.mxu3 %v1471_v4  ;;  %v1493_v4 = vld [vmem:[%s1838_s7 + $0x10] sm:$0xff] }
  0x3f   : > { %1025 = vmatpush.bf16.msrb.mxu2 %v1496_v23 }
  0x40   : > { %837 = vmatpush.bf16.msrb.mxu0 %v1469_v8 }
  0x41   : > { %923 = vmatpush.bf16.msrb.mxu1 %v1485_v5  ;;  %v1492_v5 = vld [vmem:[%s1838_s7 + $0x8] sm:$0xff] }
  0x42   : > { %1503 = vmatpush.bf16.msrb.mxu3 %v1470_v6  ;;  %v1491_v6 = vld [vmem:[%s1838_s7] sm:$0xff] }
  0x43   : > { %1026 = vmatpush.bf16.msrb.mxu2 %v1495_v2 }
  0x44   : > { %838 = vmatpush.bf16.msrb.mxu0 %v1468_v12 }
  0x45   : > { %924 = vmatpush.bf16.msrb.mxu1 %v1484_v7 }
  0x46   : > { %1504 = vmatpush.bf16.msrb.mxu3 %v1469_v8 }
  0x47   : > { %1027 = vmatpush.bf16.msrb.mxu2 %v1494_v3 }
  0x48   : > { %839 = vmatpush.bf16.msrb.mxu0 %v1467_v13 }
  0x49   : > { %925 = vmatpush.bf16.msrb.mxu1 %v1483_v9 }
  0x4a   : > { %1505 = vmatpush.bf16.msrb.mxu3 %v1468_v12 }
  0x4b   : > { %1028 = vmatpush.bf16.msrb.mxu2 %v1493_v4 }
  0x4e   : > { %1506 = vmatpush.bf16.msrb.mxu3 %v1467_v13 }
  0x4f   : > { %1029 = vmatpush.bf16.msrb.mxu2 %v1492_v5 }
  0x53   : > { %1030 = vmatpush.bf16.msrb.mxu2 %v1491_v6 }
  0xa8   : > { %v485_v10 = vpop.f32.mrf.mxu0 }
  0xa9   : > { %v552_v11 = vpop.f32.mrf.mxu1 }
  0xaa   : > { %v553_v15 = vadd.f32 %v552_v11, %v485_v10 }
  0xb0   : > { %v638_v14 = vpop.f32.mrf.mxu2  ;;  %v487_v16 = vpop.f32.mrf.mxu0 }
  0xb1   : > { %v554_v17 = vpop.f32.mrf.mxu1  ;;  %v648_v18 = vadd.f32 %v638_v14, %v553_v15  ;;  %v1516_v14 = vld [vmem:[%s1837_s6] ss:$0 sm:$0xff] }
  0xb2   : > { %v555_v20 = vadd.f32 %v554_v17, %v487_v16 }
  0xb3   : > { %v656_v22 = vadd.f32 %v1515_v19, %v648_v18 }
  0xb5   : > { %v660_v28 = vmax.f32 %v656_v22, 0.0 }
  0xb7   : > { %v672_v39 = vrot.slane %v660_v28, 1  ;;  %v664_v50 = vrot.slane %v660_v28, 7 }
  0xb8   : > { %v640_v21 = vpop.f32.mrf.mxu2  ;;  %v490_v25 = vpop.f32.mrf.mxu0 }
  0xb9   : > { %v649_v24 = vadd.f32 %v640_v21, %v555_v20  ;;  %v557_v26 = vpop.f32.mrf.mxu1 }
  0xba   : > { %v558_v30 = vadd.f32 %v557_v26, %v490_v25 }
  0xbb   : > { %v657_v27 = vadd.f32 %v1515_v19, %v649_v24 }
  0xbd   : > { %v661_v29 = vmax.f32 %v657_v27, 0.0 }
  0xbf   : > { %v698_v31 = vpack.c.bf16 %v661_v29, %v660_v28  ;;  %v673_v37 = vrot.slane %v661_v29, 1  ;;  %v665_v48 = vrot.slane %v661_v29, 7 }
  0xc0   : > { %v643_v32 = vpop.f32.mrf.mxu2  ;;  %v492_v35 = vpop.f32.mrf.mxu0 }
  0xc1   : > { %v650_v33 = vadd.f32 %v643_v32, %v558_v30  ;;  %773 = vmatmul.bf16.vlgmr.msra.gmra.mxu3 %v698_v31  ;;  %v559_v36 = vpop.f32.mrf.mxu1  ;;  %v678_v45 = vsel %vm386_vm1, %v672_v39, %v673_v37  ;;  %v670_v53 = vsel %vm377_vm0, %v664_v50, %v665_v48 }
  0xc2   : > { %v560_v41 = vadd.f32 %v559_v36, %v492_v35 }
  0xc3   : > { %v658_v34 = vadd.f32 %v1515_v19, %v650_v33 }
  0xc5   : > { %v662_v38 = vmax.f32 %v658_v34, 0.0 }
  0xc7   : > { %v674_v40 = vrot.slane %v662_v38, 1  ;;  %v666_v59 = vrot.slane %v662_v38, 7 }
  0xc8   : > { %v645_v42 = vpop.f32.mrf.mxu2 }
  0xc9   : > { %v651_v43 = vadd.f32 %v645_v42, %v560_v41  ;;  %v677_v44 = vsel %vm386_vm1, %v673_v37, %v674_v40  ;;  %v669_v62 = vsel %vm377_vm0, %v665_v48, %v666_v59  ;;  %v1043_v48 = vld [vmem:[%s358_s11 + $0x8] sm:$0xff] }
  0xca   : > { %v851_v46 = vpack.c.bf16 %v677_v44, %v678_v45 }
  0xcb   : > { %v659_v47 = vadd.f32 %v1515_v19, %v651_v43  ;;  %v1042_v43 = vld [vmem:[%s358_s11] sm:$0xff] }
  0xcc   : > { %926 = vmatmul.bf16.vlgmr.msrb.gmra.mxu1 %v851_v46 }
  0xcd   : > { %v663_v49 = vmax.f32 %v659_v47, 0.0 }
  0xcf   : > { %v667_v51 = vrot.slane %v663_v49, 7  ;;  %v699_v52 = vpack.c.bf16 %v663_v49, %v662_v38  ;;  %v675_v56 = vrot.slane %v663_v49, 1 }
  0xd1   : > { %778 = vmatmul.bf16.gmra.mxu3 %v699_v52  ;;  %v671_v54 = vsel %vm377_vm0, %v667_v51, %v664_v50  ;;  %v676_v57 = vsel %vm386_vm1, %v674_v40, %v675_v56  ;;  %v679_v58 = vsel %vm386_vm1, %v675_v56, %v672_v39  ;;  %v668_v61 = vsel %vm377_vm0, %v666_v59, %v667_v51  ;;  %v1517_v39 = vld [vmem:[%s1839_s8] ss:$0 sm:$0xff] }
  0xd2   : > { %v680_v55 = vpack.c.bf16 %v670_v53, %v671_v54  ;;  %v852_v60 = vpack.c.bf16 %v679_v58, %v676_v57  ;;  %v681_v63 = vpack.c.bf16 %v668_v61, %v669_v62  ;;  %v1518_v40 = vld [vmem:[%s361_s24] ss:$0 sm:$0xff]  ;;  %v1044_v53 = vld [vmem:[%s358_s11 + $0x10] sm:$0xff]  ;;  %v1045_v58 = vld [vmem:[%s358_s11 + $0x18] sm:$0xff] }
  0xd4   : > { %840 = vmatmul.bf16.vlgmr.msrb.gmra.mxu0 %v680_v55 }
  0xdc   : > { %931 = vmatmul.bf16.gmra.mxu1 %v852_v60 }
  0xe1   : > { %845 = vmatmul.bf16.vlgmr.msrb.gmra.mxu3 %v681_v63 }
 0x144   : > { %v774_v7 = vpop.f32.mrf.mxu3 }
 0x149   : > { %v927_v9 = vpop.f32.mrf.mxu1 }
 0x14c   : > { %v776_v8 = vpop.f32.mrf.mxu3 }
 0x151   : > { %v841_v10 = vpop.f32.mrf.mxu0  ;;  %v929_v16 = vpop.f32.mrf.mxu1 }
 0x152   : > { %v842_v11 = vadd.f32 %v841_v10, %v774_v7 }
 0x154   : > { %v779_v12 = vpop.f32.mrf.mxu3  ;;  %v937_v13 = vadd.f32 %v927_v9, %v842_v11 }
 0x156   : > { %v945_v18 = vadd.f32 %v1516_v14, %v937_v13 }
 0x158   : > { %v949_v22 = vmax.f32 %v945_v18, 0.0 }
 0x159   : > { %v843_v15 = vpop.f32.mrf.mxu0  ;;  %v932_v26 = vpop.f32.mrf.mxu1 }
 0x15a   : > { %v844_v17 = vadd.f32 %v843_v15, %v776_v8 }
 0x15c   : > { %v938_v19 = vadd.f32 %v929_v16, %v844_v17  ;;  %v781_v20 = vpop.f32.mrf.mxu3 }
 0x15e   : > { %v946_v21 = vadd.f32 %v1516_v14, %v938_v19 }
 0x160   : > { %v950_v24 = vmax.f32 %v946_v21, 0.0 }
 0x161   : > { %v934_v32 = vpop.f32.mrf.mxu1 }
 0x162   : > { %v953_v25 = vpack.c.bf16 %v950_v24, %v949_v22 }
 0x164   : > { %v846_v27 = vpop.f32.mrf.mxu3  ;;  %1031 = vmatmul.bf16.vlgmr.msrb.gmra.mxu2 %v953_v25 }
 0x165   : > { %v847_v28 = vadd.f32 %v846_v27, %v779_v12 }
 0x167   : > { %v939_v29 = vadd.f32 %v932_v26, %v847_v28 }
 0x169   : > { %v947_v34 = vadd.f32 %v1516_v14, %v939_v29 }
 0x16b   : > { %v951_v36 = vmax.f32 %v947_v34, 0.0 }
 0x16c   : > { %v848_v30 = vpop.f32.mrf.mxu3 }
 0x16d   : > { %v849_v31 = vadd.f32 %v848_v30, %v781_v20 }
 0x16f   : > { %v940_v33 = vadd.f32 %v934_v32, %v849_v31 }
 0x171   : > { %v948_v35 = vadd.f32 %v1516_v14, %v940_v33 }
 0x173   : > { %v952_v37 = vmax.f32 %v948_v35, 0.0 }
 0x175   : > { %v954_v38 = vpack.c.bf16 %v952_v37, %v951_v36 }
 0x177   : > { %1036 = vmatmul.bf16.gmra.mxu2 %v954_v38 }
 0x1e7   : > { %v1032_v41 = vpop.f32.mrf.mxu2 }
 0x1e8   : > { %v1033_v42 = vadd.f32 %v1517_v39, %v1032_v41 }
 0x1ea   : > { %v1050_v44 = vmul.f32 %v1518_v40, %v1033_v42 }
 0x1ec   : > { %v1054_v45 = vadd.f32 %v1050_v44, %v1042_v43 }
 0x1ee   : > { %1059 = vst.msk [vmem:[%s366_s17] sm:$0xff] %vm1058_vm2, %v1054_v45 }
 0x1ef   : > { %v1034_v46 = vpop.f32.mrf.mxu2 }
 0x1f0   : > { %v1035_v47 = vadd.f32 %v1517_v39, %v1034_v46 }
 0x1f2   : > { %v1051_v49 = vmul.f32 %v1518_v40, %v1035_v47 }
 0x1f4   : > { %v1055_v50 = vadd.f32 %v1051_v49, %v1043_v48 }
 0x1f6   : > { %1060 = vst.msk [vmem:[%s366_s17 + $0x8] sm:$0xff] %vm1058_vm2, %v1055_v50 }
 0x1fa   : > { %v1037_v51 = vpop.f32.mrf.mxu2 }
 0x1fb   : > { %v1038_v52 = vadd.f32 %v1517_v39, %v1037_v51 }
 0x1fd   : > { %v1052_v54 = vmul.f32 %v1518_v40, %v1038_v52 }
 0x1ff   : > { %v1056_v55 = vadd.f32 %v1052_v54, %v1044_v53 }
 0x201   : > { %1061 = vst.msk [vmem:[%s366_s17 + $0x10] sm:$0xff] %vm1058_vm2, %v1056_v55 }
 0x202   : > { %v1039_v56 = vpop.f32.mrf.mxu2 }
 0x203   : > { %v1040_v57 = vadd.f32 %v1517_v39, %v1039_v56 }
 0x205   : > { %v1053_v59 = vmul.f32 %v1518_v40, %v1040_v57 }
 0x207   : > { %v1057_v60 = vadd.f32 %v1053_v59, %v1045_v58 }
 0x209   : > { %1062 = vst.msk [vmem:[%s366_s17 + $0x18] sm:$0xff] %vm1058_vm2, %v1057_v60 }
 0x20a PF: > { %s19_s30 = sadd.s32 1, %s1525_s30  }
 0x20b   : > { %p16_p4 = scmp.ge.s32.totalorder %s19_s30, 10  }
 0x20d   :  { %18 = sbr.rel (!%p16_p4) target bundleno = 1 (0x1), region = 96 }

</bundles_post_ra>
